<compile_context>
chip_gen: v5e
topology: v5e:2x2
jax: 0.10.0
libtpu: 0.0.40
codegen_flags: <defaults>
</compile_context>

<pallas_src>
import jax
import jax.numpy as jnp
from jax import lax
from jax.experimental import pallas as pl
from jax.experimental.pallas import tpu as pltpu


def _round_up(v, m):
    return (v + m - 1) // m * m


# ----------------------------------------------------------------------------
# Weight preparation: fold the KW taps + width sliding window into banded
# matrices.  Row layout per (kd, kh) tap t:
#     row = t * k_pad + w' * Cin + ci      (w' in [0, W): UNPADDED width)
#     col = wo * Cout + co
#     val = w[co, ci, kd, kh, w' + pad - wo]   if 0 <= w'+pad-wo < KW, else 0
# The zero-padded width positions contribute nothing (their input is zero),
# so their rows are dropped; rows [W*Cin, k_pad) per tap are explicit zeros
# (lane alignment only).  Only D and H need an explicit halo in the kernel.
# ----------------------------------------------------------------------------
def _build_banded_weights(w, W, pad, k_pad, out_dtype=jnp.bfloat16):
    Cout, Cin, KD, KH, KW = w.shape
    WCin, WCout = W * Cin, W * Cout
    wk = jnp.transpose(w, (2, 3, 4, 1, 0)).reshape(KD * KH, KW, Cin, Cout)
    wp = jnp.arange(W)[None, :, None]            # input width position w'
    wo = jnp.arange(W)[None, None, :]            # output width position
    kw = jnp.arange(KW)[:, None, None]
    sel = (wp + pad - wo == kw).astype(w.dtype)  # band selector
    # M[t, w', ci, wo, co] = w[co, ci, kd, kh, w'+pad-wo] (if in band)
    M = jnp.einsum("kpo,tkic->tpioc", sel, wk).reshape(KD * KH, WCin, WCout)
    if k_pad > WCin:
        M = jnp.concatenate(
            [M, jnp.zeros((KD * KH, k_pad - WCin, WCout), M.dtype)], axis=1)
    return M.reshape(KD * KH * k_pad, WCout).astype(out_dtype)


# ----------------------------------------------------------------------------
# Batch-tile picker: smallest divisor of N whose row count reaches the MXU
# fill target, capped by a per-step VMEM budget.
# ----------------------------------------------------------------------------
def _pick_nt(n, bytes_per_sample, rows_per_sample, row_target=256,
             vmem_budget=24 * 1024 * 1024):
    best = 1
    for cand in range(1, n + 1):
        if n % cand:
            continue
        if cand > 1 and cand * bytes_per_sample > vmem_budget:
            break
        best = cand
        if cand * rows_per_sample >= row_target:
            break
    return best


# ----------------------------------------------------------------------------
# Kernels
# ----------------------------------------------------------------------------
def _make_conv_kernel(Nt, D, H, W, Cin, Cout, KD, KH, pad, k_pad):
    """BN -> ReLU -> im2col -> single MXU matmul (k >= 3, 'same' padding)."""
    Dp, Hp = D + 2 * pad, H + 2 * pad
    WCin = W * Cin
    T = KD * KH
    M = Nt * D * H

    def kernel(x_ref, sc_ref, sh_ref, w_ref, o_ref, hbuf, im2col):
        bf16 = jnp.bfloat16
        # D/H halo planes hold only zeros.  Re-zeroed every step (full
        # lane-width stores) so per-core scratch stays valid if the
        # "parallel" batch axis is split across TensorCores (v7x).
        if pad:
            hbuf[:, 0:pad, :, :] = jnp.zeros((Nt, pad, Hp, k_pad), bf16)
            hbuf[:, pad + D:Dp, :, :] = jnp.zeros((Nt, pad, Hp, k_pad), bf16)
            hbuf[:, pad:pad + D, 0:pad, :] = jnp.zeros((Nt, D, pad, k_pad), bf16)
            hbuf[:, pad:pad + D, pad + H:Hp, :] = jnp.zeros((Nt, D, pad, k_pad), bf16)

        # Fused inference BN + ReLU on the VPU (f32), cast to bf16 once and
        # written as ONE full-lane-width [h | 0] store per interior row.
        h = jnp.maximum(x_ref[...] * sc_ref[...] + sh_ref[...], 0.0).astype(bf16)
        if k_pad > WCin:
            h = jnp.concatenate(
                [h, jnp.zeros((Nt, D, H, k_pad - WCin), bf16)], axis=-1)
        hbuf[:, pad:pad + D, pad:pad + H, :] = h

        # im2col: KD*KH shifted bf16 copies into 128-aligned K segments.
        for kd in range(KD):
            for kh in range(KH):
                t = kd * KH + kh
                tap = hbuf[:, kd:kd + D, kh:kh + H, :]
                im2col[:, t * k_pad:(t + 1) * k_pad] = tap.reshape(M, k_pad)

        # Single MXU matmul (bf16 operands, f32 accumulation).
        out = jnp.dot(im2col[...], w_ref[...],
                      preferred_element_type=jnp.float32)
        o_ref[...] = out.astype(o_ref.dtype)

    scratch = [pltpu.VMEM((Nt, Dp, Hp, k_pad), jnp.bfloat16),   # halo buffer
               pltpu.VMEM((M, T * k_pad), jnp.bfloat16)]        # im2col
    return kernel, scratch


def _make_1x1_kernel():
    """1x1x1 fast path: BN -> ReLU -> one matmul, no halo / im2col scratch."""
    def kernel(x_ref, sc_ref, sh_ref, w_ref, o_ref):
        h = jnp.maximum(x_ref[...] * sc_ref[...] + sh_ref[...], 0.0)
        o_ref[...] = jnp.dot(h.astype(jnp.bfloat16), w_ref[...],
                             preferred_element_type=jnp.float32).astype(o_ref.dtype)
    return kernel


# ----------------------------------------------------------------------------
# Conv3d_Block forward (Pallas)
# ----------------------------------------------------------------------------
def conv3d_block_forward(x_ncdhw, params, *, kernel_size=1, stride=1, groups=1,
                         padding=None, eps=1e-5, out_dtype=None):
    """Conv3d(ReLU(BN(x)), bias=False) with PyTorch NCDHW in/out layout."""
    if padding is None:
        padding = (kernel_size - 1) // 2
    # TODO(synk): stride != 1 and groups != 1 are not implemented.
    assert stride == 1 and groups == 1
    assert 2 * padding == kernel_size - 1, "only 'same' odd-kernel convs supported"

    w = params["weight"]                      # (Cout, Cin, KD, KH, KW)
    Cout, Cin, KD, KH, KW = w.shape
    assert (KD, KH, KW) == (kernel_size,) * 3

    N, C, D, H, Wd = x_ncdhw.shape
    assert C == Cin

    # Inference-mode BN folded into per-channel scale/shift.
    scale = params["gamma"] / jnp.sqrt(params["var"] + eps)
    shift = params["beta"] - params["mean"] * scale

    WCin, WCout = Wd * Cin, Wd * Cout
    rows = D * H
    if out_dtype is None:
        out_dtype = x_ncdhw.dtype

    # Wrapper-side layout glue: NCDHW -> NDHWC, merge (W, C) into one lane axis.
    x = jnp.transpose(x_ncdhw, (0, 2, 3, 4, 1))            # (N, D, H, W, Cin)
    scale_l = jnp.tile(scale, Wd).reshape(1, WCin).astype(jnp.float32)
    shift_l = jnp.tile(shift, Wd).reshape(1, WCin).astype(jnp.float32)

    one_by_one = (kernel_size == 1 and padding == 0)
    k_pad = WCin if one_by_one else _round_up(WCin, 128)
    wb = _build_banded_weights(w, Wd, padding, k_pad)      # bf16

    # Per-sample resident bytes for the batch-tile budget.
    if one_by_one:
        bytes_per_sample = rows * (WCin + WCout) * 4 * 2
    else:
        Dp, Hp = D + 2 * padding, H + 2 * padding
        bytes_per_sample = (rows * KD * KH * k_pad * 2     # im2col (bf16)
                            + Dp * Hp * k_pad * 2          # halo buffer (bf16)
                            + rows * (WCin + WCout) * 4 * 2)
    Nt = _pick_nt(N, bytes_per_sample, rows)

    if one_by_one:
        kernel = _make_1x1_kernel()
        scratch = []
        x_in = x.reshape(N * rows, WCin)
        x_spec = pl.BlockSpec((Nt * rows, WCin), lambda n: (n, 0))
    else:
        kernel, scratch = _make_conv_kernel(Nt, D, H, Wd, Cin, Cout,
                                            KD, KH, padding, k_pad)
        x_in = x.reshape(N, D, H, WCin)
        x_spec = pl.BlockSpec((Nt, D, H, WCin), lambda n: (n, 0, 0, 0))

    out2 = pl.pallas_call(
        kernel,
        out_shape=jax.ShapeDtypeStruct((N * rows, WCout), out_dtype),
        grid=(N // Nt,),
        in_specs=[
            x_spec,
            pl.BlockSpec((1, WCin), lambda n: (0, 0)),
            pl.BlockSpec((1, WCin), lambda n: (0, 0)),
            pl.BlockSpec(wb.shape, lambda n: (0, 0)),
        ],
        out_specs=pl.BlockSpec((Nt * rows, WCout), lambda n: (n, 0)),
        scratch_shapes=scratch,
        compiler_params=pltpu.CompilerParams(
            dimension_semantics=("parallel",),
            vmem_limit_bytes=48 * 1024 * 1024),
    )(x_in, scale_l, shift_l, wb)

    out = out2.reshape(N, D, H, Wd, Cout)
    return jnp.transpose(out, (0, 4, 1, 2, 3))             # NDHWC -> NCDHW


# ----------------------------------------------------------------------------
# Pure-JAX reference (correctness check only)
# ----------------------------------------------------------------------------
def conv3d_block_ref(x_ncdhw, params, kernel_size, eps=1e-5):
    scale = params["gamma"] / jnp.sqrt(params["var"] + eps)
    shift = params["beta"] - params["mean"] * scale
    xl = jnp.transpose(x_ncdhw, (0, 2, 3, 4, 1))
    h = jnp.maximum(xl * scale + shift, 0.0)
    wk = jnp.transpose(params["weight"], (2, 3, 4, 1, 0))   # DHWIO
    pad = (kernel_size - 1) // 2
    o = lax.conv_general_dilated(h, wk, (1, 1, 1), [(pad, pad)] * 3,
                                 dimension_numbers=("NDHWC", "DHWIO", "NDHWC"))
    return jnp.transpose(o, (0, 4, 1, 2, 3))


# ----------------------------------------------------------------------------
if __name__ == "__main__":
    key = jax.random.PRNGKey(0)
    k_x, k_p3, k_p1 = jax.random.split(key, 3)

    N, Cin, D, H, W = 2, 8, 8, 8, 8
    Cout = 16

    x = jax.random.normal(k_x, (N, Cin, D, H, W), jnp.float32)  # NCDHW

    def make_params(k, cout, cin, ksz):
        kw, kg, kb, km, kv = jax.random.split(k, 5)
        return {
            "weight": jax.random.normal(kw, (cout, cin, ksz, ksz, ksz), jnp.float32) * 0.1,
            "gamma": jax.random.uniform(kg, (cin,), jnp.float32, 0.5, 1.5),
            "beta": jax.random.normal(kb, (cin,), jnp.float32) * 0.1,
            "mean": jax.random.normal(km, (cin,), jnp.float32) * 0.1,
            "var": jax.random.uniform(kv, (cin,), jnp.float32, 0.5, 1.5),
        }

    params3 = make_params(k_p3, Cout, Cin, 3)   # 3x3x3 "same" conv block
    params1 = make_params(k_p1, Cout, Cin, 1)   # 1x1x1 conv block (fast path)

    fwd3 = jax.jit(lambda xx: conv3d_block_forward(xx, params3, kernel_size=3))
    fwd1 = jax.jit(lambda xx: conv3d_block_forward(xx, params1, kernel_size=1))

    out3 = jax.block_until_ready(fwd3(x))
    out1 = jax.block_until_ready(fwd1(x))

    assert out3.shape == (N, Cout, D, H, W)
    assert out1.shape == (N, Cout, D, H, W)
    assert bool(jnp.isfinite(out3).all()) and bool(jnp.isfinite(out1).all())

    for out, p, ksz in ((out3, params3, 3), (out1, params1, 1)):
        ref = conv3d_block_ref(x, p, ksz)
        max_err = float(jnp.max(jnp.abs(out - ref)))
        tol = 3e-2 * (float(jnp.max(jnp.abs(ref))) + 1.0)   # bf16 MXU operands
        assert max_err <= tol, f"k={ksz} max_err={max_err} tol={tol}"

    print("KERNEL_OK")
</pallas_src>

<mosaic_0001>
module attributes {stable_mosaic.version = 11 : i64} {
  func.func @kernel(%arg0: i32, %arg1: memref<2x8x8x64xf32, #tpu.memory_space<vmem>>, %arg2: memref<1x64xf32, #tpu.memory_space<vmem>>, %arg3: memref<1x64xf32, #tpu.memory_space<vmem>>, %arg4: memref<1152x128xbf16, #tpu.memory_space<vmem>>, %arg5: memref<128x128xf32, #tpu.memory_space<vmem>>, %arg6: memref<2x10x10x128xbf16, #tpu.memory_space<vmem>>, %arg7: memref<128x1152xbf16, #tpu.memory_space<vmem>>) attributes {dimension_semantics = [#tpu.dimension_semantics<parallel>], iteration_bounds = array<i64: 1>, scalar_prefetch = 0 : i64, scratch_operands = 2 : i64, tpu.core_type = #tpu.core_type<tc>, window_params = [{transform_indices = @transform_0, window_bounds = array<i64: 2, 8, 8, 64>}, {pipeline_mode = #tpu.pipeline_mode<synchronous>, transform_indices = @transform_1, window_bounds = array<i64: 1, 64>}, {pipeline_mode = #tpu.pipeline_mode<synchronous>, transform_indices = @transform_2, window_bounds = array<i64: 1, 64>}, {pipeline_mode = #tpu.pipeline_mode<synchronous>, transform_indices = @transform_3, window_bounds = array<i64: 1152, 128>}, {transform_indices = @transform_4, window_bounds = array<i64: 128, 128>}]} {
    %cst = arith.constant 0.000000e+00 : bf16
    %0 = vector.broadcast %cst : bf16 to vector<2x1x10x128xbf16>
    %c0 = arith.constant 0 : index
    %c0_0 = arith.constant 0 : index
    %c0_1 = arith.constant 0 : index
    %c0_2 = arith.constant 0 : index
    %1 = vector.load %arg6[%c0, %c0_0, %c0_1, %c0_2] : memref<2x10x10x128xbf16, #tpu.memory_space<vmem>>, vector<2x1x10x128xbf16>
    tpu.vector_store %arg6[%c0, %c0_0, %c0_1, %c0_2], %0 {strides = array<i32>} : memref<2x10x10x128xbf16, #tpu.memory_space<vmem>>, vector<2x1x10x128xbf16>,
    %cst_3 = arith.constant 0.000000e+00 : bf16
    %2 = vector.broadcast %cst_3 : bf16 to vector<2x1x10x128xbf16>
    %c0_4 = arith.constant 0 : index
    %c9 = arith.constant 9 : index
    %c0_5 = arith.constant 0 : index
    %c0_6 = arith.constant 0 : index
    %3 = vector.load %arg6[%c0_4, %c9, %c0_5, %c0_6] : memref<2x10x10x128xbf16, #tpu.memory_space<vmem>>, vector<2x1x10x128xbf16>
    tpu.vector_store %arg6[%c0_4, %c9, %c0_5, %c0_6], %2 {strides = array<i32>} : memref<2x10x10x128xbf16, #tpu.memory_space<vmem>>, vector<2x1x10x128xbf16>,
    %cst_7 = arith.constant 0.000000e+00 : bf16
    %4 = vector.broadcast %cst_7 : bf16 to vector<2x8x1x128xbf16>
    %c0_8 = arith.constant 0 : index
    %c1 = arith.constant 1 : index
    %c0_9 = arith.constant 0 : index
    %c0_10 = arith.constant 0 : index
    %5 = vector.load %arg6[%c0_8, %c1, %c0_9, %c0_10] : memref<2x10x10x128xbf16, #tpu.memory_space<vmem>>, vector<2x8x1x128xbf16>
    tpu.vector_store %arg6[%c0_8, %c1, %c0_9, %c0_10], %4 {strides = array<i32>} : memref<2x10x10x128xbf16, #tpu.memory_space<vmem>>, vector<2x8x1x128xbf16>,
    %cst_11 = arith.constant 0.000000e+00 : bf16
    %6 = vector.broadcast %cst_11 : bf16 to vector<2x8x1x128xbf16>
    %c0_12 = arith.constant 0 : index
    %c1_13 = arith.constant 1 : index
    %c9_14 = arith.constant 9 : index
    %c0_15 = arith.constant 0 : index
    %7 = vector.load %arg6[%c0_12, %c1_13, %c9_14, %c0_15] : memref<2x10x10x128xbf16, #tpu.memory_space<vmem>>, vector<2x8x1x128xbf16>
    tpu.vector_store %arg6[%c0_12, %c1_13, %c9_14, %c0_15], %6 {strides = array<i32>} : memref<2x10x10x128xbf16, #tpu.memory_space<vmem>>, vector<2x8x1x128xbf16>,
    %c0_16 = arith.constant 0 : index
    %c0_17 = arith.constant 0 : index
    %c0_18 = arith.constant 0 : index
    %c0_19 = arith.constant 0 : index
    %8 = vector.load %arg1[%c0_16, %c0_17, %c0_18, %c0_19] : memref<2x8x8x64xf32, #tpu.memory_space<vmem>>, vector<2x8x8x64xf32>
    %c0_20 = arith.constant 0 : index
    %c0_21 = arith.constant 0 : index
    %9 = vector.load %arg2[%c0_20, %c0_21] : memref<1x64xf32, #tpu.memory_space<vmem>>, vector<1x64xf32>
    %10 = vector.shape_cast %9 : vector<1x64xf32> to vector<1x1x1x64xf32>
    %11 = vector.broadcast %10 : vector<1x1x1x64xf32> to vector<2x8x8x64xf32>
    %12 = arith.mulf %8, %11 : vector<2x8x8x64xf32>
    %c0_22 = arith.constant 0 : index
    %c0_23 = arith.constant 0 : index
    %13 = vector.load %arg3[%c0_22, %c0_23] : memref<1x64xf32, #tpu.memory_space<vmem>>, vector<1x64xf32>
    %14 = vector.shape_cast %13 : vector<1x64xf32> to vector<1x1x1x64xf32>
    %15 = vector.broadcast %14 : vector<1x1x1x64xf32> to vector<2x8x8x64xf32>
    %16 = arith.addf %12, %15 : vector<2x8x8x64xf32>
    %cst_24 = arith.constant 0.000000e+00 : f32
    %17 = vector.broadcast %cst_24 : f32 to vector<2x8x8x64xf32>
    %18 = arith.maximumf %16, %17 : vector<2x8x8x64xf32>
    %19 = arith.truncf %18 : vector<2x8x8x64xf32> to vector<2x8x8x64xbf16>
    %cst_25 = arith.constant 0.000000e+00 : bf16
    %20 = vector.broadcast %cst_25 : bf16 to vector<2x8x8x64xbf16>
    %21 = tpu.concatenate %19, %20 in 3 : vector<2x8x8x64xbf16>, vector<2x8x8x64xbf16> -> vector<2x8x8x128xbf16>
    %c0_26 = arith.constant 0 : index
    %c1_27 = arith.constant 1 : index
    %c1_28 = arith.constant 1 : index
    %c0_29 = arith.constant 0 : index
    %22 = vector.load %arg6[%c0_26, %c1_27, %c1_28, %c0_29] : memref<2x10x10x128xbf16, #tpu.memory_space<vmem>>, vector<2x8x8x128xbf16>
    tpu.vector_store %arg6[%c0_26, %c1_27, %c1_28, %c0_29], %21 {strides = array<i32>} : memref<2x10x10x128xbf16, #tpu.memory_space<vmem>>, vector<2x8x8x128xbf16>,
    %c0_30 = arith.constant 0 : index
    %c0_31 = arith.constant 0 : index
    %c0_32 = arith.constant 0 : index
    %c0_33 = arith.constant 0 : index
    %23 = vector.load %arg6[%c0_30, %c0_31, %c0_32, %c0_33] : memref<2x10x10x128xbf16, #tpu.memory_space<vmem>>, vector<2x8x8x128xbf16>
    %24 = vector.shape_cast %23 : vector<2x8x8x128xbf16> to vector<128x128xbf16>
    %c0_34 = arith.constant 0 : index
    %c0_35 = arith.constant 0 : index
    %25 = vector.load %arg7[%c0_34, %c0_35] : memref<128x1152xbf16, #tpu.memory_space<vmem>>, vector<128x128xbf16>
    tpu.vector_store %arg7[%c0_34, %c0_35], %24 {strides = array<i32>} : memref<128x1152xbf16, #tpu.memory_space<vmem>>, vector<128x128xbf16>,
    %c0_36 = arith.constant 0 : index
    %c0_37 = arith.constant 0 : index
    %c1_38 = arith.constant 1 : index
    %c0_39 = arith.constant 0 : index
    %26 = vector.load %arg6[%c0_36, %c0_37, %c1_38, %c0_39] : memref<2x10x10x128xbf16, #tpu.memory_space<vmem>>, vector<2x8x8x128xbf16>
    %27 = vector.shape_cast %26 : vector<2x8x8x128xbf16> to vector<128x128xbf16>
    %c0_40 = arith.constant 0 : index
    %c128 = arith.constant 128 : index
    %28 = vector.load %arg7[%c0_40, %c128] : memref<128x1152xbf16, #tpu.memory_space<vmem>>, vector<128x128xbf16>
    tpu.vector_store %arg7[%c0_40, %c128], %27 {strides = array<i32>} : memref<128x1152xbf16, #tpu.memory_space<vmem>>, vector<128x128xbf16>,
    %c0_41 = arith.constant 0 : index
    %c0_42 = arith.constant 0 : index
    %c2 = arith.constant 2 : index
    %c0_43 = arith.constant 0 : index
    %29 = vector.load %arg6[%c0_41, %c0_42, %c2, %c0_43] : memref<2x10x10x128xbf16, #tpu.memory_space<vmem>>, vector<2x8x8x128xbf16>
    %30 = vector.shape_cast %29 : vector<2x8x8x128xbf16> to vector<128x128xbf16>
    %c0_44 = arith.constant 0 : index
    %c256 = arith.constant 256 : index
    %31 = vector.load %arg7[%c0_44, %c256] : memref<128x1152xbf16, #tpu.memory_space<vmem>>, vector<128x128xbf16>
    tpu.vector_store %arg7[%c0_44, %c256], %30 {strides = array<i32>} : memref<128x1152xbf16, #tpu.memory_space<vmem>>, vector<128x128xbf16>,
    %c0_45 = arith.constant 0 : index
    %c1_46 = arith.constant 1 : index
    %c0_47 = arith.constant 0 : index
    %c0_48 = arith.constant 0 : index
    %32 = vector.load %arg6[%c0_45, %c1_46, %c0_47, %c0_48] : memref<2x10x10x128xbf16, #tpu.memory_space<vmem>>, vector<2x8x8x128xbf16>
    %33 = vector.shape_cast %32 : vector<2x8x8x128xbf16> to vector<128x128xbf16>
    %c0_49 = arith.constant 0 : index
    %c384 = arith.constant 384 : index
    %34 = vector.load %arg7[%c0_49, %c384] : memref<128x1152xbf16, #tpu.memory_space<vmem>>, vector<128x128xbf16>
    tpu.vector_store %arg7[%c0_49, %c384], %33 {strides = array<i32>} : memref<128x1152xbf16, #tpu.memory_space<vmem>>, vector<128x128xbf16>,
    %c0_50 = arith.constant 0 : index
    %c1_51 = arith.constant 1 : index
    %c1_52 = arith.constant 1 : index
    %c0_53 = arith.constant 0 : index
    %35 = vector.load %arg6[%c0_50, %c1_51, %c1_52, %c0_53] : memref<2x10x10x128xbf16, #tpu.memory_space<vmem>>, vector<2x8x8x128xbf16>
    %36 = vector.shape_cast %35 : vector<2x8x8x128xbf16> to vector<128x128xbf16>
    %c0_54 = arith.constant 0 : index
    %c512 = arith.constant 512 : index
    %37 = vector.load %arg7[%c0_54, %c512] : memref<128x1152xbf16, #tpu.memory_space<vmem>>, vector<128x128xbf16>
    tpu.vector_store %arg7[%c0_54, %c512], %36 {strides = array<i32>} : memref<128x1152xbf16, #tpu.memory_space<vmem>>, vector<128x128xbf16>,
    %c0_55 = arith.constant 0 : index
    %c1_56 = arith.constant 1 : index
    %c2_57 = arith.constant 2 : index
    %c0_58 = arith.constant 0 : index
    %38 = vector.load %arg6[%c0_55, %c1_56, %c2_57, %c0_58] : memref<2x10x10x128xbf16, #tpu.memory_space<vmem>>, vector<2x8x8x128xbf16>
    %39 = vector.shape_cast %38 : vector<2x8x8x128xbf16> to vector<128x128xbf16>
    %c0_59 = arith.constant 0 : index
    %c640 = arith.constant 640 : index
    %40 = vector.load %arg7[%c0_59, %c640] : memref<128x1152xbf16, #tpu.memory_space<vmem>>, vector<128x128xbf16>
    tpu.vector_store %arg7[%c0_59, %c640], %39 {strides = array<i32>} : memref<128x1152xbf16, #tpu.memory_space<vmem>>, vector<128x128xbf16>,
    %c0_60 = arith.constant 0 : index
    %c2_61 = arith.constant 2 : index
    %c0_62 = arith.constant 0 : index
    %c0_63 = arith.constant 0 : index
    %41 = vector.load %arg6[%c0_60, %c2_61, %c0_62, %c0_63] : memref<2x10x10x128xbf16, #tpu.memory_space<vmem>>, vector<2x8x8x128xbf16>
    %42 = vector.shape_cast %41 : vector<2x8x8x128xbf16> to vector<128x128xbf16>
    %c0_64 = arith.constant 0 : index
    %c768 = arith.constant 768 : index
    %43 = vector.load %arg7[%c0_64, %c768] : memref<128x1152xbf16, #tpu.memory_space<vmem>>, vector<128x128xbf16>
    tpu.vector_store %arg7[%c0_64, %c768], %42 {strides = array<i32>} : memref<128x1152xbf16, #tpu.memory_space<vmem>>, vector<128x128xbf16>,
    %c0_65 = arith.constant 0 : index
    %c2_66 = arith.constant 2 : index
    %c1_67 = arith.constant 1 : index
    %c0_68 = arith.constant 0 : index
    %44 = vector.load %arg6[%c0_65, %c2_66, %c1_67, %c0_68] : memref<2x10x10x128xbf16, #tpu.memory_space<vmem>>, vector<2x8x8x128xbf16>
    %45 = vector.shape_cast %44 : vector<2x8x8x128xbf16> to vector<128x128xbf16>
    %c0_69 = arith.constant 0 : index
    %c896 = arith.constant 896 : index
    %46 = vector.load %arg7[%c0_69, %c896] : memref<128x1152xbf16, #tpu.memory_space<vmem>>, vector<128x128xbf16>
    tpu.vector_store %arg7[%c0_69, %c896], %45 {strides = array<i32>} : memref<128x1152xbf16, #tpu.memory_space<vmem>>, vector<128x128xbf16>,
    %c0_70 = arith.constant 0 : index
    %c2_71 = arith.constant 2 : index
    %c2_72 = arith.constant 2 : index
    %c0_73 = arith.constant 0 : index
    %47 = vector.load %arg6[%c0_70, %c2_71, %c2_72, %c0_73] : memref<2x10x10x128xbf16, #tpu.memory_space<vmem>>, vector<2x8x8x128xbf16>
    %48 = vector.shape_cast %47 : vector<2x8x8x128xbf16> to vector<128x128xbf16>
    %c0_74 = arith.constant 0 : index
    %c1024 = arith.constant 1024 : index
    %49 = vector.load %arg7[%c0_74, %c1024] : memref<128x1152xbf16, #tpu.memory_space<vmem>>, vector<128x128xbf16>
    tpu.vector_store %arg7[%c0_74, %c1024], %48 {strides = array<i32>} : memref<128x1152xbf16, #tpu.memory_space<vmem>>, vector<128x128xbf16>,
    %c0_75 = arith.constant 0 : index
    %c0_76 = arith.constant 0 : index
    %50 = vector.load %arg7[%c0_75, %c0_76] : memref<128x1152xbf16, #tpu.memory_space<vmem>>, vector<128x1152xbf16>
    %c0_77 = arith.constant 0 : index
    %c0_78 = arith.constant 0 : index
    %51 = vector.load %arg4[%c0_77, %c0_78] : memref<1152x128xbf16, #tpu.memory_space<vmem>>, vector<1152x128xbf16>
    %cst_79 = arith.constant dense<0.000000e+00> : vector<128x128xf32>
    %52 = tpu.matmul %50, %51, %cst_79 {dimension_numbers = #tpu.dot_dimension_numbers<[1], [0], [0], [1], [0, 0, 1, 1], [], []>} : vector<128x1152xbf16>, vector<1152x128xbf16>, vector<128x128xf32> -> vector<128x128xf32>
    %c0_80 = arith.constant 0 : index
    %c0_81 = arith.constant 0 : index
    %53 = vector.load %arg5[%c0_80, %c0_81] : memref<128x128xf32, #tpu.memory_space<vmem>>, vector<128x128xf32>
    tpu.vector_store %arg5[%c0_80, %c0_81], %52 {strides = array<i32>} : memref<128x128xf32, #tpu.memory_space<vmem>>, vector<128x128xf32>,
    return
  }
  func.func @transform_0(%arg0: i32) -> (i32, i32, i32, i32) {
    %c0_i32 = arith.constant 0 : i32
    %c0_i32_0 = arith.constant 0 : i32
    %c0_i32_1 = arith.constant 0 : i32
    %c0_i32_2 = arith.constant 0 : i32
    return %arg0, %c0_i32, %c0_i32_0, %c0_i32_1 : i32, i32, i32, i32
  }
  func.func @transform_1(%arg0: i32) -> (i32, i32) {
    %c0_i32 = arith.constant 0 : i32
    %c0_i32_0 = arith.constant 0 : i32
    %c0_i32_1 = arith.constant 0 : i32
    return %c0_i32, %c0_i32_0 : i32, i32
  }
  func.func @transform_2(%arg0: i32) -> (i32, i32) {
    %c0_i32 = arith.constant 0 : i32
    %c0_i32_0 = arith.constant 0 : i32
    %c0_i32_1 = arith.constant 0 : i32
    return %c0_i32, %c0_i32_0 : i32, i32
  }
  func.func @transform_3(%arg0: i32) -> (i32, i32) {
    %c0_i32 = arith.constant 0 : i32
    %c0_i32_0 = arith.constant 0 : i32
    %c0_i32_1 = arith.constant 0 : i32
    return %c0_i32, %c0_i32_0 : i32, i32
  }
  func.func @transform_4(%arg0: i32) -> (i32, i32) {
    %c0_i32 = arith.constant 0 : i32
    %c0_i32_0 = arith.constant 0 : i32
    return %arg0, %c0_i32 : i32, i32
  }
}

</mosaic_0001>

<bundles_post_ra>
// kernel: tile.10
= control target key start
LH: loop header
LB: loop body
LE: loop exit
PB: predicated region body
PF: predicated region fallthrough
CT: control target
= control target key end

     0   :  { %s22_s0 = inlined_call_operand.vmem [shape: f32[8], index: 0, kind: input, shape index: {}]   ;;  %s23_s1 = inlined_call_operand.vmem [shape: f32[8,8], index: 1, kind: output, shape index: {}]  }
   0x1   :  { %v4_v0 = vld [vmem:[%s22_s0] ss:$0 sm:$0xff] }
   0x2   :  { %5 = vst [vmem:[%s23_s1] sm:$0xff] %v4_v0 }

// kernel: tile.11
= control target key start
LH: loop header
LB: loop body
LE: loop exit
PB: predicated region body
PF: predicated region fallthrough
CT: control target
= control target key end

     0   :  { %s67_s10 = smov 56   ;;  %s68_s11 = smov 40   ;;  %vm3_vm0 = vcmask 64512   ;;  %vm9_vm1 = vcmask 523712   ;;  %vm15_vm2 = vcmask 458112   ;;  %vm21_vm3 = vcmask 392512   ;;  %s111_s0 = inlined_call_operand.vmem [shape: f32[8,8], index: 0, kind: input, shape index: {}]   ;;  %s112_s1 = inlined_call_operand.vmem [shape: f32[1,64], index: 1, kind: output, shape index: {}]  }
   0x1   :  { %v53_v0 = vld [vmem:[%s111_s0 + $0x7] sm:$0x1]   ;;  %v55_v1 = vld [vmem:[%s111_s0 + $0x5] sm:$0x1]   ;;  %v57_v2 = vld [vmem:[%s111_s0 + $0x3] sm:$0x1]  }
   0x2   :  { %7 = vrot.lane.b32.xlu0 %v53_v0, %s67_s10  ;;  %19 = vrot.lane.b32.xlu1 %v55_v1, %s68_s11  ;;  %s69_s14 = smov 24   ;;  %v54_v3 = vld [vmem:[%s111_s0 + $0x6] sm:$0x1]   ;;  %v56_v4 = vld [vmem:[%s111_s0 + $0x4] sm:$0x1]   ;;  %s70_s21 = smov 48  }
   0x3   :  { %31 = vrot.lane.b32.xlu2 %v57_v2, %s69_s14  ;;  %v58_v5 = vld [vmem:[%s111_s0 + $0x2] sm:$0x1]   ;;  %s71_s22 = smov 32   ;;  %s72_s23 = smov 16   ;;  %v59_v6 = vld [vmem:[%s111_s0 + $0x1] sm:$0x1]  }
   0x4   :  { %s73_s26 = smov 8   ;;  %v2_v7 = vld [vmem:[%s111_s0] sm:$0x1]   ;;  %vm27_vm4 = vcmask 326912   ;;  %vm33_vm5 = vcmask 261312   ;;  %vm39_vm6 = vcmask 195712  }
   0x5   :  { %4 = vst.msk [vmem:[#allocation0] sm:$0x1] %vm3_vm0, %v2_v7   ;;  %vm45_vm7 = vcmask 130112  }
   0xa   :  { %13 = vrot.lane.b32.xlu0 %v54_v3, %s70_s21  ;;  %25 = vrot.lane.b32.xlu1 %v56_v4, %s71_s22 }
   0xb   :  { %37 = vrot.lane.b32.xlu2 %v58_v5, %s72_s23 }
  0x12   :  { %43 = vrot.lane.b32.xlu0 %v59_v6, %s73_s26 }
  0x5d   :  { %v32_v8 = vpop.permute.xlu2 %31  }
  0x65   :  { %v38_v9 = vpop.permute.xlu2 %37  }
  0x74   :  { %v8_v10 = vpop.permute.xlu0 %7   ;;  %v20_v11 = vpop.permute.xlu1 %19  }
  0x75   :  { %10 = vst.msk [vmem:[#allocation0] sm:$0x1] %vm9_vm1, %v8_v10  }
  0x7c   :  { %v14_v12 = vpop.permute.xlu0 %13   ;;  %v26_v13 = vpop.permute.xlu1 %25  }
  0x7d   :  { %16 = vst.msk [vmem:[#allocation0] sm:$0x1] %vm15_vm2, %v14_v12  }
  0x7e   :  { %22 = vst.msk [vmem:[#allocation0] sm:$0x1] %vm21_vm3, %v20_v11  }
  0x7f   :  { %28 = vst.msk [vmem:[#allocation0] sm:$0x1] %vm27_vm4, %v26_v13  }
  0x80   :  { %34 = vst.msk [vmem:[#allocation0] sm:$0x1] %vm33_vm5, %v32_v8  }
  0x81   :  { %40 = vst.msk [vmem:[#allocation0] sm:$0x1] %vm39_vm6, %v38_v9  }
  0x84   :  { %v44_v14 = vpop.permute.xlu0 %43  }
  0x85   :  { %46 = vst.msk [vmem:[#allocation0] sm:$0x1] %vm45_vm7, %v44_v14  }
  0x8c   :  { %v49_v15 = vld [vmem:[#allocation0] sm:$0x1] }
  0x8d   :  { %52 = vst [vmem:[%s112_s1] sm:$0x1] %v49_v15 }

// kernel: _lambda_.1
= control target key start
LH: loop header
LB: loop body
LE: loop exit
PB: predicated region body
PF: predicated region fallthrough
CT: control target
= control target key end

     0   :  { %vm28_vm0 = vcmask 1040384   ;;  %vm29_vm1 = vsmask.f32 256  ;;  %v40_v1 = vld [vmem:[#allocation2 + $0x20] sm:$0x1]  ;;  %v4286_v4 = vmov 0   ;;  %s5307_s3 = inlined_call_operand.vmem [shape: bf16[1152,128], index: 3, kind: input, shape index: {}]   ;;  %s5308_s0 = inlined_call_operand.vmem [shape: f32[2,8,8,64], index: 0, kind: input, shape index: {}]   ;;  %s5309_s1 = inlined_call_operand.vmem [shape: f32[1,64], index: 1, kind: input, shape index: {}]   ;;  %s5310_s2 = inlined_call_operand.vmem [shape: f32[1,64], index: 2, kind: input, shape index: {}]   ;;  %s5311_s4 = inlined_call_operand.vmem [shape: f32[128,128], index: 4, kind: output, shape index: {}]  }
   0x1   :  { %v4192_v0 = vld [vmem:[%s5307_s3 + $0x38] sm:$0xff]  ;;  %v4191_v2 = vld [vmem:[%s5307_s3 + $0x30] sm:$0xff]  ;;  %vm4319_vm2 = vmand %vm28_vm0, %vm29_vm1  ;;  %20 = vst [vmem:[#allocation2 + $0x50] sm:$0xf] %v4286_v4  ;;  %vm217_vm3 = vcmask 523264   ;;  %vm459_vm5 = vcmask 1043456  }
   0x2   :  { %4257 = vmatpush.bf16.msra.mxu1 %v4192_v0  ;;  %4258 = vmatpush.bf16.msra.mxu2 %v4192_v0  ;;  %v41_v5 = vsel %vm4319_vm2, 0, %v40_v1  ;;  %v43_v6 = vld [vmem:[#allocation2 + $0x28] sm:$0x1]  ;;  %v132_v7 = vld [vmem:[%s5308_s0 + $0x18] sm:$0xff]  ;;  %18 = vst [vmem:[#allocation2] sm:$0xf] %v4286_v4 }
   0x3   :  { %4259 = vmatpush.bf16.msra.mxu3 %v4192_v0  ;;  %3028 = vmatpush.bf16.msra.mxu0 %v4192_v0  ;;  %v4190_v8 = vld [vmem:[%s5307_s3 + $0x28] sm:$0xff]  ;;  %42 = vst [vmem:[#allocation2 + $0x20] sm:$0x1] %v41_v5  ;;  %v44_v9 = vsel %vm4319_vm2, 0, %v43_v6  ;;  %v133_v10 = vld [vmem:[%s5308_s0 + $0x20] sm:$0xff]  ;;  %v140_v20 = vld [vmem:[%s5308_s0 + $0x58] sm:$0xff] }
   0x4   :  { %45 = vst [vmem:[#allocation2 + $0x28] sm:$0x1] %v44_v9  ;;  %v4341_v11 = vld [vmem:[%s5309_s1] ss:$0 sm:$0xff]  ;;  %v55_v13 = vld [vmem:[#allocation2 + $0x58] sm:$0x1] }
   0x5   :  { %v4346_v12 = vld [vmem:[%s5310_s2] ss:$0 sm:$0xff]  ;;  %v152_v15 = vmul.f32 %v4341_v11, %v132_v7  ;;  %v153_v16 = vmul.f32 %v4341_v11, %v133_v10  ;;  %v56_v17 = vsel %vm4319_vm2, 0, %v55_v13  ;;  %v4356_v19 = vld [vmem:[#allocation2 + $0x70] sm:$0x1]  ;;  %v160_v22 = vmul.f32 %v4341_v11, %v140_v20  ;;  %v134_v34 = vld [vmem:[%s5308_s0 + $0x28] sm:$0xff] }
   0x6   :  { %4260 = vmatpush.bf16.msra.mxu1 %v4191_v2  ;;  %4261 = vmatpush.bf16.msra.mxu2 %v4191_v2  ;;  %v137_v14 = vld [vmem:[%s5308_s0 + $0x40] sm:$0xff]  ;;  %57 = vst [vmem:[#allocation2 + $0x58] sm:$0x1] %v56_v17  ;;  %v4372_v28 = vld [vmem:[#allocation2 + $0x78] sm:$0x1]  ;;  %v65_v31 = vsel %vm4319_vm2, 0, %v4356_v19  ;;  %v4396_v44 = vmul.f32 %v4341_v11, %v134_v34 }
   0x7   :  { %4262 = vmatpush.bf16.msra.mxu3 %v4191_v2  ;;  %3029 = vmatpush.bf16.msra.mxu0 %v4191_v2  ;;  %v157_v18 = vmul.f32 %v4341_v11, %v137_v14  ;;  %v141_v21 = vld [vmem:[%s5308_s0 + $0x60] sm:$0xff]  ;;  %v172_v24 = vadd.f32 %v4346_v12, %v152_v15  ;;  %v173_v25 = vadd.f32 %v4346_v12, %v153_v16  ;;  %v31_v39 = vld [vmem:[#allocation2 + $0x8] sm:$0x1]  ;;  %v135_v40 = vld [vmem:[%s5308_s0 + $0x30] sm:$0xff]  ;;  %vm79_vm4 = vsmask.f32 7938 }
   0x8   :  { %v129_v23 = vld [vmem:[%s5308_s0] sm:$0xff]  ;;  %v565_v27 = vld [vmem:[#allocation2 + $0x50] sm:$0xf]  ;;  %19 = vst [vmem:[#allocation2 + $0x4] sm:$0x1] %v4286_v4  ;;  %v161_v29 = vmul.f32 %v4341_v11, %v141_v21  ;;  %v180_v32 = vadd.f32 %v4346_v12, %v160_v22  ;;  %v68_v41 = vsel %vm4319_vm2, 0, %v4372_v28  ;;  %v4406_v54 = vmul.f32 %v4341_v11, %v135_v40  ;;  %vm4432_vm6 = vmand %vm459_vm5, %vm79_vm4 }
   0x9   :  { %v177_v26 = vadd.f32 %v4346_v12, %v157_v18  ;;  %v4189_v30 = vld [vmem:[%s5307_s3 + $0x20] sm:$0xff]  ;;  %581 = vst [vmem:[#allocation3 + $0x120] sm:$0xf] %v565_v27  ;;  %v149_v33 = vmul.f32 %v4341_v11, %v129_v23  ;;  %v188_v35 = vmax.f32 %v172_v24, 0.0  ;;  %v189_v36 = vmax.f32 %v173_v25, 0.0  ;;  %v4188_v45 = vld [vmem:[%s5307_s3 + $0x18] sm:$0xff]  ;;  %vm4608_vm7 = vmand %vm28_vm0, %vm79_vm4 }
   0xa   :  { %4263 = vmatpush.bf16.msra.mxu1 %v4190_v8  ;;  %4264 = vmatpush.bf16.msra.mxu2 %v4190_v8  ;;  %v181_v38 = vadd.f32 %v4346_v12, %v161_v29  ;;  %21 = vst [vmem:[#allocation2 + $0x54] sm:$0x1] %v4286_v4  ;;  %v196_v42 = vmax.f32 %v180_v32, 0.0  ;;  %v32_v51 = vsel %vm4319_vm2, 0, %v31_v39  ;;  %v46_v53 = vld [vmem:[#allocation2 + $0x30] sm:$0x1] }
   0xb   :  { %4265 = vmatpush.bf16.msra.mxu3 %v4190_v8  ;;  %3030 = vmatpush.bf16.msra.mxu0 %v4190_v8  ;;  %v193_v37 = vmax.f32 %v177_v26, 0.0  ;;  %v169_v43 = vadd.f32 %v4346_v12, %v149_v33  ;;  %v204_v46 = vpack.c.bf16 %v188_v35, %v188_v35  ;;  %v205_v47 = vpack.c.bf16 %v189_v36, %v189_v36  ;;  %v49_v63 = vld [vmem:[#allocation2 + $0x38] sm:$0x1]  ;;  %v4187_v6 = vld [vmem:[%s5307_s3 + $0x10] sm:$0xff]  ;;  %v557_v10 = vld [vmem:[#allocation2] sm:$0xf] }
   0xc   :  { %23 = vst [vmem:[#allocation2 + $0x48] sm:$0xf] %v4286_v4  ;;  %v197_v49 = vmax.f32 %v181_v38, 0.0  ;;  %v212_v50 = vpack.c.bf16 %v196_v42, %v196_v42  ;;  %v47_v5 = vsel %vm4319_vm2, 0, %v46_v53  ;;  %v50_v15 = vsel %vm4319_vm2, 0, %v49_v63  ;;  %v4186_v26 = vld [vmem:[%s5307_s3 + $0x8] sm:$0xff] }
   0xd   :  { %v209_v48 = vpack.c.bf16 %v193_v37, %v193_v37  ;;  %24 = vst [vmem:[#allocation2 + $0x4c] sm:$0x1] %v4286_v4  ;;  %v185_v52 = vmax.f32 %v169_v43, 0.0  ;;  %v226_v55 = vsel %vm217_vm3, %v204_v46, 0  ;;  %v228_v56 = vsel %vm217_vm3, %v205_v47, 0  ;;  %v138_v39 = vld [vmem:[%s5308_s0 + $0x48] sm:$0xff] }
   0xe   :  { %4266 = vmatpush.bf16.msra.mxu1 %v4189_v30  ;;  %4267 = vmatpush.bf16.msra.mxu2 %v4189_v30  ;;  %v213_v58 = vpack.c.bf16 %v197_v49, %v197_v49  ;;  %v270_v59 = vunpack.c.l.b16 %v226_v55  ;;  %v271_v60 = vunpack.c.l.b16 %v228_v56  ;;  %25 = vst [vmem:[#allocation2 + $0x98] sm:$0xf] %v4286_v4  ;;  %v242_v62 = vsel %vm217_vm3, %v212_v50, 0  ;;  %v479_v20 = vld [vmem:[#allocation2 + $0x20] sm:$0xf]  ;;  %v143_v56 = vld [vmem:[%s5308_s0 + $0x70] sm:$0xff] }
   0xf   :  { %4268 = vmatpush.bf16.msra.mxu3 %v4189_v30  ;;  %3031 = vmatpush.bf16.msra.mxu0 %v4189_v30  ;;  %v236_v57 = vsel %vm217_vm3, %v209_v48, 0  ;;  %26 = vst [vmem:[#allocation2 + $0x9c] sm:$0x1] %v4286_v4  ;;  %v278_v1 = vunpack.c.l.b16 %v242_v62  ;;  %v201_v2 = vpack.c.bf16 %v185_v52, %v185_v52  ;;  %v485_v21 = vld [vmem:[#allocation2 + $0x28] sm:$0xf]  ;;  %v174_v43 = vadd.f32 %v4346_v12, %v4396_v44  ;;  %v4185_v46 = vld [vmem:[%s5307_s3] sm:$0xff] }
  0x10   :  { %v275_v61 = vunpack.c.l.b16 %v236_v57  ;;  %v244_v0 = vsel %vm217_vm3, %v213_v58, 0  ;;  %v286_v7 = vpack.c.b16 %v270_v59, %v270_v59  ;;  %v287_v8 = vpack.c.b16 %v271_v60, %v271_v60  ;;  %66 = vst [vmem:[#allocation2 + $0x70] sm:$0x1] %v65_v31  ;;  %v509_v37 = vld [vmem:[#allocation2 + $0x58] sm:$0xf]  ;;  %v139_v44 = vld [vmem:[%s5308_s0 + $0x50] sm:$0xff] }
  0x11   :  { %69 = vst [vmem:[#allocation2 + $0x78] sm:$0x1] %v68_v41  ;;  %v279_v4 = vunpack.c.l.b16 %v244_v0  ;;  %v294_v13 = vpack.c.b16 %v278_v1, %v278_v1  ;;  %v220_v14 = vsel %vm217_vm3, %v201_v2, 0  ;;  %v158_v55 = vmul.f32 %v4341_v11, %v138_v39  ;;  %v4208_v58 = vld [vmem:[%s5307_s3 + $0xb8] sm:$0xff]  ;;  %v58_v0 = vld [vmem:[#allocation2 + $0x60] sm:$0x1] }
  0x12   :  { %4269 = vmatpush.bf16.msra.mxu1 %v4188_v45  ;;  %4270 = vmatpush.bf16.msra.mxu2 %v4188_v45  ;;  %v291_v9 = vpack.c.b16 %v275_v61, %v275_v61  ;;  %v324_v16 = vshrl.u32 %v286_v7, 16  ;;  %v327_v17 = vshll.u32 %v286_v7, 16  ;;  %v332_v18 = vshrl.u32 %v287_v8, 16  ;;  %33 = vst [vmem:[#allocation2 + $0x8] sm:$0x1] %v32_v51  ;;  %v142_v51 = vld [vmem:[%s5308_s0 + $0x68] sm:$0xff] }
  0x13   :  { %4271 = vmatpush.bf16.msra.mxu3 %v4188_v45  ;;  %3032 = vmatpush.bf16.msra.mxu0 %v4188_v45  ;;  %v335_v19 = vshll.u32 %v287_v8, 16  ;;  %v295_v24 = vpack.c.b16 %v279_v4, %v279_v4  ;;  %v388_v25 = vshrl.u32 %v294_v13, 16  ;;  %573 = vst [vmem:[#allocation3] sm:$0xf] %v557_v10  ;;  %v391_v29 = vshll.u32 %v294_v13, 16  ;;  %v4200_v59 = vld [vmem:[%s5307_s3 + $0x78] sm:$0xff] }
  0x14   :  { %v364_v22 = vshrl.u32 %v291_v9, 16  ;;  %v367_v23 = vshll.u32 %v291_v9, 16  ;;  %v4426_v27 = vrot.slane %v324_v16, 7  ;;  %v4428_v28 = vrot.slane %v332_v18, 7  ;;  %48 = vst [vmem:[#allocation2 + $0x30] sm:$0x1] %v47_v5 }
  0x15   :  { %v267_v30 = vunpack.c.l.b16 %v220_v14  ;;  %v4438_v33 = vrot.slane %v388_v25, 7  ;;  %v396_v34 = vshrl.u32 %v295_v24, 16  ;;  %51 = vst [vmem:[#allocation2 + $0x38] sm:$0x1] %v50_v15  ;;  %v399_v38 = vshll.u32 %v295_v24, 16  ;;  %v4216_v62 = vld [vmem:[%s5307_s3 + $0xf8] sm:$0xff] }
  0x16   :  { %4272 = vmatpush.bf16.msra.mxu1 %v4187_v6  ;;  %4273 = vmatpush.bf16.msra.mxu2 %v4187_v6  ;;  %v4436_v32 = vrot.slane %v364_v22, 7  ;;  %v329_v35 = vor.u32 %v327_v17, %v4426_v27  ;;  %v337_v36 = vor.u32 %v335_v19, %v4428_v28  ;;  %v175_v45 = vadd.f32 %v4346_v12, %v4406_v54  ;;  %v4224_v63 = vld [vmem:[%s5307_s3 + $0x138] sm:$0xff]  ;;  %v61_v8 = vld [vmem:[#allocation2 + $0x68] sm:$0x1]  ;;  %v4495_v13 = vld [vmem:[#allocation2 + $0x80] sm:$0x1] }
  0x17   :  { %4274 = vmatpush.bf16.msra.mxu3 %v4187_v6  ;;  %3033 = vmatpush.bf16.msra.mxu0 %v4187_v6  ;;  %v393_v41 = vor.u32 %v391_v29, %v4438_v33  ;;  %v527_v42 = vld [vmem:[#allocation2 + $0x70] sm:$0xf]  ;;  %v4458_v49 = vrot.slane %v396_v34, 7  ;;  %v283_v50 = vpack.c.b16 %v267_v30, %v267_v30  ;;  %v159_v1 = vmul.f32 %v4341_v11, %v139_v44  ;;  %v4206_v34 = vld [vmem:[%s5307_s3 + $0xa8] sm:$0xff]  ;;  %v4249_v31 = vld [vmem:[%s5307_s3 + $0x200] sm:$0xff] }
  0x18   :  { %v369_v40 = vor.u32 %v367_v23, %v4436_v32  ;;  %v480_v47 = vsel %vm4432_vm6, %v329_v35, %v479_v20  ;;  %v486_v48 = vsel %vm4432_vm6, %v337_v36, %v485_v21  ;;  %v533_v54 = vld [vmem:[#allocation2 + $0x78] sm:$0xf]  ;;  %v178_v2 = vadd.f32 %v4346_v12, %v158_v55  ;;  %v4207_v17 = vld [vmem:[%s5307_s3 + $0xb0] sm:$0xff]  ;;  %v130_v21 = vld [vmem:[%s5308_s0 + $0x8] sm:$0xff] }
  0x19   :  { %481 = vst [vmem:[#allocation2 + $0x20] sm:$0xf] %v480_v47  ;;  %v528_v53 = vsel %vm4432_vm6, %v393_v41, %v527_v42  ;;  %v401_v57 = vor.u32 %v399_v38, %v4458_v49  ;;  %v300_v60 = vshrl.u32 %v283_v50, 16  ;;  %v303_v61 = vshll.u32 %v283_v50, 16  ;;  %v461_v16 = vld [vmem:[#allocation2 + $0x8] sm:$0xf] }
  0x1a   :  { %4275 = vmatpush.bf16.msra.mxu1 %v4186_v26  ;;  %4276 = vmatpush.bf16.msra.mxu2 %v4186_v26  ;;  %v510_v52 = vsel %vm4432_vm6, %v369_v40, %v509_v37  ;;  %487 = vst [vmem:[#allocation2 + $0x28] sm:$0xf] %v486_v48  ;;  %v162_v5 = vmul.f32 %v4341_v11, %v142_v51  ;;  %v190_v9 = vmax.f32 %v174_v43, 0.0  ;;  %v191_v10 = vmax.f32 %v175_v45, 0.0  ;;  %v4199_v18 = vld [vmem:[%s5307_s3 + $0x70] sm:$0xff]  ;;  %v4198_v35 = vld [vmem:[%s5307_s3 + $0x68] sm:$0xff] }
  0x1b   :  { %4277 = vmatpush.bf16.msra.mxu3 %v4186_v26  ;;  %3034 = vmatpush.bf16.msra.mxu0 %v4186_v26  ;;  %511 = vst [vmem:[#allocation2 + $0x58] sm:$0xf] %v510_v52  ;;  %v534_v6 = vsel %vm4432_vm6, %v401_v57, %v533_v54  ;;  %v4492_v7 = vrot.slane %v300_v60, 7  ;;  %v179_v4 = vadd.f32 %v4346_v12, %v159_v1  ;;  %v59_v19 = vsel %vm4319_vm2, 0, %v58_v0  ;;  %v4215_v22 = vld [vmem:[%s5307_s3 + $0xf0] sm:$0xff]  ;;  %v4214_v40 = vld [vmem:[%s5307_s3 + $0xe8] sm:$0xff] }
  0x1c   :  { %529 = vst [vmem:[#allocation2 + $0x70] sm:$0xf] %v528_v53  ;;  %v163_v14 = vmul.f32 %v4341_v11, %v143_v56  ;;  %v4510_v20 = vadd.f32 %v4346_v12, %v162_v5  ;;  %v4223_v23 = vld [vmem:[%s5307_s3 + $0x130] sm:$0xff]  ;;  %v206_v24 = vpack.c.bf16 %v190_v9, %v190_v9  ;;  %v207_v25 = vpack.c.bf16 %v191_v10, %v191_v10  ;;  %v73_v37 = vld [vmem:[#allocation2 + $0x88] sm:$0x1]  ;;  %v4213_v0 = vld [vmem:[%s5307_s3 + $0xe0] sm:$0xff] }
  0x1d   :  { %535 = vst [vmem:[#allocation2 + $0x78] sm:$0xf] %v534_v6  ;;  %v4499_v15 = vor.u32 %v303_v61, %v4492_v7  ;;  %v62_v26 = vsel %vm4319_vm2, 0, %v61_v8  ;;  %v194_v29 = vmax.f32 %v178_v2, 0.0  ;;  %v195_v36 = vmax.f32 %v179_v4, 0.0  ;;  %v131_v38 = vld [vmem:[%s5308_s0 + $0x10] sm:$0xff] }
  0x1e   :  { %4278 = vmatpush.bf16.msra.mxu1 %v4185_v46  ;;  %4279 = vmatpush.bf16.msra.mxu2 %v4185_v46  ;;  %60 = vst [vmem:[#allocation2 + $0x60] sm:$0x1] %v59_v19  ;;  %v230_v41 = vsel %vm217_vm3, %v206_v24, 0  ;;  %v232_v42 = vsel %vm217_vm3, %v207_v25, 0  ;;  %v183_v45 = vadd.f32 %v4346_v12, %v163_v14  ;;  %v4222_v47 = vld [vmem:[%s5307_s3 + $0x128] sm:$0xff]  ;;  %v71_v51 = vsel %vm4319_vm2, 0, %v4495_v13 }
  0x1f   :  { %4280 = vmatpush.bf16.msra.mxu3 %v4185_v46  ;;  %3035 = vmatpush.bf16.msra.mxu0 %v4185_v46  ;;  %63 = vst [vmem:[#allocation2 + $0x68] sm:$0x1] %v62_v26  ;;  %v210_v43 = vpack.c.bf16 %v194_v29, %v194_v29  ;;  %v272_v48 = vunpack.c.l.b16 %v230_v41  ;;  %v273_v50 = vunpack.c.l.b16 %v232_v42  ;;  %v211_v44 = vpack.c.bf16 %v195_v36, %v195_v36  ;;  %v4221_v1 = vld [vmem:[%s5307_s3 + $0x120] sm:$0xff] }
  0x20   :  { %v561_v30 = vld [vmem:[#allocation2 + $0x20] sm:$0xf]  ;;  %v462_v53 = vsel %vm4432_vm6, %v4499_v15, %v461_v16  ;;  %v198_v55 = vmax.f32 %v4510_v20, 0.0  ;;  %v150_v56 = vmul.f32 %v4341_v11, %v130_v21  ;;  %v74_v5 = vsel %vm4319_vm2, 0, %v73_v37  ;;  %v491_v15 = vld [vmem:[#allocation2 + $0x30] sm:$0xf] }
  0x21   :  { %v562_v39 = vld [vmem:[#allocation2 + $0x28] sm:$0xf]  ;;  %577 = vst [vmem:[#allocation3 + $0x90] sm:$0xf] %v561_v30  ;;  %v238_v54 = vsel %vm217_vm3, %v210_v43, 0  ;;  %v288_v60 = vpack.c.b16 %v272_v48, %v272_v48  ;;  %v289_v61 = vpack.c.b16 %v273_v50, %v273_v50  ;;  %v199_v6 = vmax.f32 %v183_v45, 0.0 }
  0x22   :  { %3126 = vmatpush.bf16.msrb.mxu2 %v4208_v58  ;;  %3077 = vmatpush.bf16.msrb.mxu1 %v4200_v59  ;;  %578 = vst [vmem:[#allocation3 + $0xb4] sm:$0xf] %v562_v39  ;;  %v566_v46 = vld [vmem:[#allocation2 + $0x58] sm:$0xf]  ;;  %v4205_v58 = vld [vmem:[%s5307_s3 + $0xa0] sm:$0xff]  ;;  %v151_v8 = vmul.f32 %v4341_v11, %v131_v38  ;;  %v4567_v19 = vadd.f32 %v4346_v12, %v150_v56  ;;  %vm944_vm10 = vcmask 1042432  }
  0x23   :  { %3175 = vmatpush.bf16.msrb.mxu3 %v4216_v62  ;;  %3224 = vmatpush.bf16.msrb.mxu0 %v4224_v63  ;;  %582 = vst [vmem:[#allocation3 + $0x144] sm:$0xf] %v566_v46  ;;  %v569_v52 = vld [vmem:[#allocation2 + $0x70] sm:$0xf]  ;;  %v4197_v59 = vld [vmem:[%s5307_s3 + $0x60] sm:$0xff]  ;;  %v240_v62 = vsel %vm217_vm3, %v211_v44, 0  ;;  %v276_v63 = vunpack.c.l.b16 %v238_v54 }
  0x24   :  { %v570_v57 = vld [vmem:[#allocation2 + $0x78] sm:$0xf]  ;;  %585 = vst [vmem:[#allocation3 + $0x1b0] sm:$0xf] %v569_v52  ;;  %v277_v2 = vunpack.c.l.b16 %v240_v62  ;;  %v3683_v9 = vld [vmem:[#allocation3 + $0x120] sm:$0xf] }
  0x25   :  { %586 = vst [vmem:[#allocation3 + $0x1d4] sm:$0xf] %v570_v57  ;;  %v340_v10 = vshrl.u32 %v288_v60, 16  ;;  %v343_v4 = vshll.u32 %v288_v60, 16  ;;  %v348_v13 = vshrl.u32 %v289_v61, 16  ;;  %v351_v14 = vshll.u32 %v289_v61, 16 }
  0x26   :  { %3127 = vmatpush.bf16.msrb.mxu2 %v4207_v17  ;;  %3078 = vmatpush.bf16.msrb.mxu1 %v4199_v18  ;;  %463 = vst [vmem:[#allocation2 + $0x8] sm:$0xf] %v462_v53  ;;  %v497_v16 = vld [vmem:[#allocation2 + $0x38] sm:$0xf]  ;;  %v292_v17 = vpack.c.b16 %v276_v63, %v276_v63  ;;  %v293_v18 = vpack.c.b16 %v277_v2, %v277_v2  ;;  %v515_v38 = vld [vmem:[#allocation2 + $0x60] sm:$0xf] }
  0x27   :  { %3176 = vmatpush.bf16.msrb.mxu3 %v4215_v22  ;;  %3225 = vmatpush.bf16.msrb.mxu0 %v4223_v23  ;;  %72 = vst [vmem:[#allocation2 + $0x80] sm:$0x1] %v71_v51  ;;  %v4569_v11 = vrot.slane %v340_v10, 7  ;;  %v4571_v21 = vrot.slane %v348_v13, 7  ;;  %v214_v22 = vpack.c.bf16 %v198_v55, %v198_v55  ;;  %v215_v23 = vpack.c.bf16 %v199_v6, %v199_v6  ;;  %v34_v39 = vld [vmem:[#allocation2 + $0x10] sm:$0x1] }
  0x28   :  { %v3611_v20 = vld [vmem:[#allocation3 + $0x90] sm:$0xf]  ;;  %75 = vst [vmem:[#allocation2 + $0x88] sm:$0x1] %v74_v5  ;;  %v372_v25 = vshrl.u32 %v292_v17, 16  ;;  %v375_v26 = vshll.u32 %v292_v17, 16 }
  0x29   :  { %v4135_v24 = vld [vmem:[#allocation3 + $0xb0] sm:$0xf0]  ;;  %v380_v29 = vshrl.u32 %v293_v18, 16  ;;  %v383_v30 = vshll.u32 %v293_v18, 16  ;;  %v345_v36 = vor.u32 %v343_v4, %v4569_v11  ;;  %v353_v37 = vor.u32 %v351_v14, %v4571_v21  ;;  %v521_v45 = vld [vmem:[#allocation2 + $0x68] sm:$0xf] }
  0x2a   :  { %3128 = vmatpush.bf16.msrb.mxu2 %v4206_v34  ;;  %3079 = vmatpush.bf16.msrb.mxu1 %v4198_v35  ;;  %v3612_v34 = vor.u32 %v4135_v24, %v3611_v20  ;;  %v4153_v35 = vld [vmem:[#allocation3 + $0x140] sm:$0xf0]  ;;  %v4575_v42 = vrot.slane %v372_v25, 7  ;;  %v37_v46 = vld [vmem:[#allocation2 + $0x18] sm:$0x1]  ;;  %v246_v51 = vsel %vm217_vm3, %v214_v22, 0 }
  0x2b   :  { %3177 = vmatpush.bf16.msrb.mxu3 %v4214_v40  ;;  %3226 = vmatpush.bf16.msrb.mxu0 %v4222_v47  ;;  %v3684_v40 = vor.u32 %v4153_v35, %v3683_v9  ;;  %v3755_v41 = vld [vmem:[#allocation3 + $0x1b0] sm:$0xf]  ;;  %v4577_v43 = vrot.slane %v380_v29, 7  ;;  %v171_v47 = vadd.f32 %v4346_v12, %v151_v8  ;;  %v492_v50 = vsel %vm4432_vm6, %v345_v36, %v491_v15  ;;  %v4204_v53 = vld [vmem:[%s5307_s3 + $0x98] sm:$0xff]  ;;  %v3539_v8 = vld [vmem:[#allocation3] sm:$0xf] }
  0x2c   :  { %3046 = vmatmul.bf16.vlgmr.msra.gmra.mxu1 %v3612_v34  ;;  %v4171_v48 = vld [vmem:[#allocation3 + $0x1d0] sm:$0xf0]  ;;  %v498_v44 = vsel %vm4432_vm6, %v353_v37, %v497_v16  ;;  %v248_v52 = vsel %vm217_vm3, %v215_v23, 0  ;;  %v4196_v12 = vld [vmem:[%s5307_s3 + $0x58] sm:$0xff]  ;;  %493 = vst [vmem:[#allocation2 + $0x30] sm:$0xf] %v492_v50  ;;  %v377_v56 = vor.u32 %v375_v26, %v4575_v42 }
  0x2d   :  { %3056 = vmatmul.bf16.vlgmr.msra.gmra.mxu2 %v3684_v40  ;;  %v3756_v54 = vor.u32 %v4171_v48, %v3755_v41  ;;  %v558_v55 = vld [vmem:[#allocation2 + $0x8] sm:$0xf]  ;;  %v385_v57 = vor.u32 %v383_v30, %v4577_v43  ;;  %v281_v60 = vunpack.c.l.b16 %v248_v52  ;;  %v35_v61 = vsel %vm4319_vm2, 0, %v34_v39  ;;  %499 = vst [vmem:[#allocation2 + $0x38] sm:$0xf] %v498_v44  ;;  %v4220_v23 = vld [vmem:[%s5307_s3 + $0x118] sm:$0xff] }
  0x2e   :  { %3129 = vmatpush.bf16.msrb.mxu2 %v4205_v58  ;;  %3080 = vmatpush.bf16.msrb.mxu1 %v4197_v59  ;;  %v4212_v58 = vld [vmem:[%s5307_s3 + $0xd8] sm:$0xff]  ;;  %574 = vst [vmem:[#allocation3 + $0x24] sm:$0xf] %v558_v55  ;;  %v280_v59 = vunpack.c.l.b16 %v246_v51  ;;  %v516_v62 = vsel %vm4432_vm6, %v377_v56, %v515_v38  ;;  %v38_v6 = vsel %vm4319_vm2, 0, %v37_v46  ;;  %v81_v16 = vld [vmem:[#allocation2 + $0xc] sm:$0x1] }
  0x2f   :  { %3178 = vmatpush.bf16.msrb.mxu3 %v4213_v0  ;;  %3227 = vmatpush.bf16.msrb.mxu0 %v4221_v1  ;;  %v522_v63 = vsel %vm4432_vm6, %v385_v57, %v521_v45  ;;  %v186_v0 = vmax.f32 %v4567_v19, 0.0  ;;  %v187_v1 = vmax.f32 %v171_v47, 0.0  ;;  %517 = vst [vmem:[#allocation2 + $0x60] sm:$0xf] %v516_v62  ;;  %v297_v5 = vpack.c.b16 %v281_v60, %v281_v60  ;;  %v539_v18 = vld [vmem:[#allocation2 + $0x80] sm:$0xf] }
  0x30   :  { %3066 = vmatmul.bf16.vlgmr.msra.gmra.mxu3 %v3756_v54  ;;  %v296_v2 = vpack.c.b16 %v280_v59, %v280_v59  ;;  %523 = vst [vmem:[#allocation2 + $0x68] sm:$0xf] %v522_v63  ;;  %v545_v19 = vld [vmem:[#allocation2 + $0x88] sm:$0xf]  ;;  %v4203_v24 = vld [vmem:[%s5307_s3 + $0x90] sm:$0xff]  ;;  %v82_v52 = vsel %vm4608_vm7, 0, %v81_v16 }
  0x31   :  { %v202_v9 = vpack.c.bf16 %v186_v0, %v186_v0  ;;  %v203_v10 = vpack.c.bf16 %v187_v1, %v187_v1  ;;  %v412_v14 = vshrl.u32 %v297_v5, 16  ;;  %v415_v15 = vshll.u32 %v297_v5, 16  ;;  %36 = vst [vmem:[#allocation2 + $0x10] sm:$0x1] %v35_v61  ;;  %v4195_v35 = vld [vmem:[%s5307_s3 + $0x50] sm:$0xff]  ;;  %v4202_v39 = vld [vmem:[%s5307_s3 + $0x88] sm:$0xff] }
  0x32   :  { %3130 = vmatpush.bf16.msrb.mxu2 %v4204_v53  ;;  %3081 = vmatpush.bf16.msrb.mxu1 %v4196_v12  ;;  %v404_v4 = vshrl.u32 %v296_v2, 16  ;;  %v407_v13 = vshll.u32 %v296_v2, 16  ;;  %39 = vst [vmem:[#allocation2 + $0x18] sm:$0x1] %v38_v6  ;;  %v4211_v36 = vld [vmem:[%s5307_s3 + $0xd0] sm:$0xff]  ;;  %v4194_v47 = vld [vmem:[%s5307_s3 + $0x48] sm:$0xff] }
  0x33   :  { %3179 = vmatpush.bf16.msrb.mxu3 %v4212_v58  ;;  %v222_v20 = vsel %vm217_vm3, %v202_v9, 0  ;;  %v224_v22 = vsel %vm217_vm3, %v203_v10, 0  ;;  %v563_v25 = vld [vmem:[#allocation2 + $0x30] sm:$0xf]  ;;  %v4622_v29 = vrot.slane %v412_v14, 7  ;;  %3228 = vmatpush.bf16.msrb.mxu0 %v4220_v23  ;;  %v4210_v48 = vld [vmem:[%s5307_s3 + $0xc8] sm:$0xff] }
  0x34   :  { %v4620_v26 = vrot.slane %v404_v4, 7  ;;  %v268_v30 = vunpack.c.l.b16 %v222_v20  ;;  %v269_v34 = vunpack.c.l.b16 %v224_v22  ;;  %579 = vst [vmem:[#allocation3 + $0xd8] sm:$0xf] %v563_v25  ;;  %v4219_v38 = vld [vmem:[%s5307_s3 + $0x110] sm:$0xff]  ;;  %v564_v41 = vld [vmem:[#allocation2 + $0x38] sm:$0xf] }
  0x35   :  { %v4117_v37 = vld [vmem:[#allocation3 + $0x20] sm:$0xf0]  ;;  %v417_v46 = vor.u32 %v415_v15, %v4622_v29  ;;  %580 = vst [vmem:[#allocation3 + $0xfc] sm:$0xf] %v564_v41  ;;  %v4218_v55 = vld [vmem:[%s5307_s3 + $0x108] sm:$0xff]  ;;  %v306_v9 = vrot.slane %v4492_v7, 4 }
  0x36   :  { %3131 = vmatpush.bf16.msrb.mxu2 %v4203_v24  ;;  %v3540_v40 = vor.u32 %v4117_v37, %v3539_v8  ;;  %v409_v45 = vor.u32 %v407_v13, %v4620_v26  ;;  %3082 = vmatpush.bf16.msrb.mxu1 %v4195_v35  ;;  %v567_v50 = vld [vmem:[#allocation2 + $0x60] sm:$0xf]  ;;  %v284_v44 = vpack.c.b16 %v268_v30, %v268_v30  ;;  %v590_v0 = vld [vmem:[#allocation2 + $0x4] sm:$0x1]  ;;  %v591_v14 = vld [vmem:[#allocation2 + $0x8] sm:$0xf] }
  0x37   :  { %3180 = vmatpush.bf16.msrb.mxu3 %v4211_v36  ;;  %v285_v51 = vpack.c.b16 %v269_v34, %v269_v34  ;;  %v568_v53 = vld [vmem:[#allocation2 + $0x68] sm:$0xf]  ;;  %583 = vst [vmem:[#allocation3 + $0x168] sm:$0xf] %v567_v50  ;;  %v546_v54 = vsel %vm4432_vm6, %v417_v46, %v545_v19  ;;  %v4201_v56 = vld [vmem:[%s5307_s3 + $0x80] sm:$0xff]  ;;  %3229 = vmatpush.bf16.msrb.mxu0 %v4219_v38  ;;  %v634_v23 = vshll.u32 %v590_v0, 16 }
  0x38   :  { %3036 = vmatmul.bf16.vlgmr.msra.gmra.mxu0 %v3540_v40  ;;  %v540_v12 = vsel %vm4432_vm6, %v409_v45, %v539_v18  ;;  %584 = vst [vmem:[#allocation3 + $0x18c] sm:$0xf] %v568_v53  ;;  %v308_v57 = vshrl.u32 %v284_v44, 16  ;;  %v311_v58 = vshll.u32 %v284_v44, 16  ;;  %v589_v61 = vld [vmem:[#allocation2] sm:$0xf] }
  0x39   :  { %v316_v59 = vshrl.u32 %v285_v51, 16  ;;  %v319_v60 = vshll.u32 %v285_v51, 16  ;;  %541 = vst [vmem:[#allocation2 + $0x80] sm:$0xf] %v540_v12  ;;  %v467_v62 = vld [vmem:[#allocation2 + $0x10] sm:$0xf] }
  0x3a   :  { %3132 = vmatpush.bf16.msrb.mxu2 %v4202_v39  ;;  %3083 = vmatpush.bf16.msrb.mxu1 %v4194_v47  ;;  %v4193_v63 = vld [vmem:[%s5307_s3 + $0x40] sm:$0xff]  ;;  %547 = vst [vmem:[#allocation2 + $0x88] sm:$0xf] %v546_v54  ;;  %v4659_v1 = vrot.slane %v308_v57, 7  ;;  %v473_v8 = vld [vmem:[#allocation2 + $0x18] sm:$0xf] }
  0x3b   :  { %3181 = vmatpush.bf16.msrb.mxu3 %v4210_v48  ;;  %v4661_v2 = vrot.slane %v316_v59, 7  ;;  %v4209_v5 = vld [vmem:[%s5307_s3 + $0xc0] sm:$0xff]  ;;  %v3647_v6 = vld [vmem:[#allocation3 + $0xd8] sm:$0xf]  ;;  %83 = vst [vmem:[#allocation2 + $0xc] sm:$0x1] %v82_v52  ;;  %3230 = vmatpush.bf16.msrb.mxu0 %v4218_v55 }
  0x3c   :  { %v313_v10 = vor.u32 %v311_v58, %v4659_v1  ;;  %v4217_v13 = vld [vmem:[%s5307_s3 + $0x100] sm:$0xff]  ;;  %vm621_vm8 = vsmask.f32 3328  ;;  %v4144_v15 = vld [vmem:[#allocation3 + $0xf8] sm:$0xf0]  ;;  %v625_v16 = vshrl.u32 %v589_v61, 16 }
  0x3d   :  { %v321_v4 = vor.u32 %v319_v60, %v4661_v2  ;;  %vm622_vm9 = vsmask.f32 7440  ;;  %v628_v18 = vshll.u32 %v589_v61, 16  ;;  %v3648_v19 = vor.u32 %v4144_v15, %v3647_v6  ;;  %v880_v24 = vld [vmem:[#allocation2] sm:$0xe]  ;;  %v4240_v54 = vld [vmem:[%s5307_s3 + $0x1b8] sm:$0xff] }
  0x3e   :  { %3133 = vmatpush.bf16.msrb.mxu2 %v4201_v56  ;;  %3084 = vmatpush.bf16.msrb.mxu1 %v4193_v63  ;;  %v3719_v7 = vld [vmem:[#allocation3 + $0x168] sm:$0xf]  ;;  %v468_v20 = vsel %vm4432_vm6, %v313_v10, %v467_v62  ;;  %v627_v30 = vrot.slane %v625_v16, 4  ;;  %v881_v35 = vld [vmem:[#allocation2 + $0x4] sm:$0x1]  ;;  %v636_v38 = vrot.slane %v634_v23, 5  ;;  %vm4678_vm11 = vmor %vm621_vm8, %vm622_vm9 }
  0x3f   :  { %3182 = vmatpush.bf16.msrb.mxu3 %v4209_v5  ;;  %v474_v22 = vsel %vm4432_vm6, %v321_v4, %v473_v8  ;;  %v4162_v25 = vld [vmem:[#allocation3 + $0x188] sm:$0xf0]  ;;  %469 = vst [vmem:[#allocation2 + $0x10] sm:$0xf] %v468_v20  ;;  %v630_v34 = vrot.slane %v628_v18, 5  ;;  %3051 = vmatmul.bf16.gmra.mxu1 %v3648_v19  ;;  %v639_v39 = vshrl.u32 %v591_v14, 16 }
  0x40   :  { %v3720_v36 = vor.u32 %v4162_v25, %v3719_v7  ;;  %v571_v37 = vld [vmem:[#allocation2 + $0x80] sm:$0xf]  ;;  %475 = vst [vmem:[#allocation2 + $0x18] sm:$0xf] %v474_v22  ;;  %3231 = vmatpush.bf16.msrb.mxu0 %v4217_v13  ;;  %v642_v45 = vshll.u32 %v591_v14, 16  ;;  %vm945_vm12 = vcmask 1046532  }
  0x41   :  { %v572_v40 = vld [vmem:[#allocation2 + $0x88] sm:$0xf]  ;;  %587 = vst [vmem:[#allocation3 + $0x1f8] sm:$0xf] %v571_v37  ;;  %v631_v41 = vor.u32 %v630_v34, %v627_v30  ;;  %v641_v48 = vrot.slane %v639_v39, 4  ;;  %vm4684_vm13 = vmor %vm944_vm10, %vm945_vm12  ;;  %v3489_v53 = vrot.slane %v880_v24, 9 }
  0x42   :  { %3061 = vmatmul.bf16.gmra.mxu2 %v3720_v36  ;;  %588 = vst [vmem:[#allocation3 + $0x21c] sm:$0xf] %v572_v40  ;;  %v464_v46 = vld [vmem:[#allocation2 + $0xc] sm:$0x1]  ;;  %v644_v51 = vrot.slane %v642_v45, 5  ;;  %v949_v55 = vrot.slane %v881_v35, 5 }
  0x43   :  { %v465_v50 = vsel %vm4319_vm2, %v306_v9, %v464_v46  ;;  %v632_v44 = vrot.slane %v631_v41, 4  ;;  %v1043_v12 = vld [vmem:[#allocation2 + $0x8] sm:$0xf]  ;;  %v84_v56 = vld [vmem:[#allocation2 + $0x14] sm:$0x1]  ;;  %3322 = vmatpush.bf16.msra.mxu2 %v4240_v54  ;;  %v314_v30 = vrot.slane %v4659_v1, 4 }
  0x44   :  { %466 = vst [vmem:[#allocation2 + $0xc] sm:$0x1] %v465_v50  ;;  %v882_v58 = vld [vmem:[#allocation2 + $0x8] sm:$0xe]  ;;  %v645_v61 = vor.u32 %v644_v51, %v641_v48  ;;  %v950_v62 = vsel %vm4684_vm13, %v3489_v53, %v949_v55  ;;  %v85_v5 = vsel %vm4608_vm7, 0, %v84_v56  ;;  %v4248_v39 = vld [vmem:[%s5307_s3 + $0x1f8] sm:$0xff] }
  0x45   :  { %v637_v57 = vsel %vm4678_vm11, %v632_v44, %v636_v38  ;;  %1059 = vst [vmem:[#allocation3 + $0xc] sm:$0xf] %v1043_v12  ;;  %v1075_v59 = vld [vmem:[#allocation2 + $0x8] sm:$0xf]  ;;  %v3490_v4 = vrot.slane %v882_v58, 9  ;;  %v4232_v40 = vld [vmem:[%s5307_s3 + $0x178] sm:$0xff]  ;;  %3371 = vmatpush.bf16.msra.mxu3 %v4248_v39 }
  0x46   :  { %v559_v60 = vld [vmem:[#allocation2 + $0x10] sm:$0xf]  ;;  %864 = vst [vmem:[#allocation3 + $0x4] sm:$0xf] %v637_v57  ;;  %v1108_v6 = vshrl.u32 %v1075_v59, 16  ;;  %v1111_v13 = vshll.u32 %v1075_v59, 16  ;;  %3273 = vmatpush.bf16.msra.mxu1 %v4232_v40 }
  0x47   :  { %v1044_v63 = vld [vmem:[#allocation2 + $0x10] sm:$0xf]  ;;  %v560_v0 = vld [vmem:[#allocation2 + $0x18] sm:$0xf]  ;;  %575 = vst [vmem:[#allocation3 + $0x48] sm:$0xf] %v559_v60 }
  0x48   :  { %v3791_v8 = vld [vmem:[#allocation3 + $0x1f8] sm:$0xf]  ;;  %576 = vst [vmem:[#allocation3 + $0x6c] sm:$0xf] %v560_v0  ;;  %v1077_v9 = vld [vmem:[#allocation2 + $0x10] sm:$0xf] }
  0x49   :  { %v4180_v10 = vld [vmem:[#allocation3 + $0x218] sm:$0xf0]  ;;  %1027 = vst [vmem:[#allocation3 + $0x8] sm:$0xf] %v950_v62  ;;  %v646_v15 = vrot.slane %v645_v61, 4  ;;  %v1110_v16 = vrot.slane %v1108_v6, 4 }
  0x4a   :  { %v3792_v14 = vor.u32 %v4180_v10, %v3791_v8  ;;  %1060 = vst [vmem:[#allocation3 + $0x30] sm:$0xf] %v1044_v63  ;;  %v87_v18 = vld [vmem:[#allocation2 + $0x1c] sm:$0x1]  ;;  %v1122_v24 = vshrl.u32 %v1077_v9, 16  ;;  %v1125_v25 = vshll.u32 %v1077_v9, 16 }
  0x4b   :  { %v592_v19 = vld [vmem:[#allocation2 + $0xc] sm:$0x1]  ;;  %86 = vst [vmem:[#allocation2 + $0x14] sm:$0x1] %v85_v5  ;;  %v1113_v34 = vrot.slane %v1111_v13, 5  ;;  %v88_v41 = vsel %vm4608_vm7, 0, %v87_v18 }
  0x4c   :  { %v883_v7 = vld [vmem:[#allocation2 + $0xc] sm:$0x1]  ;;  %3071 = vmatmul.bf16.gmra.mxu3 %v3792_v14  ;;  %v648_v20 = vshll.u32 %v592_v19, 16  ;;  %v4256_v48 = vld [vmem:[%s5307_s3 + $0x238] sm:$0xff]  ;;  %v1124_v51 = vrot.slane %v1122_v24, 4  ;;  %v1127_v53 = vrot.slane %v1125_v25, 5 }
  0x4d   :  { %v953_v22 = vrot.slane %v883_v7, 5  ;;  %v1076_v23 = vld [vmem:[#allocation2 + $0xc] sm:$0x1]  ;;  %v1114_v1 = vor.u32 %v1113_v34, %v1110_v16  ;;  %89 = vst [vmem:[#allocation2 + $0x1c] sm:$0x1] %v88_v41  ;;  %v322_v54 = vrot.slane %v4661_v2, 4  ;;  %3420 = vmatpush.bf16.msra.mxu0 %v4256_v48 }
  0x4e   :  { %v1117_v35 = vshll.u32 %v1076_v23, 16  ;;  %v3575_v36 = vld [vmem:[#allocation3 + $0x48] sm:$0xf]  ;;  %v650_v37 = vrot.slane %v648_v20, 5  ;;  %v593_v12 = vld [vmem:[#allocation2 + $0x10] sm:$0xf]  ;;  %v1128_v8 = vor.u32 %v1127_v53, %v1124_v51 }
  0x4f   :  { %v954_v38 = vsel %vm4684_vm13, %v3490_v4, %v953_v22  ;;  %v4126_v45 = vld [vmem:[#allocation3 + $0x68] sm:$0xf0]  ;;  %v1115_v55 = vrot.slane %v1114_v1, 4  ;;  %v595_v57 = vld [vmem:[#allocation2 + $0x18] sm:$0xf]  ;;  %v653_v58 = vshrl.u32 %v593_v12, 16 }
  0x50   :  { %1028 = vst [vmem:[#allocation3 + $0x2c] sm:$0xf] %v954_v38  ;;  %v1119_v46 = vrot.slane %v1117_v35, 5  ;;  %v3576_v50 = vor.u32 %v4126_v45, %v3575_v36  ;;  %v651_v44 = vsel %vm4678_vm11, %v646_v15, %v650_v37  ;;  %v656_v59 = vshll.u32 %v593_v12, 16  ;;  %v3547_v60 = vld [vmem:[#allocation3 + $0x8] sm:$0xf] }
  0x51   :  { %865 = vst [vmem:[#allocation3 + $0x28] sm:$0xf] %v651_v44  ;;  %v4114_v61 = vld [vmem:[#allocation3 + $0xc] sm:$0xf]  ;;  %v3549_v62 = vld [vmem:[#allocation3 + $0x2c] sm:$0xf0] }
  0x52   :  { %3041 = vmatmul.bf16.gmra.mxu0 %v3576_v50  ;;  %v470_v56 = vld [vmem:[#allocation2 + $0x14] sm:$0x1]  ;;  %v1120_v0 = vsel %vm4678_vm11, %v1115_v55, %v1119_v46  ;;  %v667_v5 = vshrl.u32 %v595_v57, 16  ;;  %v670_v6 = vshll.u32 %v595_v57, 16  ;;  %v4113_v2 = vld [vmem:[#allocation3 + $0x4] sm:$0xf]  ;;  %v3552_v25 = vor.u32 %v4114_v61, %v3549_v62 }
  0x53   :  { %v471_v63 = vsel %vm4319_vm2, %v314_v30, %v470_v56  ;;  %v655_v9 = vrot.slane %v653_v58, 4  ;;  %v658_v10 = vrot.slane %v656_v59, 5  ;;  %v884_v4 = vld [vmem:[#allocation2 + $0x10] sm:$0xe]  ;;  %1347 = vst [vmem:[#allocation3 + $0x10] sm:$0xf] %v1120_v0 }
  0x54   :  { %472 = vst [vmem:[#allocation2 + $0x14] sm:$0x1] %v471_v63  ;;  %v669_v13 = vrot.slane %v667_v5, 4  ;;  %v672_v14 = vrot.slane %v670_v6, 5  ;;  %v1045_v15 = vld [vmem:[#allocation2 + $0x18] sm:$0xf] }
  0x55   :  { %v659_v18 = vor.u32 %v658_v10, %v655_v9  ;;  %v1046_v19 = vld [vmem:[#allocation2 + $0x20] sm:$0xf]  ;;  %1061 = vst [vmem:[#allocation3 + $0x54] sm:$0xf] %v1045_v15  ;;  %v330_v7 = vrot.slane %v4426_v27, 4  ;;  %v4239_v23 = vld [vmem:[%s5307_s3 + $0x1b0] sm:$0xff] }
  0x56   :  { %v476_v22 = vld [vmem:[#allocation2 + $0x1c] sm:$0x1]  ;;  %1062 = vst [vmem:[#allocation3 + $0x78] sm:$0xf] %v1046_v19  ;;  %v1129_v30 = vrot.slane %v1128_v8, 4  ;;  %v3491_v36 = vrot.slane %v884_v4, 9  ;;  %v673_v45 = vor.u32 %v672_v14, %v669_v13  ;;  %3323 = vmatpush.bf16.msra.mxu2 %v4239_v23 }
  0x57   :  { %v4118_v16 = vld [vmem:[#allocation3 + $0x28] sm:$0xf0]  ;;  %v477_v34 = vsel %vm4319_vm2, %v322_v54, %v476_v22  ;;  %v4724_v35 = vld [vmem:[#allocation2 + $0x18] sm:$0xe]  ;;  %v90_v37 = vld [vmem:[#allocation2 + $0x24] sm:$0x1] }
  0x58   :  { %v3548_v20 = vor.u32 %v4118_v16, %v3547_v60  ;;  %v3541_v24 = vld [vmem:[#allocation3 + $0x24] sm:$0xf0]  ;;  %478 = vst [vmem:[#allocation2 + $0x1c] sm:$0x1] %v477_v34  ;;  %v660_v39 = vrot.slane %v659_v18, 4  ;;  %v91_v40 = vsel %vm4608_vm7, 0, %v90_v37 }
  0x59   :  { %v3544_v38 = vor.u32 %v4113_v2, %v3541_v24  ;;  %v1079_v41 = vld [vmem:[#allocation2 + $0x18] sm:$0xf]  ;;  %92 = vst [vmem:[#allocation2 + $0x24] sm:$0x1] %v91_v40  ;;  %v1081_v1 = vld [vmem:[#allocation2 + $0x20] sm:$0xf] }
  0x5a   :  { %3134 = vmatmul.bf16.vlgmr.msrb.gmra.mxu2 %v3548_v20  ;;  %v1136_v46 = vshrl.u32 %v1079_v41, 16  ;;  %v1139_v48 = vshll.u32 %v1079_v41, 16  ;;  %v136_v56 = vld [vmem:[%s5308_s0 + $0x38] sm:$0xff]  ;;  %v3492_v57 = vrot.slane %v4724_v35, 9  ;;  %v1150_v59 = vshrl.u32 %v1081_v1, 16  ;;  %v4247_v61 = vld [vmem:[%s5307_s3 + $0x1f0] sm:$0xff] }
  0x5b   :  { %3085 = vmatmul.bf16.vlgmr.msrb.gmra.mxu1 %v3544_v38  ;;  %v1078_v50 = vld [vmem:[#allocation2 + $0x14] sm:$0x1]  ;;  %v1153_v60 = vshll.u32 %v1081_v1, 16  ;;  %v674_v0 = vrot.slane %v673_v45, 4  ;;  %3372 = vmatpush.bf16.msra.mxu3 %v4247_v61  ;;  %v93_v4 = vld [vmem:[#allocation2 + $0x2c] sm:$0x1] }
  0x5c   :  { %v594_v44 = vld [vmem:[#allocation2 + $0x14] sm:$0x1]  ;;  %3183 = vmatmul.bf16.vlgmr.msrb.gmra.mxu3 %v3552_v25  ;;  %v1131_v53 = vshll.u32 %v1078_v50, 16  ;;  %v1138_v55 = vrot.slane %v1136_v46, 4  ;;  %v1141_v58 = vrot.slane %v1139_v48, 5  ;;  %v1152_v9 = vrot.slane %v1150_v59, 4 }
  0x5d   :  { %v885_v51 = vld [vmem:[#allocation2 + $0x14] sm:$0x1]  ;;  %v662_v12 = vshll.u32 %v594_v44, 16  ;;  %v1155_v10 = vrot.slane %v1153_v60, 5  ;;  %v4746_v13 = vld [vmem:[%s5309_s1] ss:$0 sm:$0xff] }
  0x5e   :  { %v957_v54 = vrot.slane %v885_v51, 5  ;;  %v1133_v62 = vrot.slane %v1131_v53, 5  ;;  %v4231_v6 = vld [vmem:[%s5307_s3 + $0x170] sm:$0xff]  ;;  %v1142_v8 = vor.u32 %v1141_v58, %v1138_v55  ;;  %v156_v14 = vmul.f32 %v4746_v13, %v136_v56  ;;  %v597_v40 = vld [vmem:[#allocation2 + $0x20] sm:$0xf]  ;;  %v4238_v53 = vld [vmem:[%s5307_s3 + $0x1a8] sm:$0xff] }
  0x5f   :  { %v664_v63 = vrot.slane %v662_v12, 5  ;;  %v4255_v2 = vld [vmem:[%s5307_s3 + $0x230] sm:$0xff]  ;;  %v596_v16 = vld [vmem:[#allocation2 + $0x1c] sm:$0x1]  ;;  %3274 = vmatpush.bf16.msra.mxu1 %v4231_v6  ;;  %v94_v35 = vsel %vm4608_vm7, 0, %v93_v4  ;;  %v1156_v45 = vor.u32 %v1155_v10, %v1152_v9  ;;  %v681_v46 = vshrl.u32 %v597_v40, 16  ;;  %3324 = vmatpush.bf16.msra.mxu2 %v4238_v53 }
  0x60   :  { %v958_v5 = vsel %vm4684_vm13, %v3491_v36, %v957_v54  ;;  %v1134_v15 = vsel %vm4678_vm11, %v1129_v30, %v1133_v62  ;;  %v887_v19 = vld [vmem:[#allocation2 + $0x1c] sm:$0x1]  ;;  %3421 = vmatpush.bf16.msra.mxu0 %v4255_v2  ;;  %v676_v22 = vshll.u32 %v596_v16, 16  ;;  %v482_v24 = vld [vmem:[#allocation2 + $0x24] sm:$0x1]  ;;  %v1143_v34 = vrot.slane %v1142_v8, 4 }
  0x61   :  { %1029 = vst [vmem:[#allocation3 + $0x50] sm:$0xf] %v958_v5  ;;  %v665_v18 = vsel %vm4678_vm11, %v660_v39, %v664_v63  ;;  %v1080_v20 = vld [vmem:[#allocation2 + $0x1c] sm:$0x1]  ;;  %v961_v23 = vrot.slane %v887_v19, 5  ;;  %v483_v25 = vsel %vm4319_vm2, %v330_v7, %v482_v24  ;;  %v684_v50 = vshll.u32 %v597_v40, 16 }
  0x62   :  { %1348 = vst [vmem:[#allocation3 + $0x34] sm:$0xf] %v1134_v15  ;;  %v1145_v30 = vshll.u32 %v1080_v20, 16  ;;  %v678_v36 = vrot.slane %v676_v22, 5  ;;  %v4123_v38 = vld [vmem:[#allocation3 + $0x54] sm:$0xf] }
  0x63   :  { %866 = vst [vmem:[#allocation3 + $0x4c] sm:$0xf] %v665_v18  ;;  %v962_v37 = vsel %vm4684_vm13, %v3492_v57, %v961_v23  ;;  %v3585_v39 = vld [vmem:[#allocation3 + $0x74] sm:$0xf0]  ;;  %v4764_v27 = vld [vmem:[%s5310_s2] ss:$0 sm:$0xff] }
  0x64   :  { %484 = vst [vmem:[#allocation2 + $0x24] sm:$0x1] %v483_v25  ;;  %v176_v7 = vadd.f32 %v4764_v27, %v156_v14  ;;  %v1147_v41 = vrot.slane %v1145_v30, 5  ;;  %v599_v1 = vld [vmem:[#allocation2 + $0x28] sm:$0xf]  ;;  %v679_v48 = vsel %vm4678_vm11, %v674_v0, %v678_v36  ;;  %v338_v12 = vrot.slane %v4428_v28, 4 }
  0x65   :  { %1030 = vst [vmem:[#allocation3 + $0x74] sm:$0xf] %v962_v37  ;;  %v695_v44 = vshrl.u32 %v599_v1, 16  ;;  %v698_v51 = vshll.u32 %v599_v1, 16  ;;  %v3555_v54 = vld [vmem:[#allocation3 + $0x10] sm:$0xf]  ;;  %v3588_v61 = vor.u32 %v4123_v38, %v3585_v39 }
  0x66   :  { %95 = vst [vmem:[#allocation2 + $0x2c] sm:$0x1] %v94_v35  ;;  %v1148_v55 = vsel %vm4678_vm11, %v1143_v34, %v1147_v41  ;;  %v683_v56 = vrot.slane %v681_v46, 4  ;;  %v686_v58 = vrot.slane %v684_v50, 5  ;;  %v192_v59 = vmax.f32 %v176_v7, 0.0 }
  0x67   :  { %867 = vst [vmem:[#allocation3 + $0x70] sm:$0xf] %v679_v48  ;;  %v1157_v62 = vrot.slane %v1156_v45, 4  ;;  %v697_v63 = vrot.slane %v695_v44, 4  ;;  %v888_v0 = vld [vmem:[#allocation2 + $0x20] sm:$0xe] }
  0x68   :  { %v3583_v57 = vld [vmem:[#allocation3 + $0x50] sm:$0xf]  ;;  %1349 = vst [vmem:[#allocation3 + $0x58] sm:$0xf] %v1148_v55  ;;  %v687_v2 = vor.u32 %v686_v58, %v683_v56  ;;  %v700_v28 = vrot.slane %v698_v51, 5  ;;  %v3493_v8 = vrot.slane %v888_v0, 9  ;;  %v208_v20 = vpack.c.bf16 %v192_v59, %v192_v59 }
  0x69   :  { %v4119_v60 = vld [vmem:[#allocation3 + $0x30] sm:$0xf0]  ;;  %v1047_v9 = vld [vmem:[#allocation2 + $0x28] sm:$0xf]  ;;  %v346_v22 = vrot.slane %v4569_v11, 4 }
  0x6a   :  { %v3556_v5 = vor.u32 %v4119_v60, %v3555_v54  ;;  %v4122_v6 = vld [vmem:[#allocation3 + $0x4c] sm:$0xf]  ;;  %v688_v18 = vrot.slane %v687_v2, 4  ;;  %1063 = vst [vmem:[#allocation3 + $0x9c] sm:$0xf] %v1047_v9  ;;  %v701_v38 = vor.u32 %v700_v28, %v697_v63  ;;  %v234_v50 = vsel %vm217_vm3, %v208_v20, 0 }
  0x6b   :  { %v1082_v10 = vld [vmem:[#allocation2 + $0x24] sm:$0x1]  ;;  %v1048_v40 = vld [vmem:[#allocation2 + $0x30] sm:$0xf]  ;;  %v96_v7 = vld [vmem:[#allocation2 + $0x34] sm:$0x1] }
  0x6c   :  { %v598_v4 = vld [vmem:[#allocation2 + $0x24] sm:$0x1]  ;;  %3232 = vmatmul.bf16.vlgmr.msrb.gmra.mxu0 %v3556_v5  ;;  %v4127_v15 = vld [vmem:[#allocation3 + $0x70] sm:$0xf0]  ;;  %v1159_v16 = vshll.u32 %v1082_v10, 16  ;;  %3188 = vmatmul.bf16.gmra.mxu3 %v3588_v61  ;;  %v97_v46 = vsel %vm4608_vm7, 0, %v96_v7 }
  0x6d   :  { %v889_v14 = vld [vmem:[#allocation2 + $0x24] sm:$0x1]  ;;  %v690_v19 = vshll.u32 %v598_v4, 16  ;;  %v3584_v23 = vor.u32 %v4127_v15, %v3583_v57  ;;  %v488_v24 = vld [vmem:[#allocation2 + $0x2c] sm:$0x1]  ;;  %v702_v57 = vrot.slane %v701_v38, 4 }
  0x6e   :  { %v965_v25 = vrot.slane %v889_v14, 5  ;;  %v3577_v34 = vld [vmem:[#allocation3 + $0x6c] sm:$0xf0]  ;;  %v1161_v30 = vrot.slane %v1159_v16, 5  ;;  %v489_v35 = vsel %vm4319_vm2, %v338_v12, %v488_v24  ;;  %v890_v1 = vld [vmem:[#allocation2 + $0x28] sm:$0xe]  ;;  %v274_v12 = vunpack.c.l.b16 %v234_v50 }
  0x6f   :  { %v692_v36 = vrot.slane %v690_v19, 5  ;;  %v3580_v37 = vor.u32 %v4122_v6, %v3577_v34  ;;  %3139 = vmatmul.bf16.gmra.mxu2 %v3584_v23  ;;  %490 = vst [vmem:[#allocation2 + $0x2c] sm:$0x1] %v489_v35  ;;  %v1083_v48 = vld [vmem:[#allocation2 + $0x28] sm:$0xf]  ;;  %v3494_v5 = vrot.slane %v890_v1, 9 }
  0x70   :  { %v966_v39 = vsel %vm4684_vm13, %v3493_v8, %v965_v25  ;;  %v1162_v41 = vsel %vm4678_vm11, %v1157_v62, %v1161_v30  ;;  %v1085_v44 = vld [vmem:[#allocation2 + $0x30] sm:$0xf]  ;;  %v1164_v51 = vshrl.u32 %v1083_v48, 16  ;;  %v1167_v53 = vshll.u32 %v1083_v48, 16  ;;  %v99_v56 = vld [vmem:[#allocation2 + $0x3c] sm:$0x1] }
  0x71   :  { %v693_v45 = vsel %vm4678_vm11, %v688_v18, %v692_v36  ;;  %1031 = vst [vmem:[#allocation3 + $0x98] sm:$0xf] %v966_v39  ;;  %3090 = vmatmul.bf16.gmra.mxu1 %v3580_v37  ;;  %v1178_v54 = vshrl.u32 %v1085_v44, 16  ;;  %v1181_v55 = vshll.u32 %v1085_v44, 16  ;;  %v100_v60 = vsel %vm4608_vm7, 0, %v99_v56  ;;  %v4246_v62 = vld [vmem:[%s5307_s3 + $0x1e8] sm:$0xff] }
  0x72   :  { %1350 = vst [vmem:[#allocation3 + $0x7c] sm:$0xf] %v1162_v41  ;;  %v1166_v58 = vrot.slane %v1164_v51, 4  ;;  %v1169_v59 = vrot.slane %v1167_v53, 5  ;;  %v3591_v61 = vld [vmem:[#allocation3 + $0x58] sm:$0xf]  ;;  %v4795_v0 = vpack.c.b16 %v274_v12, %v274_v12  ;;  %3373 = vmatpush.bf16.msra.mxu3 %v4246_v62 }
  0x73   :  { %868 = vst [vmem:[#allocation3 + $0x94] sm:$0xf] %v693_v45  ;;  %v4230_v63 = vld [vmem:[%s5307_s3 + $0x168] sm:$0xff]  ;;  %v1180_v2 = vrot.slane %v1178_v54, 4  ;;  %v1183_v28 = vrot.slane %v1181_v55, 5  ;;  %v354_v20 = vrot.slane %v4571_v21, 4 }
  0x74   :  { %1064 = vst [vmem:[#allocation3 + $0xc0] sm:$0xf] %v1048_v40  ;;  %v1170_v6 = vor.u32 %v1169_v59, %v1166_v58  ;;  %v4254_v8 = vld [vmem:[%s5307_s3 + $0x228] sm:$0xff]  ;;  %3275 = vmatpush.bf16.msra.mxu1 %v4230_v63  ;;  %v4132_v16 = vld [vmem:[#allocation3 + $0x9c] sm:$0xf]  ;;  %v356_v25 = vshrl.u32 %v4795_v0, 16 }
  0x75   :  { %98 = vst [vmem:[#allocation2 + $0x34] sm:$0x1] %v97_v46  ;;  %3422 = vmatpush.bf16.msra.mxu0 %v4254_v8  ;;  %v601_v24 = vld [vmem:[#allocation2 + $0x30] sm:$0xf]  ;;  %v603_v37 = vld [vmem:[#allocation2 + $0x38] sm:$0xf]  ;;  %v1184_v39 = vor.u32 %v1183_v28, %v1180_v2 }
  0x76   :  { %101 = vst [vmem:[#allocation2 + $0x3c] sm:$0x1] %v100_v60  ;;  %v600_v9 = vld [vmem:[#allocation2 + $0x2c] sm:$0x1]  ;;  %v1171_v18 = vrot.slane %v1170_v6, 4  ;;  %v709_v40 = vshrl.u32 %v601_v24, 16 }
  0x77   :  { %v891_v10 = vld [vmem:[#allocation2 + $0x2c] sm:$0x1]  ;;  %v704_v14 = vshll.u32 %v600_v9, 16  ;;  %v712_v7 = vshll.u32 %v601_v24, 16  ;;  %v723_v46 = vshrl.u32 %v603_v37, 16  ;;  %v4237_v48 = vld [vmem:[%s5307_s3 + $0x1a0] sm:$0xff] }
  0x78   :  { %v1084_v4 = vld [vmem:[#allocation2 + $0x2c] sm:$0x1]  ;;  %v969_v15 = vrot.slane %v891_v10, 5  ;;  %v711_v51 = vrot.slane %v709_v40, 4  ;;  %v3619_v12 = vld [vmem:[#allocation3 + $0x98] sm:$0xf]  ;;  %3325 = vmatpush.bf16.msra.mxu2 %v4237_v48 }
  0x79   :  { %v1173_v19 = vshll.u32 %v1084_v4, 16  ;;  %v4128_v23 = vld [vmem:[#allocation3 + $0x78] sm:$0xf0]  ;;  %v706_v30 = vrot.slane %v704_v14, 5  ;;  %v714_v53 = vrot.slane %v712_v7, 5  ;;  %v725_v55 = vrot.slane %v723_v46, 4 }
  0x7a   :  { %v3592_v34 = vor.u32 %v4128_v23, %v3591_v61  ;;  %v970_v35 = vsel %vm4684_vm13, %v3494_v5, %v969_v15  ;;  %v726_v56 = vshll.u32 %v603_v37, 16  ;;  %v1185_v58 = vrot.slane %v1184_v39, 4  ;;  %v52_v59 = vld [vmem:[#allocation2 + $0x40] sm:$0x1]  ;;  %v4131_v60 = vld [vmem:[#allocation3 + $0x94] sm:$0xf] }
  0x7b   :  { %v1175_v36 = vrot.slane %v1173_v19, 5  ;;  %1032 = vst [vmem:[#allocation3 + $0xbc] sm:$0xf] %v970_v35  ;;  %v3621_v38 = vld [vmem:[#allocation3 + $0xbc] sm:$0xf0]  ;;  %v707_v41 = vsel %vm4678_vm11, %v702_v57, %v706_v30  ;;  %v4817_v11 = vrot.slane %v356_v25, 7 }
  0x7c   :  { %v3624_v21 = vor.u32 %v4132_v16, %v3621_v38  ;;  %v494_v45 = vld [vmem:[#allocation2 + $0x34] sm:$0x1]  ;;  %3237 = vmatmul.bf16.gmra.mxu0 %v3592_v34  ;;  %869 = vst [vmem:[#allocation3 + $0xb8] sm:$0xf] %v707_v41  ;;  %v892_v57 = vld [vmem:[#allocation2 + $0x30] sm:$0xe] }
  0x7d   :  { %v1176_v1 = vsel %vm4678_vm11, %v1171_v18, %v1175_v36  ;;  %v495_v50 = vsel %vm4319_vm2, %v346_v22, %v494_v45  ;;  %v500_v44 = vld [vmem:[#allocation2 + $0x3c] sm:$0x1]  ;;  %v715_v22 = vor.u32 %v714_v53, %v711_v51  ;;  %v728_v61 = vrot.slane %v726_v56, 5  ;;  %v894_v62 = vld [vmem:[#allocation2 + $0x38] sm:$0xe]  ;;  %v4245_v46 = vld [vmem:[%s5307_s3 + $0x1e0] sm:$0xff] }
  0x7e   :  { %3193 = vmatmul.bf16.gmra.mxu3 %v3624_v21  ;;  %496 = vst [vmem:[#allocation2 + $0x34] sm:$0x1] %v495_v50  ;;  %v501_v54 = vsel %vm4319_vm2, %v354_v20, %v500_v44  ;;  %v53_v63 = vsel %vm4319_vm2, 0, %v52_v59  ;;  %v3495_v5 = vrot.slane %v892_v57, 9  ;;  %v359_v6 = vshll.u32 %v4795_v0, 16  ;;  %v4229_v57 = vld [vmem:[%s5307_s3 + $0x160] sm:$0xff] }
  0x7f   :  { %1351 = vst [vmem:[#allocation3 + $0xa0] sm:$0xf] %v1176_v1  ;;  %v1049_v2 = vld [vmem:[#allocation2 + $0x38] sm:$0xf]  ;;  %v729_v8 = vor.u32 %v728_v61, %v725_v55  ;;  %v102_v9 = vld [vmem:[#allocation2 + $0x44] sm:$0x1]  ;;  %3374 = vmatpush.bf16.msra.mxu3 %v4245_v46  ;;  %3276 = vmatpush.bf16.msra.mxu1 %v4229_v57 }
  0x80   :  { %502 = vst [vmem:[#allocation2 + $0x3c] sm:$0x1] %v501_v54  ;;  %v3496_v4 = vrot.slane %v894_v62, 9  ;;  %v362_v14 = vrot.slane %v4817_v11, 4  ;;  %v103_v15 = vsel %vm4608_vm7, 0, %v102_v9  ;;  %v716_v19 = vrot.slane %v715_v22, 4 }
  0x81   :  { %54 = vst [vmem:[#allocation2 + $0x40] sm:$0x1] %v53_v63  ;;  %v1087_v16 = vld [vmem:[#allocation2 + $0x38] sm:$0xf]  ;;  %v361_v34 = vor.u32 %v359_v6, %v4817_v11  ;;  %v730_v36 = vrot.slane %v729_v8, 4  ;;  %v4253_v59 = vld [vmem:[%s5307_s3 + $0x220] sm:$0xff] }
  0x82   :  { %v4136_v28 = vld [vmem:[#allocation3 + $0xb8] sm:$0xf0]  ;;  %1065 = vst [vmem:[#allocation3 + $0xe4] sm:$0xf] %v1049_v2  ;;  %v1192_v20 = vshrl.u32 %v1087_v16, 16  ;;  %v1195_v53 = vshll.u32 %v1087_v16, 16  ;;  %3423 = vmatpush.bf16.msra.mxu0 %v4253_v59 }
  0x83   :  { %v3620_v10 = vor.u32 %v4136_v28, %v3619_v12  ;;  %v3613_v18 = vld [vmem:[#allocation3 + $0xb4] sm:$0xf0]  ;;  %104 = vst [vmem:[#allocation2 + $0x44] sm:$0x1] %v103_v15  ;;  %v105_v48 = vld [vmem:[#allocation2 + $0x5c] sm:$0x1] }
  0x84   :  { %v3616_v23 = vor.u32 %v4131_v60, %v3613_v18  ;;  %v1194_v51 = vrot.slane %v1192_v20, 4  ;;  %v1197_v60 = vrot.slane %v1195_v53, 5  ;;  %v605_v62 = vld [vmem:[#allocation2 + $0x50] sm:$0xf]  ;;  %v106_v6 = vsel %vm4608_vm7, 0, %v105_v48 }
  0x85   :  { %3144 = vmatmul.bf16.gmra.mxu2 %v3620_v10  ;;  %v1086_v0 = vld [vmem:[#allocation2 + $0x34] sm:$0x1]  ;;  %v737_v8 = vshrl.u32 %v605_v62, 16  ;;  %v740_v9 = vshll.u32 %v605_v62, 16  ;;  %v607_v15 = vld [vmem:[#allocation2 + $0x58] sm:$0xf] }
  0x86   :  { %v602_v24 = vld [vmem:[#allocation2 + $0x34] sm:$0x1]  ;;  %v1187_v30 = vshll.u32 %v1086_v0, 16  ;;  %3095 = vmatmul.bf16.gmra.mxu1 %v3616_v23  ;;  %v1198_v63 = vor.u32 %v1197_v60, %v1194_v51  ;;  %v3627_v28 = vld [vmem:[#allocation3 + $0xa0] sm:$0xf] }
  0x87   :  { %v893_v25 = vld [vmem:[#allocation2 + $0x34] sm:$0x1]  ;;  %v718_v35 = vshll.u32 %v602_v24, 16  ;;  %v604_v38 = vld [vmem:[#allocation2 + $0x3c] sm:$0x1]  ;;  %v742_v16 = vrot.slane %v740_v9, 5 }
  0x88   :  { %v973_v37 = vrot.slane %v893_v25, 5  ;;  %v895_v39 = vld [vmem:[#allocation2 + $0x3c] sm:$0x1]  ;;  %v1189_v7 = vrot.slane %v1187_v30, 5  ;;  %v732_v21 = vshll.u32 %v604_v38, 16 }
  0x89   :  { %v1088_v40 = vld [vmem:[#allocation2 + $0x3c] sm:$0x1]  ;;  %v720_v41 = vrot.slane %v718_v35, 5  ;;  %v503_v1 = vld [vmem:[#allocation2 + $0x40] sm:$0xf]  ;;  %v977_v50 = vrot.slane %v895_v39, 5 }
  0x8a   :  { %v974_v45 = vsel %vm4684_vm13, %v3495_v5, %v973_v37  ;;  %v504_v44 = vsel %vm4432_vm6, %v361_v34, %v503_v1  ;;  %v1190_v12 = vsel %vm4678_vm11, %v1185_v58, %v1189_v7  ;;  %v734_v55 = vrot.slane %v732_v21, 5  ;;  %v506_v58 = vld [vmem:[#allocation2 + $0x44] sm:$0x1]  ;;  %v606_v2 = vld [vmem:[#allocation2 + $0x54] sm:$0x1] }
  0x8b   :  { %1033 = vst [vmem:[#allocation3 + $0xe0] sm:$0xf] %v974_v45  ;;  %v721_v54 = vsel %vm4678_vm11, %v716_v19, %v720_v41  ;;  %v1201_v56 = vshll.u32 %v1088_v40, 16  ;;  %v978_v11 = vsel %vm4684_vm13, %v3496_v4, %v977_v50  ;;  %v507_v61 = vsel %vm4319_vm2, %v362_v14, %v506_v58  ;;  %v896_v18 = vld [vmem:[#allocation2 + $0x50] sm:$0xe]  ;;  %v4236_v45 = vld [vmem:[%s5307_s3 + $0x198] sm:$0xff] }
  0x8c   :  { %505 = vst [vmem:[#allocation2 + $0x40] sm:$0xf] %v504_v44  ;;  %v735_v22 = vsel %vm4678_vm11, %v730_v36, %v734_v55  ;;  %v746_v10 = vshll.u32 %v606_v2, 16  ;;  %v1199_v4 = vrot.slane %v1198_v63, 4  ;;  %v739_v14 = vrot.slane %v737_v8, 4  ;;  %3326 = vmatpush.bf16.msra.mxu2 %v4236_v45 }
  0x8d   :  { %1352 = vst [vmem:[#allocation3 + $0xc4] sm:$0xf] %v1190_v12  ;;  %v1203_v5 = vrot.slane %v1201_v56, 5  ;;  %v370_v19 = vrot.slane %v4436_v32, 4  ;;  %v751_v39 = vshrl.u32 %v607_v15, 16  ;;  %v3497_v40 = vrot.slane %v896_v18, 9 }
  0x8e   :  { %870 = vst [vmem:[#allocation3 + $0xdc] sm:$0xf] %v721_v54  ;;  %v748_v25 = vrot.slane %v746_v10, 5  ;;  %v743_v36 = vor.u32 %v742_v16, %v739_v14  ;;  %v4141_v48 = vld [vmem:[#allocation3 + $0xe4] sm:$0xf]  ;;  %v754_v50 = vshll.u32 %v607_v15, 16 }
  0x8f   :  { %871 = vst [vmem:[#allocation3 + $0x100] sm:$0xf] %v735_v22  ;;  %v1204_v24 = vsel %vm4678_vm11, %v1199_v4, %v1203_v5  ;;  %v897_v44 = vld [vmem:[#allocation2 + $0x54] sm:$0x1]  ;;  %v1051_v56 = vld [vmem:[#allocation2 + $0x58] sm:$0xf] }
  0x90   :  { %1034 = vst [vmem:[#allocation3 + $0x104] sm:$0xf] %v978_v11  ;;  %v744_v21 = vrot.slane %v743_v36, 4  ;;  %v981_v55 = vrot.slane %v897_v44, 5  ;;  %v753_v60 = vrot.slane %v751_v39, 4  ;;  %v756_v5 = vrot.slane %v754_v50, 5 }
  0x91   :  { %508 = vst [vmem:[#allocation2 + $0x44] sm:$0x1] %v507_v61  ;;  %v1052_v61 = vld [vmem:[#allocation2 + $0x60] sm:$0xf]  ;;  %v898_v2 = vld [vmem:[#allocation2 + $0x58] sm:$0xe] }
  0x92   :  { %107 = vst [vmem:[#allocation2 + $0x5c] sm:$0x1] %v106_v6  ;;  %v3655_v20 = vld [vmem:[#allocation3 + $0xe0] sm:$0xf]  ;;  %v749_v54 = vsel %vm4678_vm11, %v744_v21, %v748_v25  ;;  %v982_v22 = vsel %vm4684_vm13, %v3497_v40, %v981_v55  ;;  %v1091_v10 = vld [vmem:[#allocation2 + $0x58] sm:$0xf]  ;;  %v757_v16 = vor.u32 %v756_v5, %v753_v60 }
  0x93   :  { %v1050_v23 = vld [vmem:[#allocation2 + $0x40] sm:$0xf]  ;;  %1353 = vst [vmem:[#allocation3 + $0xe8] sm:$0xf] %v1204_v24  ;;  %v1220_v15 = vshrl.u32 %v1091_v10, 16  ;;  %v1223_v14 = vshll.u32 %v1091_v10, 16 }
  0x94   :  { %v1089_v0 = vld [vmem:[#allocation2 + $0x40] sm:$0xf]  ;;  %v4137_v34 = vld [vmem:[#allocation3 + $0xc0] sm:$0xf0]  ;;  %1066 = vst [vmem:[#allocation3 + $0x108] sm:$0xf] %v1050_v23 }
  0x95   :  { %v1206_v30 = vshrl.u32 %v1089_v0, 16  ;;  %v1209_v35 = vshll.u32 %v1089_v0, 16  ;;  %v3628_v37 = vor.u32 %v4137_v34, %v3627_v28  ;;  %v4140_v38 = vld [vmem:[#allocation3 + $0xdc] sm:$0xf]  ;;  %872 = vst [vmem:[#allocation3 + $0x124] sm:$0xf] %v749_v54 }
  0x96   :  { %v3649_v7 = vld [vmem:[#allocation3 + $0xfc] sm:$0xf0]  ;;  %1067 = vst [vmem:[#allocation3 + $0x12c] sm:$0xf] %v1051_v56  ;;  %v108_v28 = vld [vmem:[#allocation2 + $0x64] sm:$0x1] }
  0x97   :  { %v1208_v41 = vrot.slane %v1206_v30, 4  ;;  %v1211_v32 = vrot.slane %v1209_v35, 5  ;;  %3242 = vmatmul.bf16.gmra.mxu0 %v3628_v37  ;;  %v3652_v1 = vor.u32 %v4140_v38, %v3649_v7  ;;  %v4145_v46 = vld [vmem:[#allocation3 + $0x100] sm:$0xf0]  ;;  %1035 = vst [vmem:[#allocation3 + $0x128] sm:$0xf] %v982_v22 }
  0x98   :  { %v3656_v51 = vor.u32 %v4145_v46, %v3655_v20  ;;  %v1090_v53 = vld [vmem:[#allocation2 + $0x44] sm:$0x1]  ;;  %1068 = vst [vmem:[#allocation3 + $0x150] sm:$0xf] %v1052_v61  ;;  %v109_v9 = vsel %vm4608_vm7, 0, %v108_v28  ;;  %v378_v23 = vrot.slane %v4575_v42, 4 }
  0x99   :  { %v1212_v12 = vor.u32 %v1211_v32, %v1208_v41  ;;  %3100 = vmatmul.bf16.gmra.mxu1 %v3652_v1  ;;  %v1215_v57 = vshll.u32 %v1090_v53, 16  ;;  %v512_v59 = vld [vmem:[#allocation2 + $0x5c] sm:$0x1]  ;;  %v1093_v4 = vld [vmem:[#allocation2 + $0x60] sm:$0xf]  ;;  %v1222_v0 = vrot.slane %v1220_v15, 4 }
  0x9a   :  { %3149 = vmatmul.bf16.gmra.mxu2 %v3656_v51  ;;  %v513_v58 = vsel %vm4319_vm2, %v370_v19, %v512_v59  ;;  %110 = vst [vmem:[#allocation2 + $0x64] sm:$0x1] %v109_v9  ;;  %v1234_v18 = vshrl.u32 %v1093_v4, 16  ;;  %v1237_v19 = vshll.u32 %v1093_v4, 16  ;;  %v111_v20 = vld [vmem:[#allocation2 + $0x6c] sm:$0x1] }
  0x9b   :  { %v1213_v11 = vrot.slane %v1212_v12, 4  ;;  %v3657_v62 = vld [vmem:[#allocation3 + $0x104] sm:$0xf0]  ;;  %v1217_v63 = vrot.slane %v1215_v57, 5  ;;  %514 = vst [vmem:[#allocation2 + $0x5c] sm:$0x1] %v513_v58 }
  0x9c   :  { %v3660_v6 = vor.u32 %v4141_v48, %v3657_v62  ;;  %v1225_v24 = vrot.slane %v1223_v14, 5  ;;  %v4244_v25 = vld [vmem:[%s5307_s3 + $0x1d8] sm:$0xff]  ;;  %v3498_v30 = vrot.slane %v898_v2, 9  ;;  %v1236_v35 = vrot.slane %v1234_v18, 4  ;;  %v3663_v41 = vld [vmem:[#allocation3 + $0xe8] sm:$0xf] }
  0x9d   :  { %v1218_v8 = vsel %vm4678_vm11, %v1213_v11, %v1217_v63  ;;  %v4228_v34 = vld [vmem:[%s5307_s3 + $0x158] sm:$0xff]  ;;  %v1239_v36 = vrot.slane %v1237_v19, 5  ;;  %v112_v42 = vsel %vm4608_vm7, 0, %v111_v20  ;;  %3375 = vmatpush.bf16.msra.mxu3 %v4244_v25  ;;  %v758_v32 = vrot.slane %v757_v16, 4  ;;  %v4235_v44 = vld [vmem:[%s5307_s3 + $0x190] sm:$0xff] }
  0x9e   :  { %3198 = vmatmul.bf16.gmra.mxu3 %v3660_v6  ;;  %1354 = vst [vmem:[#allocation3 + $0x10c] sm:$0xf] %v1218_v8  ;;  %v4252_v37 = vld [vmem:[%s5307_s3 + $0x218] sm:$0xff]  ;;  %v1226_v7 = vor.u32 %v1225_v24, %v1222_v0  ;;  %3277 = vmatpush.bf16.msra.mxu1 %v4228_v34  ;;  %v394_v46 = vrot.slane %v4438_v33, 4  ;;  %v402_v48 = vrot.slane %v4458_v49, 4  ;;  %v386_v11 = vrot.slane %v4577_v43, 4 }
  0x9f   :  { %3424 = vmatpush.bf16.msra.mxu0 %v4252_v37  ;;  %113 = vst [vmem:[#allocation2 + $0x6c] sm:$0x1] %v112_v42  ;;  %v4150_v54 = vld [vmem:[#allocation3 + $0x12c] sm:$0xf]  ;;  %v3693_v55 = vld [vmem:[#allocation3 + $0x14c] sm:$0xf0]  ;;  %v1240_v57 = vor.u32 %v1239_v36, %v1236_v35  ;;  %3327 = vmatpush.bf16.msra.mxu2 %v4235_v44 }
  0xa0   :  { %v1227_v50 = vrot.slane %v1226_v7, 4  ;;  %v609_v59 = vld [vmem:[#allocation2 + $0x60] sm:$0xf]  ;;  %v611_v5 = vld [vmem:[#allocation2 + $0x68] sm:$0xf]  ;;  %v410_v28 = vrot.slane %v4620_v26, 4  ;;  %v3696_v18 = vor.u32 %v4150_v54, %v3693_v55 }
  0xa1   :  { %v518_v60 = vld [vmem:[#allocation2 + $0x64] sm:$0x1]  ;;  %v765_v22 = vshrl.u32 %v609_v59, 16  ;;  %v768_v6 = vshll.u32 %v609_v59, 16  ;;  %v900_v2 = vld [vmem:[#allocation2 + $0x60] sm:$0xe] }
  0xa2   :  { %v608_v38 = vld [vmem:[#allocation2 + $0x5c] sm:$0x1]  ;;  %v519_v62 = vsel %vm4319_vm2, %v378_v23, %v518_v60  ;;  %v779_v8 = vshrl.u32 %v611_v5, 16  ;;  %v782_v9 = vshll.u32 %v611_v5, 16  ;;  %v418_v10 = vrot.slane %v4622_v29, 4  ;;  %v4243_v60 = vld [vmem:[%s5307_s3 + $0x1d0] sm:$0xff] }
  0xa3   :  { %v899_v39 = vld [vmem:[#allocation2 + $0x5c] sm:$0x1]  ;;  %v760_v21 = vshll.u32 %v608_v38, 16  ;;  %v767_v43 = vrot.slane %v765_v22, 4  ;;  %v3691_v4 = vld [vmem:[#allocation3 + $0x128] sm:$0xf]  ;;  %3376 = vmatpush.bf16.msra.mxu3 %v4243_v60 }
  0xa4   :  { %v1092_v40 = vld [vmem:[#allocation2 + $0x5c] sm:$0x1]  ;;  %v985_v45 = vrot.slane %v899_v39, 5  ;;  %520 = vst [vmem:[#allocation2 + $0x64] sm:$0x1] %v519_v62  ;;  %v4895_v15 = vrot.slane %v1240_v57, 4 }
  0xa5   :  { %v1229_v1 = vshll.u32 %v1092_v40, 16  ;;  %v4146_v51 = vld [vmem:[#allocation3 + $0x108] sm:$0xf0]  ;;  %v762_v53 = vrot.slane %v760_v21, 5  ;;  %v770_v14 = vrot.slane %v768_v6, 5  ;;  %v3499_v16 = vrot.slane %v900_v2, 9 }
  0xa6   :  { %v986_v12 = vsel %vm4684_vm13, %v3498_v30, %v985_v45  ;;  %v3664_v58 = vor.u32 %v4146_v51, %v3663_v41  ;;  %v781_v19 = vrot.slane %v779_v8, 4  ;;  %v784_v20 = vrot.slane %v782_v9, 5  ;;  %v4897_v23 = vld [vmem:[#allocation2 + $0x68] sm:$0xe]  ;;  %v4149_v0 = vld [vmem:[#allocation3 + $0x124] sm:$0xf] }
  0xa7   :  { %v1231_v56 = vrot.slane %v1229_v1, 5  ;;  %1036 = vst [vmem:[#allocation3 + $0x14c] sm:$0xf] %v986_v12  ;;  %v763_v61 = vsel %vm4678_vm11, %v758_v32, %v762_v53  ;;  %v524_v24 = vld [vmem:[#allocation2 + $0x6c] sm:$0x1]  ;;  %v771_v25 = vor.u32 %v770_v14, %v767_v43  ;;  %v3500_v38 = vrot.slane %v4897_v23, 9 }
  0xa8   :  { %3247 = vmatmul.bf16.gmra.mxu0 %v3664_v58  ;;  %873 = vst [vmem:[#allocation3 + $0x148] sm:$0xf] %v763_v61  ;;  %v1053_v34 = vld [vmem:[#allocation2 + $0x68] sm:$0xf]  ;;  %v1054_v30 = vld [vmem:[#allocation2 + $0x70] sm:$0xf]  ;;  %v525_v35 = vsel %vm4319_vm2, %v386_v11, %v524_v24  ;;  %v785_v41 = vor.u32 %v784_v20, %v781_v19 }
  0xa9   :  { %v1232_v63 = vsel %vm4678_vm11, %v1227_v50, %v1231_v56  ;;  %1069 = vst [vmem:[#allocation3 + $0x174] sm:$0xf] %v1053_v34  ;;  %v114_v36 = vld [vmem:[#allocation2 + $0x74] sm:$0x1]  ;;  %v1095_v37 = vld [vmem:[#allocation2 + $0x68] sm:$0xf] }
  0xaa   :  { %1355 = vst [vmem:[#allocation3 + $0x130] sm:$0xf] %v1232_v63  ;;  %v115_v39 = vsel %vm4608_vm7, 0, %v114_v36  ;;  %v772_v7 = vrot.slane %v771_v25, 4  ;;  %v1097_v32 = vld [vmem:[#allocation2 + $0x70] sm:$0xf] }
  0xab   :  { %526 = vst [vmem:[#allocation2 + $0x6c] sm:$0x1] %v525_v35  ;;  %v1248_v21 = vshrl.u32 %v1095_v37, 16  ;;  %v1251_v1 = vshll.u32 %v1095_v37, 16  ;;  %v1262_v50 = vshrl.u32 %v1097_v32, 16  ;;  %v786_v59 = vrot.slane %v785_v41, 4 }
  0xac   :  { %1070 = vst [vmem:[#allocation3 + $0x198] sm:$0xf] %v1054_v30  ;;  %v1094_v51 = vld [vmem:[#allocation2 + $0x64] sm:$0x1]  ;;  %v4227_v22 = vld [vmem:[%s5307_s3 + $0x150] sm:$0xff]  ;;  %v1265_v6 = vshll.u32 %v1097_v32, 16 }
  0xad   :  { %116 = vst [vmem:[#allocation2 + $0x74] sm:$0x1] %v115_v39  ;;  %v610_v53 = vld [vmem:[#allocation2 + $0x64] sm:$0x1]  ;;  %v1243_v54 = vshll.u32 %v1094_v51, 16  ;;  %v1250_v57 = vrot.slane %v1248_v21, 4  ;;  %3278 = vmatpush.bf16.msra.mxu1 %v4227_v22 }
  0xae   :  { %v4154_v42 = vld [vmem:[#allocation3 + $0x148] sm:$0xf0]  ;;  %3203 = vmatmul.bf16.gmra.mxu3 %v3696_v18  ;;  %v901_v12 = vld [vmem:[#allocation2 + $0x64] sm:$0x1]  ;;  %v774_v55 = vshll.u32 %v610_v53, 16  ;;  %v1253_v11 = vrot.slane %v1251_v1, 5 }
  0xaf   :  { %v3692_v40 = vor.u32 %v4154_v42, %v3691_v4  ;;  %v3685_v45 = vld [vmem:[#allocation3 + $0x144] sm:$0xf0]  ;;  %v989_v56 = vrot.slane %v901_v12, 5  ;;  %v1264_v58 = vrot.slane %v1262_v50, 4  ;;  %v4251_v61 = vld [vmem:[%s5307_s3 + $0x210] sm:$0xff]  ;;  %v1245_v62 = vrot.slane %v1243_v54, 5  ;;  %v4935_v12 = vpop.f32.mrf.mxu1 }
  0xb0   :  { %v3688_v44 = vor.u32 %v4149_v0, %v3685_v45  ;;  %v776_v63 = vrot.slane %v774_v55, 5  ;;  %v117_v2 = vld [vmem:[#allocation2 + $0x7c] sm:$0x1]  ;;  %v1254_v9 = vor.u32 %v1253_v11, %v1250_v57  ;;  %v4159_v20 = vld [vmem:[#allocation3 + $0x174] sm:$0xf]  ;;  %3425 = vmatpush.bf16.msra.mxu0 %v4251_v61  ;;  %v1267_v35 = vrot.slane %v1265_v6, 5 }
  0xb1   :  { %3154 = vmatmul.bf16.gmra.mxu2 %v3692_v40  ;;  %v990_v5 = vsel %vm4684_vm13, %v3499_v16, %v989_v56  ;;  %v1246_v4 = vsel %vm4678_vm11, %v4895_v15, %v1245_v62  ;;  %v613_v36 = vld [vmem:[#allocation2 + $0x70] sm:$0xf]  ;;  %v118_v42 = vsel %vm4608_vm7, 0, %v117_v2  ;;  %v615_v39 = vld [vmem:[#allocation2 + $0x78] sm:$0xf] }
  0xb2   :  { %3105 = vmatmul.bf16.gmra.mxu1 %v3688_v44  ;;  %v612_v43 = vld [vmem:[#allocation2 + $0x6c] sm:$0x1]  ;;  %1037 = vst [vmem:[#allocation3 + $0x170] sm:$0xf] %v990_v5  ;;  %v777_v14 = vsel %vm4678_vm11, %v772_v7, %v776_v63  ;;  %v1255_v24 = vrot.slane %v1254_v9, 4  ;;  %v1268_v7 = vor.u32 %v1267_v35, %v1264_v58  ;;  %v793_v41 = vshrl.u32 %v613_v36, 16 }
  0xb3   :  { %v903_v8 = vld [vmem:[#allocation2 + $0x6c] sm:$0x1]  ;;  %v788_v18 = vshll.u32 %v612_v43, 16  ;;  %v3729_v23 = vld [vmem:[#allocation3 + $0x194] sm:$0xf0]  ;;  %v807_v21 = vshrl.u32 %v615_v39, 16 }
  0xb4   :  { %v993_v19 = vrot.slane %v903_v8, 5  ;;  %v1096_v16 = vld [vmem:[#allocation2 + $0x6c] sm:$0x1]  ;;  %1356 = vst [vmem:[#allocation3 + $0x154] sm:$0xf] %v1246_v4  ;;  %v3732_v33 = vor.u32 %v4159_v20, %v3729_v23  ;;  %v144_v45 = vld [vmem:[%s5308_s0 + $0x78] sm:$0xff] }
  0xb5   :  { %v530_v0 = vld [vmem:[#allocation2 + $0x74] sm:$0x1]  ;;  %v1257_v25 = vshll.u32 %v1096_v16, 16  ;;  %v790_v34 = vrot.slane %v788_v18, 5  ;;  %874 = vst [vmem:[#allocation3 + $0x16c] sm:$0xf] %v777_v14  ;;  %v164_v63 = vmul.f32 %v4746_v13, %v144_v45 }
  0xb6   :  { %v994_v30 = vsel %vm4684_vm13, %v3500_v38, %v993_v19  ;;  %v531_v15 = vsel %vm4319_vm2, %v394_v46, %v530_v0  ;;  %v796_v38 = vshll.u32 %v613_v36, 16  ;;  %v3699_v32 = vld [vmem:[#allocation3 + $0x130] sm:$0xf]  ;;  %v795_v1 = vrot.slane %v793_v41, 4  ;;  %119 = vst [vmem:[#allocation2 + $0x7c] sm:$0x1] %v118_v42 }
  0xb7   :  { %1038 = vst [vmem:[#allocation3 + $0x194] sm:$0xf] %v994_v30  ;;  %v1259_v37 = vrot.slane %v1257_v25, 5  ;;  %v791_v40 = vsel %vm4678_vm11, %v786_v59, %v790_v34  ;;  %v810_v50 = vshll.u32 %v615_v39, 16  ;;  %v904_v44 = vld [vmem:[#allocation2 + $0x70] sm:$0xe]  ;;  %v184_v30 = vadd.f32 %v4764_v27, %v164_v63 }
  0xb8   :  { %532 = vst [vmem:[#allocation2 + $0x74] sm:$0x1] %v531_v15  ;;  %v1269_v53 = vrot.slane %v1268_v7, 4  ;;  %v798_v54 = vrot.slane %v796_v38, 5  ;;  %v4937_v56 = vrot.slane %v807_v21, 4  ;;  %v4234_v59 = vld [vmem:[%s5307_s3 + $0x188] sm:$0xff]  ;;  %v4948_v15 = vpop.f32.mrf.mxu0 }
  0xb9   :  { %875 = vst [vmem:[#allocation3 + $0x190] sm:$0xf] %v791_v40  ;;  %v1260_v46 = vsel %vm4678_vm11, %v1255_v24, %v1259_v37  ;;  %v3727_v51 = vld [vmem:[#allocation3 + $0x170] sm:$0xf]  ;;  %v1055_v57 = vld [vmem:[#allocation2 + $0x78] sm:$0xf]  ;;  %3328 = vmatpush.bf16.msra.mxu2 %v4234_v59 }
  0xba   :  { %1357 = vst [vmem:[#allocation3 + $0x178] sm:$0xf] %v1260_v46  ;;  %v799_v60 = vor.u32 %v798_v54, %v795_v1  ;;  %v1056_v22 = vld [vmem:[#allocation2 + $0x80] sm:$0xf]  ;;  %v120_v62 = vld [vmem:[#allocation2 + $0x84] sm:$0x1] }
  0xbb   :  { %v4155_v55 = vld [vmem:[#allocation3 + $0x150] sm:$0xf0]  ;;  %1071 = vst [vmem:[#allocation3 + $0x1bc] sm:$0xf] %v1055_v57  ;;  %v3501_v8 = vrot.slane %v904_v44, 9  ;;  %v812_v20 = vrot.slane %v810_v50, 5  ;;  %v4971_v50 = vpop.f32.mrf.mxu1 }
  0xbc   :  { %v3700_v11 = vor.u32 %v4155_v55, %v3699_v32  ;;  %v4158_v58 = vld [vmem:[#allocation3 + $0x16c] sm:$0xf]  ;;  %1072 = vst [vmem:[#allocation3 + $0x1e0] sm:$0xf] %v1056_v22  ;;  %v800_v43 = vrot.slane %v799_v60, 4  ;;  %v121_v0 = vsel %vm4608_vm7, 0, %v120_v62  ;;  %v4966_v32 = vpop.f32.mrf.mxu2 }
  0xbd   :  { %v4943_v23 = vld [vmem:[#allocation2 + $0x78] sm:$0xe]  ;;  %v536_v25 = vld [vmem:[#allocation2 + $0x7c] sm:$0x1]  ;;  %122 = vst [vmem:[#allocation2 + $0x84] sm:$0x1] %v121_v0  ;;  %v813_v46 = vor.u32 %v812_v20, %v4937_v56 }
  0xbe   :  { %3208 = vmatmul.bf16.gmra.mxu3 %v3732_v33  ;;  %v4163_v61 = vld [vmem:[#allocation3 + $0x190] sm:$0xf0]  ;;  %3252 = vmatmul.bf16.gmra.mxu0 %v3700_v11  ;;  %v1099_v13 = vld [vmem:[#allocation2 + $0x78] sm:$0xf]  ;;  %v537_v35 = vsel %vm4319_vm2, %v402_v48, %v536_v25  ;;  %v1101_v37 = vld [vmem:[#allocation2 + $0x80] sm:$0xf]  ;;  %v4968_v33 = vpop.f32.mrf.mxu3 }
  0xbf   :  { %v3728_v5 = vor.u32 %v4163_v61, %v3727_v51  ;;  %v1098_v6 = vld [vmem:[#allocation2 + $0x74] sm:$0x1]  ;;  %v1276_v42 = vshrl.u32 %v1099_v13, 16  ;;  %v1279_v39 = vshll.u32 %v1099_v13, 16  ;;  %v4242_v40 = vld [vmem:[%s5307_s3 + $0x1c8] sm:$0xff]  ;;  %v1290_v41 = vshrl.u32 %v1101_v37, 16 }
  0xc0   :  { %v614_v2 = vld [vmem:[#allocation2 + $0x74] sm:$0x1]  ;;  %v3721_v9 = vld [vmem:[#allocation3 + $0x18c] sm:$0xf0]  ;;  %v1271_v4 = vshll.u32 %v1098_v6, 16  ;;  %v4226_v27 = vld [vmem:[%s5307_s3 + $0x148] sm:$0xff]  ;;  %3377 = vmatpush.bf16.msra.mxu3 %v4242_v40 }
  0xc1   :  { %v802_v14 = vshll.u32 %v614_v2, 16  ;;  %v905_v18 = vld [vmem:[#allocation2 + $0x74] sm:$0x1]  ;;  %v3724_v19 = vor.u32 %v4158_v58, %v3721_v9  ;;  %3159 = vmatmul.bf16.gmra.mxu2 %v3728_v5  ;;  %538 = vst [vmem:[#allocation2 + $0x7c] sm:$0x1] %v537_v35  ;;  %v1293_v38 = vshll.u32 %v1101_v37, 16  ;;  %3279 = vmatpush.bf16.msra.mxu1 %v4226_v27 }
  0xc2   :  { %v997_v16 = vrot.slane %v905_v18, 5  ;;  %v1273_v24 = vrot.slane %v1271_v4, 5  ;;  %v4168_v7 = vld [vmem:[#allocation3 + $0x1bc] sm:$0xf]  ;;  %v1278_v45 = vrot.slane %v1276_v42, 4  ;;  %v1281_v1 = vrot.slane %v1279_v39, 5 }
  0xc3   :  { %v804_v34 = vrot.slane %v802_v14, 5  ;;  %3110 = vmatmul.bf16.gmra.mxu1 %v3724_v19  ;;  %v3765_v21 = vld [vmem:[#allocation3 + $0x1dc] sm:$0xf0]  ;;  %v3502_v44 = vrot.slane %v4943_v23, 9  ;;  %v1292_v51 = vrot.slane %v1290_v41, 4  ;;  %v4250_v54 = vld [vmem:[%s5307_s3 + $0x208] sm:$0xff] }
  0xc4   :  { %v998_v36 = vsel %vm4684_vm13, %v3501_v8, %v997_v16  ;;  %v1274_v49 = vsel %vm4678_vm11, %v1269_v53, %v1273_v24  ;;  %v1295_v53 = vrot.slane %v1293_v38, 5  ;;  %v1282_v55 = vor.u32 %v1281_v1, %v1278_v45  ;;  %v123_v57 = vld [vmem:[#allocation2 + $0x8c] sm:$0x1]  ;;  %v617_v56 = vld [vmem:[#allocation2 + $0x80] sm:$0xf]  ;;  %3426 = vmatpush.bf16.msra.mxu0 %v4250_v54  ;;  %v4989_v42 = vpop.f32.mrf.mxu2 }
  0xc5   :  { %v805_v48 = vsel %vm4678_vm11, %v800_v43, %v804_v34  ;;  %1358 = vst [vmem:[#allocation3 + $0x19c] sm:$0xf] %v1274_v49  ;;  %v3735_v59 = vld [vmem:[#allocation3 + $0x178] sm:$0xf]  ;;  %v124_v11 = vsel %vm4608_vm7, 0, %v123_v57  ;;  %v821_v60 = vshrl.u32 %v617_v56, 16  ;;  %v3768_v63 = vor.u32 %v4168_v7, %v3765_v21  ;;  %v4985_v34 = vpop.f32.mrf.mxu0  ;;  %v4995_v49 = vpop.f32.mrf.mxu1 }
  0xc6   :  { %876 = vst [vmem:[#allocation3 + $0x1b4] sm:$0xf] %v805_v48  ;;  %v619_v58 = vld [vmem:[#allocation2 + $0x88] sm:$0xf]  ;;  %v824_v22 = vshll.u32 %v617_v56, 16  ;;  %v200_v61 = vmax.f32 %v184_v30, 0.0  ;;  %v1296_v6 = vor.u32 %v1295_v53, %v1292_v51  ;;  %v4991_v39 = vpop.f32.mrf.mxu3 }
  0xc7   :  { %1039 = vst [vmem:[#allocation3 + $0x1b8] sm:$0xf] %v998_v36  ;;  %v814_v62 = vrot.slane %v813_v46, 4  ;;  %v542_v5 = vld [vmem:[#allocation2 + $0x84] sm:$0x1]  ;;  %v835_v2 = vshrl.u32 %v619_v58, 16 }
  0xc8   :  { %125 = vst [vmem:[#allocation2 + $0x8c] sm:$0x1] %v124_v11  ;;  %v543_v43 = vsel %vm4319_vm2, %v410_v28, %v542_v5  ;;  %v1283_v8 = vrot.slane %v1282_v55, 4  ;;  %v823_v9 = vrot.slane %v821_v60, 4  ;;  %v826_v4 = vrot.slane %v824_v22, 5  ;;  %v4233_v1 = vld [vmem:[%s5307_s3 + $0x180] sm:$0xff]  ;;  %3427 = vmatpush.bf16.msra.mxu0 %v4249_v31 }
  0xc9   :  { %v4983_v14 = vld [vmem:[#allocation2 + $0x80] sm:$0xe]  ;;  %v616_v18 = vld [vmem:[#allocation2 + $0x7c] sm:$0x1]  ;;  %544 = vst [vmem:[#allocation2 + $0x84] sm:$0x1] %v543_v43  ;;  %v216_v24 = vpack.c.bf16 %v200_v61, %v200_v61  ;;  %3329 = vmatpush.bf16.msra.mxu2 %v4233_v1 }
  0xca   :  { %v907_v19 = vld [vmem:[#allocation2 + $0x7c] sm:$0x1]  ;;  %v816_v23 = vshll.u32 %v616_v18, 16  ;;  %v827_v13 = vor.u32 %v826_v4, %v823_v9  ;;  %v837_v28 = vrot.slane %v835_v2, 4  ;;  %v838_v30 = vshll.u32 %v619_v58, 16 }
  0xcb   :  { %v1001_v16 = vrot.slane %v907_v19, 5  ;;  %v1100_v0 = vld [vmem:[#allocation2 + $0x7c] sm:$0x1]  ;;  %v1297_v37 = vrot.slane %v1296_v6, 4  ;;  %v4993_v40 = vld [vmem:[#allocation2 + $0x88] sm:$0xe] }
  0xcc   :  { %v4164_v20 = vld [vmem:[#allocation3 + $0x198] sm:$0xf0]  ;;  %v1285_v26 = vshll.u32 %v1100_v0, 16  ;;  %v818_v35 = vrot.slane %v816_v23, 5  ;;  %v828_v48 = vrot.slane %v827_v13, 4  ;;  %v840_v7 = vrot.slane %v838_v30, 5 }
  0xcd   :  { %v3736_v25 = vor.u32 %v4164_v20, %v3735_v59  ;;  %v1002_v36 = vsel %vm4684_vm13, %v3502_v44, %v1001_v16  ;;  %v3503_v41 = vrot.slane %v4983_v14, 9  ;;  %v76_v21 = vld [vmem:[#allocation2 + $0x90] sm:$0x1]  ;;  %v250_v45 = vsel %vm217_vm3, %v216_v24, 0  ;;  %v1057_v55 = vld [vmem:[#allocation2 + $0x88] sm:$0xf]  ;;  %v5025_v24 = vpop.f32.mrf.mxu2 }
  0xce   :  { %3213 = vmatmul.bf16.gmra.mxu3 %v3768_v63  ;;  %1040 = vst [vmem:[#allocation3 + $0x1dc] sm:$0xf] %v1002_v36  ;;  %v1287_v27 = vrot.slane %v1285_v26, 5  ;;  %v819_v38 = vsel %vm4678_vm11, %v814_v62, %v818_v35  ;;  %v841_v53 = vor.u32 %v840_v7, %v837_v28  ;;  %v77_v54 = vsel %vm4319_vm2, 0, %v76_v21  ;;  %v3763_v57 = vld [vmem:[#allocation3 + $0x1b8] sm:$0xf]  ;;  %v5032_v35 = vpop.f32.mrf.mxu1 }
  0xcf   :  { %3257 = vmatmul.bf16.gmra.mxu0 %v3736_v25  ;;  %v548_v46 = vld [vmem:[#allocation2 + $0x8c] sm:$0x1]  ;;  %877 = vst [vmem:[#allocation3 + $0x1d8] sm:$0xf] %v819_v38  ;;  %v282_v11 = vunpack.c.l.b16 %v250_v45  ;;  %v3504_v29 = vrot.slane %v4993_v40, 9  ;;  %v5019_v19 = vpop.f32.mrf.mxu0  ;;  %v5027_v25 = vpop.f32.mrf.mxu3  ;;  %v4241_v30 = vld [vmem:[%s5307_s3 + $0x1c0] sm:$0xff] }
  0xd0   :  { %v1288_v44 = vsel %vm4678_vm11, %v1283_v8, %v1287_v27  ;;  %v549_v51 = vsel %vm4319_vm2, %v418_v10, %v548_v46  ;;  %v1102_v56 = vld [vmem:[#allocation2 + $0x84] sm:$0x1]  ;;  %v5012_v22 = vrot.slane %v841_v53, 4  ;;  %v4167_v61 = vld [vmem:[#allocation3 + $0x1b4] sm:$0xf]  ;;  %3378 = vmatpush.bf16.msra.mxu3 %v4241_v30 }
  0xd1   :  { %1359 = vst [vmem:[#allocation3 + $0x1c0] sm:$0xf] %v1288_v44  ;;  %v618_v59 = vld [vmem:[#allocation2 + $0x84] sm:$0x1]  ;;  %v1299_v58 = vshll.u32 %v1102_v56, 16  ;;  %v298_v62 = vpack.c.b16 %v282_v11, %v282_v11 }
  0xd2   :  { %550 = vst [vmem:[#allocation2 + $0x8c] sm:$0x1] %v549_v51  ;;  %v830_v60 = vshll.u32 %v618_v59, 16  ;;  %v909_v10 = vld [vmem:[#allocation2 + $0x84] sm:$0x1] }
  0xd3   :  { %78 = vst [vmem:[#allocation2 + $0x90] sm:$0x1] %v77_v54  ;;  %v126_v63 = vld [vmem:[#allocation2 + $0x94] sm:$0x1]  ;;  %v1301_v5 = vrot.slane %v1299_v58, 5  ;;  %v1005_v2 = vrot.slane %v909_v10, 5 }
  0xd4   :  { %v832_v6 = vrot.slane %v830_v60, 5  ;;  %1073 = vst [vmem:[#allocation3 + $0x204] sm:$0xf] %v1057_v55  ;;  %v127_v43 = vsel %vm4608_vm7, 0, %v126_v63  ;;  %v420_v9 = vshrl.u32 %v298_v62, 16  ;;  %v423_v4 = vshll.u32 %v298_v62, 16 }
  0xd5   :  { %v4172_v8 = vld [vmem:[#allocation3 + $0x1d8] sm:$0xf0]  ;;  %128 = vst [vmem:[#allocation2 + $0x94] sm:$0x1] %v127_v43  ;;  %v1302_v18 = vsel %vm4678_vm11, %v1297_v37, %v1301_v5  ;;  %v1006_v23 = vsel %vm4684_vm13, %v3503_v41, %v1005_v2  ;;  %v1103_v16 = vld [vmem:[#allocation2 + $0x88] sm:$0xf]  ;;  %v5052_v62 = vpop.f32.mrf.mxu2 }
  0xd6   :  { %v3764_v14 = vor.u32 %v4172_v8, %v3763_v57  ;;  %v833_v20 = vsel %vm4678_vm11, %v828_v48, %v832_v6  ;;  %v3757_v0 = vld [vmem:[#allocation3 + $0x1d4] sm:$0xf0]  ;;  %1360 = vst [vmem:[#allocation3 + $0x1e4] sm:$0xf] %v1302_v18  ;;  %v422_v17 = vrot.slane %v420_v9, 7  ;;  %v1304_v13 = vshrl.u32 %v1103_v16, 16 }
  0xd7   :  { %v3760_v26 = vor.u32 %v4167_v61, %v3757_v0  ;;  %878 = vst [vmem:[#allocation3 + $0x1fc] sm:$0xf] %v833_v20  ;;  %v1307_v28 = vshll.u32 %v1103_v16, 16  ;;  %v5034_v36 = vld [vmem:[#allocation2 + $0x10] sm:$0xf]  ;;  %v4225_v51 = vld [vmem:[%s5307_s3 + $0x140] sm:$0xff]  ;;  %v5054_v63 = vpop.f32.mrf.mxu3  ;;  %v5056_v6 = vpop.f32.mrf.mxu0 }
  0xd8   :  { %3164 = vmatmul.bf16.gmra.mxu2 %v3764_v14  ;;  %1041 = vst [vmem:[#allocation3 + $0x200] sm:$0xf] %v1006_v23  ;;  %v425_v27 = vor.u32 %v423_v4, %v422_v17  ;;  %v426_v41 = vrot.slane %v422_v17, 4  ;;  %v1306_v46 = vrot.slane %v1304_v13, 4  ;;  %v3771_v21 = vld [vmem:[#allocation3 + $0x1c0] sm:$0xf]  ;;  %3280 = vmatpush.bf16.msra.mxu1 %v4225_v51  ;;  %v3086_v2 = vpop.f32.mrf.mxu1 }
  0xd9   :  { %v620_v37 = vld [vmem:[#allocation2 + $0x8c] sm:$0x1]  ;;  %3115 = vmatmul.bf16.gmra.mxu1 %v3760_v26  ;;  %v1309_v44 = vrot.slane %v1307_v28, 5  ;;  %v1363_v11 = vld [vmem:[#allocation2 + $0x8] sm:$0xe]  ;;  %v1589_v58 = vshrl.u32 %v5034_v36, 16  ;;  %v3087_v4 = vadd.f32 %v3086_v2, %v4948_v15 }
  0xda   :  { %v911_v40 = vld [vmem:[#allocation2 + $0x8c] sm:$0x1]  ;;  %v844_v48 = vshll.u32 %v620_v37, 16  ;;  %v551_v38 = vld [vmem:[#allocation2 + $0x90] sm:$0xf]  ;;  %v3505_v5 = vrot.slane %v1363_v11, 9 }
  0xdb   :  { %v1009_v7 = vrot.slane %v911_v40, 5  ;;  %v552_v45 = vsel %vm4432_vm6, %v425_v27, %v551_v38  ;;  %v1104_v1 = vld [vmem:[#allocation2 + $0x8c] sm:$0x1]  ;;  %v1310_v59 = vor.u32 %v1309_v44, %v1306_v46  ;;  %v1365_v8 = vld [vmem:[#allocation2 + $0x10] sm:$0xe]  ;;  %v1591_v9 = vrot.slane %v1589_v58, 4 }
  0xdc   :  { %v846_v53 = vrot.slane %v844_v48, 5  ;;  %553 = vst [vmem:[#allocation2 + $0x90] sm:$0xf] %v552_v45  ;;  %v554_v55 = vld [vmem:[#allocation2 + $0x94] sm:$0x1]  ;;  %v1313_v57 = vshll.u32 %v1104_v1, 16 }
  0xdd   :  { %v1010_v54 = vsel %vm4684_vm13, %v3504_v29, %v1009_v7  ;;  %v555_v56 = vsel %vm4319_vm2, %v426_v41, %v554_v55  ;;  %v4173_v60 = vld [vmem:[#allocation3 + $0x1e0] sm:$0xf0]  ;;  %v1311_v3 = vrot.slane %v1310_v59, 4  ;;  %v1364_v43 = vld [vmem:[#allocation2 + $0xc] sm:$0x1]  ;;  %v3506_v20 = vrot.slane %v1365_v8, 9 }
  0xde   :  { %1042 = vst [vmem:[#allocation3 + $0x224] sm:$0xf] %v1010_v54  ;;  %v847_v29 = vsel %vm4678_vm11, %v5012_v22, %v846_v53  ;;  %v1315_v61 = vrot.slane %v1313_v57, 5  ;;  %v3772_v10 = vor.u32 %v4173_v60, %v3771_v21  ;;  %v1366_v14 = vld [vmem:[#allocation2 + $0x14] sm:$0x1]  ;;  %v1429_v18 = vrot.slane %v1364_v43, 5  ;;  %v3135_v57 = vpop.f32.mrf.mxu2 }
  0xdf   :  { %556 = vst [vmem:[#allocation2 + $0x94] sm:$0x1] %v555_v56  ;;  %v1524_v23 = vld [vmem:[#allocation2 + $0x10] sm:$0xf]  ;;  %v4176_v16 = vld [vmem:[#allocation3 + $0x1fc] sm:$0xf]  ;;  %v3184_v56 = vpop.f32.mrf.mxu3 }
  0xe0   :  { %879 = vst [vmem:[#allocation3 + $0x220] sm:$0xf] %v847_v29  ;;  %3262 = vmatmul.bf16.gmra.mxu0 %v3772_v10  ;;  %v1316_v22 = vsel %vm4678_vm11, %v1311_v3, %v1315_v61  ;;  %v3799_v0 = vld [vmem:[#allocation3 + $0x200] sm:$0xf]  ;;  %v1433_v17 = vrot.slane %v1366_v14, 5  ;;  %v1592_v26 = vshll.u32 %v5034_v36, 16  ;;  %v1430_v37 = vsel %vm4684_vm13, %v3505_v5, %v1429_v18  ;;  %v5066_v29 = vpop.f32.mrf.mxu1 }
  0xe1   :  { %1361 = vst [vmem:[#allocation3 + $0x208] sm:$0xf] %v1316_v22  ;;  %v1557_v13 = vld [vmem:[#allocation2 + $0x14] sm:$0x1]  ;;  %v1525_v40 = vld [vmem:[#allocation2 + $0x18] sm:$0xf]  ;;  %v3136_v14 = vadd.f32 %v3135_v57, %v3087_v4 }
  0xe2   :  { %1540 = vst [vmem:[#allocation3 + $0x18] sm:$0xf] %v1524_v23  ;;  %v1434_v7 = vsel %vm4684_vm13, %v3506_v20, %v1433_v17  ;;  %v1558_v46 = vld [vmem:[#allocation2 + $0x18] sm:$0xf]  ;;  %v1594_v44 = vrot.slane %v1592_v26, 5  ;;  %v1598_v54 = vshll.u32 %v1557_v13, 16 }
  0xe3   :  { %v1058_v28 = vld [vmem:[#allocation2 + $0x90] sm:$0xf]  ;;  %1507 = vst [vmem:[#allocation3 + $0x14] sm:$0xf] %v1430_v37  ;;  %v1559_v53 = vld [vmem:[#allocation2 + $0x1c] sm:$0x1] }
  0xe4   :  { %v1105_v30 = vld [vmem:[#allocation2 + $0x90] sm:$0xf]  ;;  %1074 = vst [vmem:[#allocation3 + $0x228] sm:$0xf] %v1058_v28  ;;  %v1603_v55 = vshrl.u32 %v1558_v46, 16  ;;  %v1595_v11 = vor.u32 %v1594_v44, %v1591_v9  ;;  %v1606_v58 = vshll.u32 %v1558_v46, 16 }
  0xe5   :  { %v4181_v27 = vld [vmem:[#allocation3 + $0x220] sm:$0xf0]  ;;  %v1318_v15 = vshrl.u32 %v1105_v30, 16  ;;  %v1321_v48 = vshll.u32 %v1105_v30, 16  ;;  %1508 = vst [vmem:[#allocation3 + $0x38] sm:$0xf] %v1434_v7 }
  0xe6   :  { %v3800_v41 = vor.u32 %v4181_v27, %v3799_v0  ;;  %v1106_v38 = vld [vmem:[#allocation2 + $0x94] sm:$0x1]  ;;  %1541 = vst [vmem:[#allocation3 + $0x3c] sm:$0xf] %v1525_v40  ;;  %v1844_v60 = vld [vmem:[#allocation2 + $0x10] sm:$0xe]  ;;  %v3185_v27 = vadd.f32 %v3184_v56, %v3136_v14 }
  0xe7   :  { %v3793_v21 = vld [vmem:[#allocation3 + $0x21c] sm:$0xf0]  ;;  %v1320_v36 = vrot.slane %v1318_v15, 4  ;;  %v1323_v45 = vrot.slane %v1321_v48, 5  ;;  %v1327_v1 = vshll.u32 %v1106_v38, 16  ;;  %v1600_v10 = vrot.slane %v1598_v54, 5  ;;  %v5076_v38 = vpop.f32.mrf.mxu2  ;;  %v5078_v46 = vpop.f32.mrf.mxu3 }
  0xe8   :  { %v3796_v51 = vor.u32 %v4176_v16, %v3793_v21  ;;  %3169 = vmatmul.bf16.gmra.mxu2 %v3800_v41  ;;  %v4177_v61 = vld [vmem:[#allocation3 + $0x204] sm:$0xf]  ;;  %v1605_v3 = vrot.slane %v1603_v55, 4  ;;  %v1612_v5 = vshll.u32 %v1559_v53, 16  ;;  %v1596_v8 = vrot.slane %v1595_v11, 4 }
  0xe9   :  { %v1324_v59 = vor.u32 %v1323_v45, %v1320_v36  ;;  %v1329_v31 = vrot.slane %v1327_v1, 5  ;;  %v3233_v43 = vpop.f32.mrf.mxu0  ;;  %v1608_v22 = vrot.slane %v1606_v58, 5  ;;  %v1845_v23 = vld [vmem:[#allocation2 + $0x14] sm:$0x1]  ;;  %v3521_v16 = vrot.slane %v1844_v60, 9 }
  0xea   :  { %3120 = vmatmul.bf16.gmra.mxu1 %v3796_v51  ;;  %v1614_v20 = vrot.slane %v1612_v5, 5  ;;  %v1601_v17 = vsel %vm4678_vm11, %v1596_v8, %v1600_v10  ;;  %v1846_v26 = vld [vmem:[#allocation2 + $0x18] sm:$0xe]  ;;  %v1847_v28 = vld [vmem:[#allocation2 + $0x1c] sm:$0x1]  ;;  %v1910_v30 = vrot.slane %v1845_v23, 5  ;;  %v5080_v45 = vadd.f32 %v3233_v43, %v3185_v27 }
  0xeb   :  { %v1325_v2 = vrot.slane %v1324_v59, 4  ;;  %v3801_v18 = vld [vmem:[#allocation3 + $0x224] sm:$0xf0]  ;;  %v1609_v13 = vor.u32 %v1608_v22, %v1605_v3  ;;  %v3522_v37 = vrot.slane %v1846_v26, 9  ;;  %v1914_v40 = vrot.slane %v1847_v28, 5 }
  0xec   :  { %v3804_v0 = vor.u32 %v4177_v61, %v3801_v18  ;;  %1828 = vst [vmem:[#allocation3 + $0x1c] sm:$0xf] %v1601_v17  ;;  %v3563_v15 = vld [vmem:[#allocation3 + $0x18] sm:$0xf]  ;;  %v1911_v7 = vsel %vm4684_vm13, %v3521_v16, %v1910_v30  ;;  %v1368_v36 = vld [vmem:[#allocation2 + $0x1c] sm:$0x1] }
  0xed   :  { %v1330_v9 = vsel %vm4678_vm11, %v1325_v2, %v1329_v31  ;;  %v1610_v4 = vrot.slane %v1609_v13, 4  ;;  %v4120_v48 = vld [vmem:[#allocation3 + $0x38] sm:$0xf0]  ;;  %v1915_v41 = vsel %vm4684_vm13, %v3522_v37, %v1914_v40  ;;  %v1367_v21 = vld [vmem:[#allocation2 + $0x18] sm:$0xe]  ;;  %v1437_v31 = vrot.slane %v1368_v36, 5 }
  0xee   :  { %1362 = vst [vmem:[#allocation3 + $0x22c] sm:$0xf] %v1330_v9  ;;  %3218 = vmatmul.bf16.gmra.mxu3 %v3804_v0  ;;  %v3807_v1 = vld [vmem:[#allocation3 + $0x208] sm:$0xf]  ;;  %v3091_v51 = vpop.f32.mrf.mxu1  ;;  %v1369_v53 = vld [vmem:[#allocation2 + $0x20] sm:$0xe]  ;;  %v3564_v43 = vor.u32 %v4120_v48, %v3563_v15 }
  0xef   :  { %v1615_v44 = vsel %vm4678_vm11, %v1610_v4, %v1614_v20  ;;  %1988 = vst [vmem:[#allocation3 + $0x20] sm:$0xf] %v1911_v7  ;;  %v1370_v54 = vld [vmem:[#allocation2 + $0x24] sm:$0x1]  ;;  %v4115_v55 = vld [vmem:[#allocation3 + $0x14] sm:$0xf]  ;;  %v3092_v56 = vadd.f32 %v3091_v51, %v5019_v19  ;;  %v3189_v30 = vpop.f32.mrf.mxu3 }
  0xf0   :  { %v3557_v57 = vld [vmem:[#allocation3 + $0x34] sm:$0xf0]  ;;  %1829 = vst [vmem:[#allocation3 + $0x40] sm:$0xf] %v1615_v44  ;;  %v3507_v59 = vrot.slane %v1367_v21, 9  ;;  %v3508_v11 = vrot.slane %v1369_v53, 9 }
  0xf1   :  { %1989 = vst [vmem:[#allocation3 + $0x44] sm:$0xf] %v1915_v41  ;;  %v5085_v58 = vpop.f32.mrf.mxu0  ;;  %v1441_v60 = vrot.slane %v1370_v54, 5  ;;  %v1526_v61 = vld [vmem:[#allocation2 + $0x20] sm:$0xf]  ;;  %v3560_v18 = vor.u32 %v4115_v55, %v3557_v57 }
  0xf2   :  { %v1438_v10 = vsel %vm4684_vm13, %v3507_v59, %v1437_v31  ;;  %v1527_v3 = vld [vmem:[#allocation2 + $0x28] sm:$0xf]  ;;  %1542 = vst [vmem:[#allocation3 + $0x60] sm:$0xf] %v1526_v61  ;;  %v1560_v5 = vld [vmem:[#allocation2 + $0x20] sm:$0xf]  ;;  %v3140_v28 = vpop.f32.mrf.mxu2 }
  0xf3   :  { %v1442_v8 = vsel %vm4684_vm13, %v3508_v11, %v1441_v60  ;;  %1509 = vst [vmem:[#allocation3 + $0x5c] sm:$0xf] %v1438_v10  ;;  %v1561_v19 = vld [vmem:[#allocation2 + $0x24] sm:$0x1]  ;;  %v1562_v14 = vld [vmem:[#allocation2 + $0x28] sm:$0xf]  ;;  %v3141_v15 = vadd.f32 %v3140_v28, %v3092_v56 }
  0xf4   :  { %1510 = vst [vmem:[#allocation3 + $0x80] sm:$0xf] %v1442_v8  ;;  %v1563_v20 = vld [vmem:[#allocation2 + $0x2c] sm:$0x1]  ;;  %v1617_v23 = vshrl.u32 %v1560_v5, 16  ;;  %v1620_v16 = vshll.u32 %v1560_v5, 16 }
  0xf5   :  { %v4182_v2 = vld [vmem:[#allocation3 + $0x228] sm:$0xf0]  ;;  %1543 = vst [vmem:[#allocation3 + $0x84] sm:$0xf] %v1527_v3  ;;  %v4116_v0 = vld [vmem:[#allocation3 + $0x1c] sm:$0xf]  ;;  %v3190_v59 = vadd.f32 %v3189_v30, %v3141_v15 }
  0xf6   :  { %v3808_v22 = vor.u32 %v4182_v2, %v3807_v1  ;;  %v1626_v9 = vshll.u32 %v1561_v19, 16  ;;  %v1631_v17 = vshrl.u32 %v1562_v14, 16  ;;  %v1634_v13 = vshll.u32 %v1562_v14, 16  ;;  %v1848_v4 = vld [vmem:[#allocation2 + $0x20] sm:$0xe]  ;;  %v5091_v51 = vpop.f32.mrf.mxu1 }
  0xf7   :  { %v1640_v26 = vshll.u32 %v1563_v20, 16  ;;  %v3565_v37 = vld [vmem:[#allocation3 + $0x3c] sm:$0xf0]  ;;  %v1619_v40 = vrot.slane %v1617_v23, 4  ;;  %v1622_v27 = vrot.slane %v1620_v16, 5  ;;  %v3523_v44 = vrot.slane %v1848_v4, 9 }
  0xf8   :  { %3267 = vmatmul.bf16.gmra.mxu0 %v3808_v22  ;;  %3330 = vmatmul.bf16.vlgmr.msra.gmra.mxu2 %v3564_v43  ;;  %v1633_v48 = vrot.slane %v1631_v17, 4  ;;  %v1636_v7 = vrot.slane %v1634_v13, 5  ;;  %v3568_v41 = vor.u32 %v4116_v0, %v3565_v37  ;;  %v1628_v36 = vrot.slane %v1626_v9, 5  ;;  %v1849_v1 = vld [vmem:[#allocation2 + $0x24] sm:$0x1] }
  0xf9   :  { %v1623_v21 = vor.u32 %v1622_v27, %v1619_v40  ;;  %v1642_v54 = vrot.slane %v1640_v26, 5  ;;  %v1850_v55 = vld [vmem:[#allocation2 + $0x28] sm:$0xe]  ;;  %v1851_v57 = vld [vmem:[#allocation2 + $0x2c] sm:$0x1]  ;;  %v3238_v31 = vpop.f32.mrf.mxu0  ;;  %v1918_v60 = vrot.slane %v1849_v1, 5  ;;  %v5105_v27 = vpop.f32.mrf.mxu3 }
  0xfa   :  { %3281 = vmatmul.bf16.vlgmr.msra.gmra.mxu1 %v3560_v18  ;;  %v1637_v53 = vor.u32 %v1636_v7, %v1633_v48  ;;  %v3524_v61 = vrot.slane %v1850_v55, 9  ;;  %v1922_v56 = vrot.slane %v1851_v57, 5  ;;  %v1371_v3 = vld [vmem:[#allocation2 + $0x28] sm:$0xe]  ;;  %v5093_v5 = vadd.f32 %v3238_v31, %v3190_v59  ;;  %v3571_v2 = vld [vmem:[#allocation3 + $0x20] sm:$0xf]  ;;  %v5103_v9 = vpop.f32.mrf.mxu2 }
  0xfb   :  { %v1624_v11 = vrot.slane %v1623_v21, 4  ;;  %v4121_v43 = vld [vmem:[#allocation3 + $0x40] sm:$0xf0]  ;;  %v3599_v8 = vld [vmem:[#allocation3 + $0x60] sm:$0xf]  ;;  %v1919_v14 = vsel %vm4684_vm13, %v3523_v44, %v1918_v60  ;;  %v3509_v17 = vrot.slane %v1371_v3, 9 }
  0xfc   :  { %v1638_v10 = vrot.slane %v1637_v53, 4  ;;  %v4129_v19 = vld [vmem:[#allocation3 + $0x80] sm:$0xf0]  ;;  %v1923_v18 = vsel %vm4684_vm13, %v3524_v61, %v1922_v56  ;;  %v1372_v20 = vld [vmem:[#allocation2 + $0x2c] sm:$0x1] }
  0xfd   :  { %v1629_v22 = vsel %vm4678_vm11, %v1624_v11, %v1628_v36  ;;  %v1373_v23 = vld [vmem:[#allocation2 + $0x30] sm:$0xe]  ;;  %v1374_v16 = vld [vmem:[#allocation2 + $0x34] sm:$0x1]  ;;  %v1445_v13 = vrot.slane %v1372_v20, 5  ;;  %v3572_v36 = vor.u32 %v4121_v43, %v3571_v2  ;;  %v3600_v1 = vor.u32 %v4129_v19, %v3599_v8 }
  0xfe   :  { %3379 = vmatmul.bf16.vlgmr.msra.gmra.mxu3 %v3568_v41  ;;  %v1643_v0 = vsel %vm4678_vm11, %v1638_v10, %v1642_v54  ;;  %1830 = vst [vmem:[#allocation3 + $0x64] sm:$0xf] %v1629_v22  ;;  %v3510_v26 = vrot.slane %v1373_v23, 9  ;;  %v1449_v28 = vrot.slane %v1374_v16, 5  ;;  %v1528_v30 = vld [vmem:[#allocation2 + $0x30] sm:$0xf] }
  0xff   :  { %1831 = vst [vmem:[#allocation3 + $0x88] sm:$0xf] %v1643_v0  ;;  %v4124_v37 = vld [vmem:[#allocation3 + $0x5c] sm:$0xf]  ;;  %v3593_v40 = vld [vmem:[#allocation3 + $0x7c] sm:$0xf0]  ;;  %v1446_v4 = vsel %vm4684_vm13, %v3509_v17, %v1445_v13 }
 0x100   :  { %1990 = vst [vmem:[#allocation3 + $0x68] sm:$0xf] %v1919_v14  ;;  %v1529_v15 = vld [vmem:[#allocation2 + $0x38] sm:$0xf]  ;;  %v1564_v48 = vld [vmem:[#allocation2 + $0x30] sm:$0xf]  ;;  %v1450_v7 = vsel %vm4684_vm13, %v3510_v26, %v1449_v28  ;;  %v3596_v10 = vor.u32 %v4124_v37, %v3593_v40 }
 0x101   :  { %1991 = vst [vmem:[#allocation3 + $0x8c] sm:$0xf] %v1923_v18  ;;  %v1565_v41 = vld [vmem:[#allocation2 + $0x34] sm:$0x1]  ;;  %v1566_v21 = vld [vmem:[#allocation2 + $0x38] sm:$0xf]  ;;  %v5111_v18 = vpop.f32.mrf.mxu0 }
 0x102   :  { %1511 = vst [vmem:[#allocation3 + $0xa4] sm:$0xf] %v1446_v4  ;;  %v1567_v44 = vld [vmem:[#allocation2 + $0x3c] sm:$0x1]  ;;  %v1645_v53 = vshrl.u32 %v1564_v48, 16  ;;  %v1648_v54 = vshll.u32 %v1564_v48, 16 }
 0x103   :  { %v3096_v55 = vpop.f32.mrf.mxu1  ;;  %1512 = vst [vmem:[#allocation3 + $0xc8] sm:$0xf] %v1450_v7  ;;  %v1654_v57 = vshll.u32 %v1565_v41, 16  ;;  %v1659_v59 = vshrl.u32 %v1566_v21, 16  ;;  %v1662_v31 = vshll.u32 %v1566_v21, 16  ;;  %v1668_v11 = vshll.u32 %v1567_v44, 16  ;;  %v3194_v21 = vpop.f32.mrf.mxu3 }
 0x104   :  { %1544 = vst [vmem:[#allocation3 + $0xa8] sm:$0xf] %v1528_v30  ;;  %v1647_v60 = vrot.slane %v1645_v53, 4  ;;  %v1650_v61 = vrot.slane %v1648_v54, 5  ;;  %v1852_v56 = vld [vmem:[#allocation2 + $0x30] sm:$0xe]  ;;  %v3097_v20 = vadd.f32 %v3096_v55, %v4935_v12 }
 0x105   :  { %v4125_v3 = vld [vmem:[#allocation3 + $0x64] sm:$0xf]  ;;  %1545 = vst [vmem:[#allocation3 + $0xcc] sm:$0xf] %v1529_v15  ;;  %v1661_v22 = vrot.slane %v1659_v59, 4  ;;  %v1656_v8 = vrot.slane %v1654_v57, 5 }
 0x106   :  { %v3601_v2 = vld [vmem:[#allocation3 + $0x84] sm:$0xf0]  ;;  %v1651_v43 = vor.u32 %v1650_v61, %v1647_v60  ;;  %v1664_v19 = vrot.slane %v1662_v31, 5  ;;  %v1853_v14 = vld [vmem:[#allocation2 + $0x34] sm:$0x1]  ;;  %v1670_v23 = vrot.slane %v1668_v11, 5 }
 0x107   :  { %v1854_v16 = vld [vmem:[#allocation2 + $0x38] sm:$0xe]  ;;  %v1855_v0 = vld [vmem:[#allocation2 + $0x3c] sm:$0x1]  ;;  %v3525_v28 = vrot.slane %v1852_v56, 9  ;;  %v1926_v30 = vrot.slane %v1853_v14, 5  ;;  %v3604_v37 = vor.u32 %v4125_v3, %v3601_v2 }
 0x108   :  { %3428 = vmatmul.bf16.vlgmr.msra.gmra.mxu0 %v3572_v36  ;;  %3335 = vmatmul.bf16.gmra.mxu2 %v3600_v1  ;;  %v3145_v17 = vpop.f32.mrf.mxu2  ;;  %v1652_v13 = vrot.slane %v1651_v43, 4  ;;  %v1665_v26 = vor.u32 %v1664_v19, %v1661_v22  ;;  %v3526_v40 = vrot.slane %v1854_v16, 9  ;;  %v1930_v4 = vrot.slane %v1855_v0, 5  ;;  %v1375_v48 = vld [vmem:[#allocation2 + $0x38] sm:$0xe] }
 0x109   :  { %v3146_v15 = vadd.f32 %v3145_v17, %v3097_v20  ;;  %v1927_v12 = vsel %vm4684_vm13, %v3525_v28, %v1926_v30  ;;  %v1376_v36 = vld [vmem:[#allocation2 + $0x3c] sm:$0x1]  ;;  %v1377_v54 = vld [vmem:[#allocation2 + $0x40] sm:$0xe]  ;;  %v3511_v55 = vrot.slane %v1375_v48, 9 }
 0x10a   :  { %3286 = vmatmul.bf16.gmra.mxu1 %v3596_v10  ;;  %v1657_v7 = vsel %vm4678_vm11, %v1652_v13, %v1656_v8  ;;  %v1666_v41 = vrot.slane %v1665_v26, 4  ;;  %v1931_v1 = vsel %vm4684_vm13, %v3526_v40, %v1930_v4  ;;  %1992 = vst [vmem:[#allocation3 + $0xb0] sm:$0xf] %v1927_v12  ;;  %v1378_v59 = vld [vmem:[#allocation2 + $0x44] sm:$0x1]  ;;  %v1453_v60 = vrot.slane %v1376_v36, 5 }
 0x10b   :  { %1832 = vst [vmem:[#allocation3 + $0xac] sm:$0xf] %v1657_v7  ;;  %v3195_v44 = vadd.f32 %v3194_v21, %v3146_v15  ;;  %v5120_v53 = vpop.f32.mrf.mxu1  ;;  %v3607_v31 = vld [vmem:[#allocation3 + $0x68] sm:$0xf]  ;;  %v4130_v11 = vld [vmem:[#allocation3 + $0x88] sm:$0xf0] }
 0x10c   :  { %v1671_v57 = vsel %vm4678_vm11, %v1666_v41, %v1670_v23  ;;  %v3512_v61 = vrot.slane %v1377_v54, 9  ;;  %v1457_v56 = vrot.slane %v1378_v59, 5  ;;  %v3635_v10 = vld [vmem:[#allocation3 + $0xa8] sm:$0xf]  ;;  %v4138_v3 = vld [vmem:[#allocation3 + $0xc8] sm:$0xf0]  ;;  %v1454_v43 = vsel %vm4684_vm13, %v3511_v55, %v1453_v60  ;;  %v5132_v54 = vpop.f32.mrf.mxu3 }
 0x10d   :  { %1833 = vst [vmem:[#allocation3 + $0xd0] sm:$0xf] %v1671_v57  ;;  %v1530_v22 = vld [vmem:[#allocation2 + $0x40] sm:$0xf]  ;;  %v1531_v2 = vld [vmem:[#allocation2 + $0x48] sm:$0xf]  ;;  %v3636_v7 = vor.u32 %v4138_v3, %v3635_v10 }
 0x10e   :  { %3384 = vmatmul.bf16.gmra.mxu3 %v3604_v37  ;;  %1993 = vst [vmem:[#allocation3 + $0xd4] sm:$0xf] %v1931_v1  ;;  %v1458_v8 = vsel %vm4684_vm13, %v3512_v61, %v1457_v56  ;;  %v1568_v19 = vld [vmem:[#allocation2 + $0x40] sm:$0xf]  ;;  %v1569_v14 = vld [vmem:[#allocation2 + $0x44] sm:$0x1]  ;;  %v3608_v37 = vor.u32 %v4130_v11, %v3607_v31 }
 0x10f   :  { %1546 = vst [vmem:[#allocation3 + $0xf0] sm:$0xf] %v1530_v22  ;;  %v4133_v20 = vld [vmem:[#allocation3 + $0xa4] sm:$0xf]  ;;  %v1570_v16 = vld [vmem:[#allocation2 + $0x48] sm:$0xf] }
 0x110   :  { %v5128_v23 = vpop.f32.mrf.mxu2  ;;  %1513 = vst [vmem:[#allocation3 + $0xec] sm:$0xf] %v1454_v43  ;;  %v1571_v0 = vld [vmem:[#allocation2 + $0x4c] sm:$0x1]  ;;  %v1673_v13 = vshrl.u32 %v1568_v19, 16  ;;  %v1676_v26 = vshll.u32 %v1568_v19, 16 }
 0x111   :  { %1514 = vst [vmem:[#allocation3 + $0x110] sm:$0xf] %v1458_v8  ;;  %v1682_v28 = vshll.u32 %v1569_v14, 16  ;;  %v1687_v30 = vshrl.u32 %v1570_v16, 16  ;;  %v3629_v40 = vld [vmem:[#allocation3 + $0xc4] sm:$0xf0] }
 0x112   :  { %1547 = vst [vmem:[#allocation3 + $0x114] sm:$0xf] %v1531_v2  ;;  %v1690_v4 = vshll.u32 %v1570_v16, 16  ;;  %v1696_v15 = vshll.u32 %v1571_v0, 16  ;;  %v1675_v12 = vrot.slane %v1673_v13, 4  ;;  %v1678_v21 = vrot.slane %v1676_v26, 5 }
 0x113   :  { %v1689_v36 = vrot.slane %v1687_v30, 4  ;;  %v4134_v1 = vld [vmem:[#allocation3 + $0xac] sm:$0xf]  ;;  %v1684_v57 = vrot.slane %v1682_v28, 5  ;;  %v1856_v60 = vld [vmem:[#allocation2 + $0x40] sm:$0xe]  ;;  %v3632_v31 = vor.u32 %v4133_v20, %v3629_v40 }
 0x114   :  { %v3243_v17 = vpop.f32.mrf.mxu0  ;;  %v1692_v59 = vrot.slane %v1690_v4, 5  ;;  %v3637_v11 = vld [vmem:[#allocation3 + $0xcc] sm:$0xf0]  ;;  %v1679_v61 = vor.u32 %v1678_v21, %v1675_v12  ;;  %v1857_v56 = vld [vmem:[#allocation2 + $0x44] sm:$0x1]  ;;  %v1698_v10 = vrot.slane %v1696_v15, 5 }
 0x115   :  { %v5130_v48 = vadd.f32 %v3243_v17, %v3195_v44  ;;  %v1858_v22 = vld [vmem:[#allocation2 + $0x48] sm:$0xe]  ;;  %v1859_v3 = vld [vmem:[#allocation2 + $0x4c] sm:$0x1]  ;;  %v3527_v2 = vrot.slane %v1856_v60, 9  ;;  %v1934_v43 = vrot.slane %v1857_v56, 5  ;;  %v3640_v20 = vor.u32 %v4134_v1, %v3637_v11 }
 0x116   :  { %v3101_v41 = vpop.f32.mrf.mxu1  ;;  %v1693_v44 = vor.u32 %v1692_v59, %v1689_v36  ;;  %v1680_v8 = vrot.slane %v1679_v61, 4  ;;  %v3528_v19 = vrot.slane %v1858_v22, 9  ;;  %v1938_v14 = vrot.slane %v1859_v3, 5  ;;  %v1379_v0 = vld [vmem:[#allocation2 + $0x58] sm:$0xe] }
 0x117   :  { %v3102_v55 = vadd.f32 %v3101_v41, %v4995_v49  ;;  %v1935_v49 = vsel %vm4684_vm13, %v3527_v2, %v1934_v43  ;;  %v1380_v28 = vld [vmem:[#allocation2 + $0x5c] sm:$0x1]  ;;  %v1381_v40 = vld [vmem:[#allocation2 + $0x60] sm:$0xe]  ;;  %v1382_v4 = vld [vmem:[#allocation2 + $0x64] sm:$0x1] }
 0x118   :  { %3433 = vmatmul.bf16.gmra.mxu0 %v3608_v37  ;;  %3340 = vmatmul.bf16.gmra.mxu2 %v3636_v7  ;;  %v1694_v16 = vrot.slane %v1693_v44, 4  ;;  %v1685_v13 = vsel %vm4678_vm11, %v1680_v8, %v1684_v57  ;;  %v1939_v26 = vsel %vm4684_vm13, %v3528_v19, %v1938_v14  ;;  %1994 = vst [vmem:[#allocation3 + $0xf8] sm:$0xf] %v1935_v49  ;;  %v3513_v7 = vrot.slane %v1379_v0, 9  ;;  %v1532_v36 = vld [vmem:[#allocation2 + $0x60] sm:$0xf] }
 0x119   :  { %1834 = vst [vmem:[#allocation3 + $0xf4] sm:$0xf] %v1685_v13  ;;  %v1461_v41 = vrot.slane %v1380_v28, 5  ;;  %v3514_v12 = vrot.slane %v1381_v40, 9  ;;  %v1465_v21 = vrot.slane %v1382_v4, 5 }
 0x11a   :  { %3291 = vmatmul.bf16.gmra.mxu1 %v3632_v31  ;;  %v1699_v30 = vsel %vm4678_vm11, %v1694_v16, %v1698_v10  ;;  %1995 = vst [vmem:[#allocation3 + $0x11c] sm:$0xf] %v1939_v26  ;;  %v3643_v1 = vld [vmem:[#allocation3 + $0xb0] sm:$0xf]  ;;  %v4139_v57 = vld [vmem:[#allocation3 + $0xd0] sm:$0xf0] }
 0x11b   :  { %1835 = vst [vmem:[#allocation3 + $0x118] sm:$0xf] %v1699_v30  ;;  %v1462_v59 = vsel %vm4684_vm13, %v3513_v7, %v1461_v41  ;;  %v1533_v60 = vld [vmem:[#allocation2 + $0x68] sm:$0xf]  ;;  %v1572_v31 = vld [vmem:[#allocation2 + $0x60] sm:$0xf]  ;;  %v3644_v26 = vor.u32 %v4139_v57, %v3643_v1 }
 0x11c   :  { %v5137_v17 = vpop.f32.mrf.mxu0  ;;  %1548 = vst [vmem:[#allocation3 + $0x138] sm:$0xf] %v1532_v36  ;;  %v3671_v11 = vld [vmem:[#allocation3 + $0xf0] sm:$0xf]  ;;  %v1573_v56 = vld [vmem:[#allocation2 + $0x64] sm:$0x1] }
 0x11d   :  { %v3150_v37 = vpop.f32.mrf.mxu2  ;;  %1515 = vst [vmem:[#allocation3 + $0x134] sm:$0xf] %v1462_v59  ;;  %v1574_v22 = vld [vmem:[#allocation2 + $0x68] sm:$0xf]  ;;  %v4142_v44 = vld [vmem:[#allocation3 + $0xec] sm:$0xf] }
 0x11e   :  { %v3151_v15 = vadd.f32 %v3150_v37, %v3102_v55  ;;  %3389 = vmatmul.bf16.gmra.mxu3 %v3640_v20  ;;  %v1466_v55 = vsel %vm4684_vm13, %v3514_v12, %v1465_v21  ;;  %v1575_v3 = vld [vmem:[#allocation2 + $0x6c] sm:$0x1]  ;;  %v1701_v2 = vshrl.u32 %v1572_v31, 16  ;;  %v1704_v43 = vshll.u32 %v1572_v31, 16  ;;  %v4147_v8 = vld [vmem:[#allocation3 + $0x110] sm:$0xf0]  ;;  %v5149_v28 = vpop.f32.mrf.mxu1 }
 0x11f   :  { %1516 = vst [vmem:[#allocation3 + $0x158] sm:$0xf] %v1466_v55  ;;  %v1710_v19 = vshll.u32 %v1573_v56, 16  ;;  %v1715_v14 = vshrl.u32 %v1574_v22, 16  ;;  %v3665_v16 = vld [vmem:[#allocation3 + $0x10c] sm:$0xf0]  ;;  %v3672_v4 = vor.u32 %v4147_v8, %v3671_v11 }
 0x120   :  { %1549 = vst [vmem:[#allocation3 + $0x15c] sm:$0xf] %v1533_v60  ;;  %v1703_v49 = vrot.slane %v1701_v2, 4  ;;  %v1706_v0 = vrot.slane %v1704_v43, 5  ;;  %v1718_v20 = vshll.u32 %v1574_v22, 16  ;;  %v1724_v13 = vshll.u32 %v1575_v3, 16 }
 0x121   :  { %v3199_v61 = vpop.f32.mrf.mxu3  ;;  %v1717_v30 = vrot.slane %v1715_v14, 4  ;;  %v1860_v37 = vld [vmem:[#allocation2 + $0x60] sm:$0xe]  ;;  %v1712_v41 = vrot.slane %v1710_v19, 5  ;;  %v1861_v21 = vld [vmem:[#allocation2 + $0x64] sm:$0x1]  ;;  %v3668_v36 = vor.u32 %v4142_v44, %v3665_v16 }
 0x122   :  { %v3200_v10 = vadd.f32 %v3199_v61, %v3151_v15  ;;  %v4143_v15 = vld [vmem:[#allocation3 + $0xf4] sm:$0xf]  ;;  %v1707_v7 = vor.u32 %v1706_v0, %v1703_v49  ;;  %v1720_v12 = vrot.slane %v1718_v20, 5  ;;  %v3673_v59 = vld [vmem:[#allocation3 + $0x114] sm:$0xf0]  ;;  %v3529_v31 = vrot.slane %v1860_v37, 9 }
 0x123   :  { %v1862_v60 = vld [vmem:[#allocation2 + $0x68] sm:$0xe]  ;;  %v1726_v1 = vrot.slane %v1724_v13, 5  ;;  %v1863_v57 = vld [vmem:[#allocation2 + $0x6c] sm:$0x1]  ;;  %v1942_v22 = vrot.slane %v1861_v21, 5  ;;  %v3676_v14 = vor.u32 %v4143_v15, %v3673_v59 }
 0x124   :  { %v1708_v55 = vrot.slane %v1707_v7, 4  ;;  %v1721_v56 = vor.u32 %v1720_v12, %v1717_v30  ;;  %v3530_v2 = vrot.slane %v1862_v60, 9  ;;  %v1946_v43 = vrot.slane %v1863_v57, 5  ;;  %v1383_v8 = vld [vmem:[#allocation2 + $0x68] sm:$0xe] }
 0x125   :  { %v3248_v40 = vpop.f32.mrf.mxu0  ;;  %v5153_v3 = vpop.f32.mrf.mxu2  ;;  %v1943_v16 = vsel %vm4684_vm13, %v3529_v31, %v1942_v22  ;;  %v1385_v0 = vld [vmem:[#allocation2 + $0x70] sm:$0xe]  ;;  %v1386_v20 = vld [vmem:[#allocation2 + $0x74] sm:$0x1]  ;;  %v1535_v7 = vld [vmem:[#allocation2 + $0x78] sm:$0xf] }
 0x126   :  { %v5151_v61 = vadd.f32 %v3248_v40, %v3200_v10  ;;  %5323 = vst [vmem:[#allocation5_spill] sm:$0xff] %v5153_v3  ;;  %v1713_v44 = vsel %vm4678_vm11, %v1708_v55, %v1712_v41  ;;  %v1722_v19 = vrot.slane %v1721_v56, 4  ;;  %v1384_v10 = vld [vmem:[#allocation2 + $0x6c] sm:$0x1]  ;;  %v1947_v49 = vsel %vm4684_vm13, %v3530_v2, %v1946_v43  ;;  %v1576_v41 = vld [vmem:[#allocation2 + $0x70] sm:$0xf] }
 0x127   :  { %1836 = vst [vmem:[#allocation3 + $0x13c] sm:$0xf] %v1713_v44  ;;  %v1469_v30 = vrot.slane %v1384_v10, 5  ;;  %v3516_v37 = vrot.slane %v1385_v0, 9  ;;  %v1473_v40 = vrot.slane %v1386_v20, 5  ;;  %v1729_v56 = vshrl.u32 %v1576_v41, 16 }
 0x128   :  { %5322 = vst [vmem:[#allocation4_spill] sm:$0xff] %v5151_v61  ;;  %3438 = vmatmul.bf16.gmra.mxu0 %v3644_v26  ;;  %3345 = vmatmul.bf16.gmra.mxu2 %v3672_v4  ;;  %v1727_v13 = vsel %vm4678_vm11, %v1722_v19, %v1726_v1  ;;  %v3515_v26 = vrot.slane %v1383_v8, 9  ;;  %v1534_v4 = vld [vmem:[#allocation2 + $0x70] sm:$0xf]  ;;  %v1578_v59 = vld [vmem:[#allocation2 + $0x78] sm:$0xf] }
 0x129   :  { %v5155_v11 = vpop.f32.mrf.mxu3  ;;  %1996 = vst [vmem:[#allocation3 + $0x140] sm:$0xf] %v1943_v16  ;;  %v1474_v21 = vsel %vm4684_vm13, %v3516_v37, %v1473_v40  ;;  %v3679_v60 = vld [vmem:[#allocation3 + $0xf8] sm:$0xf]  ;;  %v4148_v31 = vld [vmem:[#allocation3 + $0x118] sm:$0xf0] }
 0x12a   :  { %5324 = vst [vmem:[#allocation6_spill] sm:$0xff] %v5155_v11  ;;  %3296 = vmatmul.bf16.gmra.mxu1 %v3668_v36  ;;  %v1470_v15 = vsel %vm4684_vm13, %v3515_v26, %v1469_v30  ;;  %v1577_v36 = vld [vmem:[#allocation2 + $0x74] sm:$0x1]  ;;  %v1579_v55 = vld [vmem:[#allocation2 + $0x7c] sm:$0x1]  ;;  %v1732_v1 = vshll.u32 %v1576_v41, 16 }
 0x12b   :  { %1837 = vst [vmem:[#allocation3 + $0x160] sm:$0xf] %v1727_v13  ;;  %v1738_v22 = vshll.u32 %v1577_v36, 16  ;;  %v1743_v2 = vshrl.u32 %v1578_v59, 16  ;;  %v1746_v43 = vshll.u32 %v1578_v59, 16  ;;  %v1752_v8 = vshll.u32 %v1579_v55, 16 }
 0x12c   :  { %1997 = vst [vmem:[#allocation3 + $0x164] sm:$0xf] %v1947_v49  ;;  %v3707_v19 = vld [vmem:[#allocation3 + $0x138] sm:$0xf]  ;;  %v1731_v10 = vrot.slane %v1729_v56, 4  ;;  %v1734_v16 = vrot.slane %v1732_v1, 5 }
 0x12d   :  { %1517 = vst [vmem:[#allocation3 + $0x17c] sm:$0xf] %v1470_v15  ;;  %v5170_v49 = vpop.f32.mrf.mxu0  ;;  %v3701_v0 = vld [vmem:[#allocation3 + $0x154] sm:$0xf0]  ;;  %v4156_v20 = vld [vmem:[#allocation3 + $0x158] sm:$0xf0] }
 0x12e   :  { %3394 = vmatmul.bf16.gmra.mxu3 %v3676_v14  ;;  %1518 = vst [vmem:[#allocation3 + $0x1a0] sm:$0xf] %v1474_v21  ;;  %v4151_v14 = vld [vmem:[#allocation3 + $0x134] sm:$0xf]  ;;  %v1745_v26 = vrot.slane %v1743_v2, 4  ;;  %v1748_v30 = vrot.slane %v1746_v43, 5  ;;  %v1735_v40 = vor.u32 %v1734_v16, %v1731_v10  ;;  %v3680_v21 = vor.u32 %v4148_v31, %v3679_v60 }
 0x12f   :  { %v3106_v12 = vpop.f32.mrf.mxu1  ;;  %1550 = vst [vmem:[#allocation3 + $0x180] sm:$0xf] %v1534_v4  ;;  %v1740_v4 = vrot.slane %v1738_v22, 5  ;;  %v1864_v15 = vld [vmem:[#allocation2 + $0x70] sm:$0xe]  ;;  %v3708_v59 = vor.u32 %v4156_v20, %v3707_v19  ;;  %v3704_v43 = vor.u32 %v4151_v14, %v3701_v0 }
 0x130   :  { %v3107_v44 = vadd.f32 %v3106_v12, %v4966_v32  ;;  %1551 = vst [vmem:[#allocation3 + $0x1a4] sm:$0xf] %v1535_v7  ;;  %v1865_v41 = vld [vmem:[#allocation2 + $0x74] sm:$0x1]  ;;  %v1749_v36 = vor.u32 %v1748_v30, %v1745_v26  ;;  %v1754_v32 = vrot.slane %v1752_v8, 5  ;;  %v1736_v56 = vrot.slane %v1735_v40, 4 }
 0x131   :  { %v3204_v57 = vpop.f32.mrf.mxu3  ;;  %5325 = vst [vmem:[#allocation7_spill] sm:$0xff] %v5170_v49  ;;  %v1866_v12 = vld [vmem:[#allocation2 + $0x78] sm:$0xe]  ;;  %v1867_v7 = vld [vmem:[#allocation2 + $0x7c] sm:$0x1]  ;;  %v3531_v1 = vrot.slane %v1864_v15, 9 }
 0x132   :  { %v1750_v11 = vrot.slane %v1749_v36, 4  ;;  %v1950_v61 = vrot.slane %v1865_v41, 5  ;;  %v3532_v3 = vrot.slane %v1866_v12, 9  ;;  %v1954_v2 = vrot.slane %v1867_v7, 5  ;;  %v3709_v10 = vld [vmem:[#allocation3 + $0x15c] sm:$0xf0] }
 0x133   :  { %v1741_v22 = vsel %vm4678_vm11, %v1736_v56, %v1740_v4  ;;  %v1387_v8 = vld [vmem:[#allocation2 + $0x78] sm:$0xe]  ;;  %v1580_v19 = vld [vmem:[#allocation2 + $0x80] sm:$0xf]  ;;  %v1388_v0 = vld [vmem:[#allocation2 + $0x7c] sm:$0x1] }
 0x134   :  { %v3155_v13 = vpop.f32.mrf.mxu2  ;;  %v1755_v60 = vsel %vm4678_vm11, %v1750_v11, %v1754_v32  ;;  %1838 = vst [vmem:[#allocation3 + $0x184] sm:$0xf] %v1741_v22  ;;  %v1951_v31 = vsel %vm4684_vm13, %v3531_v1, %v1950_v61  ;;  %v1389_v20 = vld [vmem:[#allocation2 + $0x80] sm:$0xe]  ;;  %v1582_v26 = vld [vmem:[#allocation2 + $0x88] sm:$0xf] }
 0x135   :  { %v3156_v37 = vadd.f32 %v3155_v13, %v3107_v44  ;;  %v4152_v44 = vld [vmem:[#allocation3 + $0x13c] sm:$0xf]  ;;  %1839 = vst [vmem:[#allocation3 + $0x1a8] sm:$0xf] %v1755_v60  ;;  %v1581_v13 = vld [vmem:[#allocation2 + $0x84] sm:$0x1] }
 0x136   :  { %1998 = vst [vmem:[#allocation3 + $0x188] sm:$0xf] %v1951_v31  ;;  %v1390_v11 = vld [vmem:[#allocation2 + $0x84] sm:$0x1]  ;;  %v1477_v40 = vrot.slane %v1388_v0, 5  ;;  %v3712_v61 = vor.u32 %v4152_v44, %v3709_v10  ;;  %v1757_v7 = vshrl.u32 %v1580_v19, 16 }
 0x137   :  { %v3205_v55 = vadd.f32 %v3204_v57, %v3156_v37  ;;  %v3108_v49 = vpop.f32.mrf.mxu1  ;;  %v1955_v57 = vsel %vm4684_vm13, %v3532_v3, %v1954_v2  ;;  %v3517_v37 = vrot.slane %v1387_v8, 9  ;;  %v3518_v3 = vrot.slane %v1389_v20, 9  ;;  %v1536_v41 = vld [vmem:[#allocation2 + $0x80] sm:$0xf]  ;;  %v1583_v36 = vld [vmem:[#allocation2 + $0x8c] sm:$0x1] }
 0x138   :  { %3443 = vmatmul.bf16.gmra.mxu0 %v3680_v21  ;;  %3350 = vmatmul.bf16.gmra.mxu2 %v3708_v59  ;;  %v3109_v16 = vadd.f32 %v3108_v49, %v4989_v42  ;;  %1999 = vst [vmem:[#allocation3 + $0x1ac] sm:$0xf] %v1955_v57  ;;  %v1481_v15 = vrot.slane %v1390_v11, 5  ;;  %v1537_v49 = vld [vmem:[#allocation2 + $0x88] sm:$0xf]  ;;  %v1760_v59 = vshll.u32 %v1580_v19, 16 }
 0x139   :  { %v3206_v14 = vpop.f32.mrf.mxu3  ;;  %v1478_v42 = vsel %vm4684_vm13, %v3517_v37, %v1477_v40  ;;  %1552 = vst [vmem:[#allocation3 + $0x1c8] sm:$0xf] %v1536_v41  ;;  %v1766_v56 = vshll.u32 %v1581_v13, 16  ;;  %v1771_v1 = vshrl.u32 %v1582_v26, 16  ;;  %v1774_v2 = vshll.u32 %v1582_v26, 16 }
 0x13a   :  { %3301 = vmatmul.bf16.gmra.mxu1 %v3704_v43  ;;  %v1482_v12 = vsel %vm4684_vm13, %v3518_v3, %v1481_v15  ;;  %1519 = vst [vmem:[#allocation3 + $0x1c4] sm:$0xf] %v1478_v42  ;;  %v1780_v43 = vshll.u32 %v1583_v36, 16  ;;  %v3715_v44 = vld [vmem:[#allocation3 + $0x140] sm:$0xf]  ;;  %v1759_v22 = vrot.slane %v1757_v7, 4 }
 0x13b   :  { %v3253_v21 = vpop.f32.mrf.mxu0  ;;  %1520 = vst [vmem:[#allocation3 + $0x1e8] sm:$0xf] %v1482_v12  ;;  %v4157_v10 = vld [vmem:[#allocation3 + $0x160] sm:$0xf0]  ;;  %v1762_v60 = vrot.slane %v1760_v59, 5  ;;  %v1773_v0 = vrot.slane %v1771_v1, 4 }
 0x13c   :  { %v3157_v30 = vpop.f32.mrf.mxu2  ;;  %1553 = vst [vmem:[#allocation3 + $0x1ec] sm:$0xf] %v1537_v49  ;;  %v1868_v31 = vld [vmem:[#allocation2 + $0x80] sm:$0xe]  ;;  %v5185_v57 = vadd.f32 %v3253_v21, %v3205_v55  ;;  %v1776_v20 = vrot.slane %v1774_v2, 5  ;;  %v1782_v37 = vrot.slane %v1780_v43, 5  ;;  %v3716_v49 = vor.u32 %v4157_v10, %v3715_v44 }
 0x13d   :  { %v3158_v4 = vadd.f32 %v3157_v30, %v3109_v16  ;;  %v3743_v16 = vld [vmem:[#allocation3 + $0x180] sm:$0xf]  ;;  %v1763_v19 = vor.u32 %v1762_v60, %v1759_v22  ;;  %v1768_v30 = vrot.slane %v1766_v56, 5  ;;  %v1869_v13 = vld [vmem:[#allocation2 + $0x84] sm:$0x1] }
 0x13e   :  { %3399 = vmatmul.bf16.gmra.mxu3 %v3712_v61  ;;  %v1870_v11 = vld [vmem:[#allocation2 + $0x88] sm:$0xe]  ;;  %v1777_v26 = vor.u32 %v1776_v20, %v1773_v0  ;;  %v1871_v40 = vld [vmem:[#allocation2 + $0x8c] sm:$0x1]  ;;  %v3533_v61 = vrot.slane %v1868_v31, 9 }
 0x13f   :  { %v3207_v32 = vadd.f32 %v3206_v14, %v3158_v4  ;;  %v4165_v14 = vld [vmem:[#allocation3 + $0x1a0] sm:$0xf0]  ;;  %v1958_v4 = vrot.slane %v1869_v13, 5  ;;  %v4160_v15 = vld [vmem:[#allocation3 + $0x17c] sm:$0xf]  ;;  %v1764_v55 = vrot.slane %v1763_v19, 4 }
 0x140   :  { %v3111_v8 = vpop.f32.mrf.mxu1  ;;  %v3534_v21 = vrot.slane %v1870_v11, 9  ;;  %v1962_v42 = vrot.slane %v1871_v40, 5  ;;  %v3737_v12 = vld [vmem:[#allocation3 + $0x19c] sm:$0xf0]  ;;  %v3744_v7 = vor.u32 %v4165_v14, %v3743_v16  ;;  %v1778_v56 = vrot.slane %v1777_v26, 4 }
 0x141   :  { %v3112_v3 = vadd.f32 %v3111_v8, %v5025_v24  ;;  %v3209_v41 = vpop.f32.mrf.mxu3  ;;  %v1959_v1 = vsel %vm4684_vm13, %v3533_v61, %v1958_v4  ;;  %v1584_v2 = vld [vmem:[#allocation2 + $0x90] sm:$0xf]  ;;  %v4161_v43 = vld [vmem:[#allocation3 + $0x184] sm:$0xf]  ;;  %v3745_v22 = vld [vmem:[#allocation3 + $0x1a4] sm:$0xf0]  ;;  %v1769_v24 = vsel %vm4678_vm11, %v1764_v55, %v1768_v30  ;;  %v3740_v14 = vor.u32 %v4160_v15, %v3737_v12 }
 0x142   :  { %v1963_v31 = vsel %vm4684_vm13, %v3534_v21, %v1962_v42  ;;  %2000 = vst [vmem:[#allocation3 + $0x1d0] sm:$0xf] %v1959_v1  ;;  %v1783_v10 = vsel %vm4678_vm11, %v1778_v56, %v1782_v37  ;;  %v1585_v8 = vld [vmem:[#allocation2 + $0x94] sm:$0x1]  ;;  %v1586_v16 = vld [vmem:[#allocation2 + $0x98] sm:$0xf] }
 0x143   :  { %v3255_v36 = vpop.f32.mrf.mxu0  ;;  %1840 = vst [vmem:[#allocation3 + $0x1cc] sm:$0xf] %v1769_v24  ;;  %v1587_v20 = vld [vmem:[#allocation2 + $0x9c] sm:$0x1]  ;;  %v1785_v19 = vshrl.u32 %v1584_v2, 16  ;;  %v1788_v13 = vshll.u32 %v1584_v2, 16 }
 0x144   :  { %v3160_v59 = vpop.f32.mrf.mxu2  ;;  %v5194_v44 = vadd.f32 %v3255_v36, %v3207_v32  ;;  %1841 = vst [vmem:[#allocation3 + $0x1f0] sm:$0xf] %v1783_v10  ;;  %v1391_v11 = vld [vmem:[#allocation2 + $0x88] sm:$0xe]  ;;  %v1392_v26 = vld [vmem:[#allocation2 + $0x8c] sm:$0x1]  ;;  %v3748_v32 = vor.u32 %v4161_v43, %v3745_v22 }
 0x145   :  { %v3161_v60 = vadd.f32 %v3160_v59, %v3112_v3  ;;  %2001 = vst [vmem:[#allocation3 + $0x1f4] sm:$0xf] %v1963_v31  ;;  %v1393_v40 = vld [vmem:[#allocation2 + $0x90] sm:$0xe]  ;;  %v1394_v61 = vld [vmem:[#allocation2 + $0x94] sm:$0x1] }
 0x146   :  { %v3519_v4 = vrot.slane %v1391_v11, 9  ;;  %v1485_v37 = vrot.slane %v1392_v26, 5  ;;  %v3520_v3 = vrot.slane %v1393_v40, 9  ;;  %v1489_v55 = vrot.slane %v1394_v61, 5  ;;  %v1872_v59 = vld [vmem:[#allocation2 + $0x90] sm:$0xe] }
 0x147   :  { %v3210_v0 = vadd.f32 %v3209_v41, %v3161_v60  ;;  %v1787_v21 = vrot.slane %v1785_v19, 4  ;;  %v1790_v15 = vrot.slane %v1788_v13, 5  ;;  %v1794_v36 = vshll.u32 %v1585_v8, 16  ;;  %v1539_v2 = vld [vmem:[#allocation2 + $0x98] sm:$0xf] }
 0x148   :  { %3448 = vmatmul.bf16.gmra.mxu0 %v3716_v49  ;;  %v3113_v30 = vpop.f32.mrf.mxu1  ;;  %3355 = vmatmul.bf16.gmra.mxu2 %v3744_v7  ;;  %v1486_v42 = vsel %vm4684_vm13, %v3519_v4, %v1485_v37  ;;  %v1538_v49 = vld [vmem:[#allocation2 + $0x90] sm:$0xf]  ;;  %v1799_v12 = vshrl.u32 %v1586_v16, 16  ;;  %v1490_v1 = vsel %vm4684_vm13, %v3520_v3, %v1489_v55  ;;  %v1802_v22 = vshll.u32 %v1586_v16, 16  ;;  %v3751_v13 = vld [vmem:[#allocation3 + $0x188] sm:$0xf] }
 0x149   :  { %v3114_v41 = vadd.f32 %v3113_v30, %v5052_v62  ;;  %1521 = vst [vmem:[#allocation3 + $0x20c] sm:$0xf] %v1486_v42  ;;  %v1791_v43 = vor.u32 %v1790_v15, %v1787_v21  ;;  %v1808_v60 = vshll.u32 %v1587_v20, 16  ;;  %v1796_v62 = vrot.slane %v1794_v36, 5  ;;  %v4166_v30 = vld [vmem:[#allocation3 + $0x1a8] sm:$0xf0] }
 0x14a   :  { %3306 = vmatmul.bf16.gmra.mxu1 %v3740_v14  ;;  %1522 = vst [vmem:[#allocation3 + $0x230] sm:$0xf] %v1490_v1  ;;  %v1801_v31 = vrot.slane %v1799_v12, 4  ;;  %v3211_v14 = vpop.f32.mrf.mxu3  ;;  %v1804_v19 = vrot.slane %v1802_v22, 5  ;;  %v3535_v40 = vrot.slane %v1872_v59, 9 }
 0x14b   :  { %1554 = vst [vmem:[#allocation3 + $0x210] sm:$0xf] %v1538_v49  ;;  %v1792_v8 = vrot.slane %v1791_v43, 4  ;;  %v1810_v26 = vrot.slane %v1808_v60, 5  ;;  %v1873_v61 = vld [vmem:[#allocation2 + $0x94] sm:$0x1]  ;;  %v3752_v49 = vor.u32 %v4166_v30, %v3751_v13 }
 0x14c   :  { %v3258_v7 = vpop.f32.mrf.mxu0  ;;  %v3162_v56 = vpop.f32.mrf.mxu2  ;;  %1555 = vst [vmem:[#allocation3 + $0x234] sm:$0xf] %v1539_v2  ;;  %v1805_v20 = vor.u32 %v1804_v19, %v1801_v31  ;;  %v1874_v4 = vld [vmem:[#allocation2 + $0x98] sm:$0xe]  ;;  %v1875_v37 = vld [vmem:[#allocation2 + $0x9c] sm:$0x1] }
 0x14d   :  { %v3163_v24 = vadd.f32 %v3162_v56, %v3114_v41  ;;  %v5203_v10 = vadd.f32 %v3258_v7, %v3210_v0  ;;  %v1797_v16 = vsel %vm4678_vm11, %v1792_v8, %v1796_v62  ;;  %v1966_v0 = vrot.slane %v1873_v61, 5  ;;  %v3779_v21 = vld [vmem:[#allocation3 + $0x1c8] sm:$0xf]  ;;  %v4174_v15 = vld [vmem:[#allocation3 + $0x1e8] sm:$0xf0] }
 0x14e   :  { %3404 = vmatmul.bf16.gmra.mxu3 %v3748_v32  ;;  %1842 = vst [vmem:[#allocation3 + $0x214] sm:$0xf] %v1797_v16  ;;  %v3536_v3 = vrot.slane %v1874_v4, 9  ;;  %v1970_v55 = vrot.slane %v1875_v37, 5  ;;  %v1806_v32 = vrot.slane %v1805_v20, 4  ;;  %v3780_v56 = vor.u32 %v4174_v15, %v3779_v21 }
 0x14f   :  { %v3212_v11 = vadd.f32 %v3211_v14, %v3163_v24  ;;  %v1967_v41 = vsel %vm4684_vm13, %v3535_v40, %v1966_v0  ;;  %v4169_v12 = vld [vmem:[#allocation3 + $0x1c4] sm:$0xf]  ;;  %v3773_v59 = vld [vmem:[#allocation3 + $0x1e4] sm:$0xf0]  ;;  %v4170_v22 = vld [vmem:[#allocation3 + $0x1cc] sm:$0xf] }
 0x150   :  { %v1971_v42 = vsel %vm4684_vm13, %v3536_v3, %v1970_v55  ;;  %v1811_v7 = vsel %vm4678_vm11, %v1806_v32, %v1810_v26  ;;  %2002 = vst [vmem:[#allocation3 + $0x218] sm:$0xf] %v1967_v41  ;;  %v3776_v2 = vor.u32 %v4169_v12, %v3773_v59  ;;  %v3781_v60 = vld [vmem:[#allocation3 + $0x1ec] sm:$0xf0]  ;;  %v4175_v30 = vld [vmem:[#allocation3 + $0x1f0] sm:$0xf0] }
 0x151   :  { %1843 = vst [vmem:[#allocation3 + $0x238] sm:$0xf] %v1811_v7  ;;  %v3784_v24 = vor.u32 %v4170_v22, %v3781_v60  ;;  %v3787_v13 = vld [vmem:[#allocation3 + $0x1d0] sm:$0xf] }
 0x152   :  { %2003 = vst [vmem:[#allocation3 + $0x23c] sm:$0xf] %v1971_v42  ;;  %v3214_v31 = vpop.f32.mrf.mxu3  ;;  %v3815_v26 = vld [vmem:[#allocation3 + $0x210] sm:$0xf]  ;;  %v3788_v20 = vor.u32 %v4175_v30, %v3787_v13 }
 0x153   :  { %v4183_v40 = vld [vmem:[#allocation3 + $0x230] sm:$0xf0]  ;;  %v3809_v4 = vld [vmem:[#allocation3 + $0x22c] sm:$0xf0] }
 0x154   :  { %v3260_v36 = vpop.f32.mrf.mxu0  ;;  %v3816_v0 = vor.u32 %v4183_v40, %v3815_v26 }
 0x155   :  { %v5213_v1 = vadd.f32 %v3260_v36, %v3212_v11  ;;  %v4179_v41 = vld [vmem:[#allocation3 + $0x214] sm:$0xf] }
 0x156   :  { %v3116_v43 = vpop.f32.mrf.mxu1 }
 0x157   :  { %v3117_v52 = vadd.f32 %v3116_v43, %v4968_v33  ;;  %v4178_v33 = vld [vmem:[#allocation3 + $0x20c] sm:$0xf] }
 0x158   :  { %3453 = vmatmul.bf16.gmra.mxu0 %v3752_v49  ;;  %3360 = vmatmul.bf16.gmra.mxu2 %v3780_v56  ;;  %v3812_v21 = vor.u32 %v4178_v33, %v3809_v4  ;;  %v3817_v42 = vld [vmem:[#allocation3 + $0x234] sm:$0xf0] }
 0x159   :  { %v3823_v56 = vld [vmem:[#allocation3 + $0x218] sm:$0xf] }
 0x15a   :  { %3311 = vmatmul.bf16.gmra.mxu1 %v3776_v2  ;;  %v3216_v3 = vpop.f32.mrf.mxu3  ;;  %v4184_v2 = vld [vmem:[#allocation3 + $0x238] sm:$0xf0] }
 0x15b   :  { %v3165_v62 = vpop.f32.mrf.mxu2 }
 0x15c   :  { %v3166_v47 = vadd.f32 %v3165_v62, %v3117_v52  ;;  %v3824_v52 = vor.u32 %v4184_v2, %v3823_v56 }
 0x15d   :  { %v3263_v14 = vpop.f32.mrf.mxu0 }
 0x15e   :  { %3409 = vmatmul.bf16.gmra.mxu3 %v3784_v24  ;;  %v3215_v8 = vadd.f32 %v3214_v31, %v3166_v47  ;;  %v3118_v19 = vpop.f32.mrf.mxu1 }
 0x15f   :  { %v3119_v16 = vadd.f32 %v3118_v19, %v4991_v39  ;;  %v3820_v39 = vor.u32 %v4179_v41, %v3817_v42 }
 0x160   :  { %v5216_v11 = vadd.f32 %v3263_v14, %v3215_v8  ;;  %v3089_v14 = vadd.f32 %v5066_v29, %v4985_v34 }
 0x162   :  { %v3138_v19 = vadd.f32 %v5076_v38, %v3089_v14 }
 0x163   :  { %v3167_v61 = vpop.f32.mrf.mxu2 }
 0x164   :  { %v3168_v37 = vadd.f32 %v3167_v61, %v3119_v16  ;;  %v3187_v16 = vadd.f32 %v5078_v46, %v3138_v19 }
 0x165   :  { %v3265_v15 = vpop.f32.mrf.mxu0 }
 0x166   :  { %v3217_v55 = vadd.f32 %v3216_v3, %v3168_v37  ;;  %v3236_v37 = vadd.f32 %v5085_v58, %v3187_v16 }
 0x167   :  { %v3121_v32 = vpop.f32.mrf.mxu1 }
 0x168   :  { %3458 = vmatmul.bf16.gmra.mxu0 %v3788_v20  ;;  %3365 = vmatmul.bf16.gmra.mxu2 %v3816_v0  ;;  %v5219_v49 = vadd.f32 %v3265_v15, %v3217_v55  ;;  %v3122_v36 = vadd.f32 %v3121_v32, %v5027_v25  ;;  %v3094_v55 = vadd.f32 %v5091_v51, %v5056_v6 }
 0x16a   :  { %3316 = vmatmul.bf16.gmra.mxu1 %v3812_v21  ;;  %v3143_v21 = vadd.f32 %v5103_v9, %v3094_v55 }
 0x16b   :  { %v3170_v12 = vpop.f32.mrf.mxu2 }
 0x16c   :  { %v3171_v59 = vadd.f32 %v3170_v12, %v3122_v36  ;;  %v3192_v36 = vadd.f32 %v5105_v27, %v3143_v21  ;;  %v3099_v27 = vadd.f32 %v5120_v53, %v4971_v50 }
 0x16e   :  { %3414 = vmatmul.bf16.gmra.mxu3 %v3820_v39  ;;  %v3241_v6 = vadd.f32 %v5111_v18, %v3192_v36 }
 0x16f   :  { %v3123_v7 = vpop.f32.mrf.mxu1 }
 0x170   :  { %v3124_v60 = vadd.f32 %v3123_v7, %v5054_v63 }
 0x171   :  { %v3219_v43 = vpop.f32.mrf.mxu3 }
 0x172   :  { %v3220_v22 = vadd.f32 %v3219_v43, %v3171_v59 }
 0x173   :  { %v3172_v24 = vpop.f32.mrf.mxu2 }
 0x174   :  { %v3173_v31 = vadd.f32 %v3172_v24, %v3124_v60  ;;  %v3148_v60 = vadd.f32 %v5128_v23, %v3099_v27 }
 0x175   :  { %v3268_v62 = vpop.f32.mrf.mxu0 }
 0x176   :  { %v5223_v47 = vadd.f32 %v3268_v62, %v3220_v22 }
 0x177   :  { %v3282_v25 = vpop.f32.mrf.mxu1 }
 0x178   :  { %3463 = vmatmul.bf16.gmra.mxu0 %v3824_v52  ;;  %v3283_v40 = vadd.f32 %v3282_v25, %v5080_v45  ;;  %v3197_v25 = vadd.f32 %v5132_v54, %v3148_v60  ;;  %v3104_v54 = vadd.f32 %v5149_v28, %v5032_v35  ;;  %v5329_v35 = vld [vmem:[#allocation7_spill] sm:$0xff] }
 0x179   :  { %v3221_v8 = vpop.f32.mrf.mxu3 }
 0x17a   :  { %v3222_v13 = vadd.f32 %v3221_v8, %v3173_v31  ;;  %v3246_v50 = vadd.f32 %v5137_v17, %v3197_v25  ;;  %v5327_v17 = vld [vmem:[#allocation4_spill] sm:$0xff] }
 0x17b   :  { %v3331_v30 = vpop.f32.mrf.mxu2 }
 0x17c   :  { %v3332_v20 = vadd.f32 %v3331_v30, %v3283_v40 }
 0x17d   :  { %v3270_v26 = vpop.f32.mrf.mxu0 }
 0x17e   :  { %v5229_v63 = vadd.f32 %v3270_v26, %v3222_v13 }
 0x17f   :  { %v3284_v61 = vpop.f32.mrf.mxu1 }
 0x180   :  { %v3285_v29 = vadd.f32 %v3284_v61, %v3236_v37 }
 0x181   :  { %v3380_v33 = vpop.f32.mrf.mxu3 }
 0x182   :  { %v3381_v4 = vadd.f32 %v3380_v33, %v3332_v20  ;;  %v5326_v20 = vld [vmem:[#allocation5_spill] sm:$0xff] }
 0x183   :  { %v3333_v0 = vpop.f32.mrf.mxu2  ;;  %v3153_v61 = vadd.f32 %v5326_v20, %v3104_v54 }
 0x184   :  { %v3334_v38 = vadd.f32 %v3333_v0, %v3285_v29  ;;  %v5328_v29 = vld [vmem:[#allocation6_spill] sm:$0xff] }
 0x185   :  { %v3429_v34 = vpop.f32.mrf.mxu0 }
 0x186   :  { %v3430_v3 = vadd.f32 %v3429_v34, %v3381_v4 }
 0x187   :  { %v3287_v45 = vpop.f32.mrf.mxu1 }
 0x188   :  { %3469 = vst [vmem:[%s5311_s4] sm:$0xff] %v3430_v3  ;;  %v3288_v58 = vadd.f32 %v3287_v45, %v5093_v5  ;;  %v3202_v3 = vadd.f32 %v5328_v29, %v3153_v61 }
 0x189   :  { %v3382_v46 = vpop.f32.mrf.mxu3 }
 0x18a   :  { %v3383_v15 = vadd.f32 %v3382_v46, %v3334_v38  ;;  %v3251_v28 = vadd.f32 %v5329_v35, %v3202_v3 }
 0x18b   :  { %v3336_v32 = vpop.f32.mrf.mxu2 }
 0x18c   :  { %v3337_v39 = vadd.f32 %v3336_v32, %v3288_v58 }
 0x18d   :  { %v3431_v41 = vpop.f32.mrf.mxu0 }
 0x18e   :  { %v3432_v42 = vadd.f32 %v3431_v41, %v3383_v15 }
 0x18f   :  { %v3289_v12 = vpop.f32.mrf.mxu1 }
 0x190   :  { %3470 = vst [vmem:[%s5311_s4 + $0x8] sm:$0xff] %v3432_v42  ;;  %v3290_v56 = vadd.f32 %v3289_v12, %v3241_v6 }
 0x191   :  { %v3385_v59 = vpop.f32.mrf.mxu3 }
 0x192   :  { %v3386_v7 = vadd.f32 %v3385_v59, %v3337_v39 }
 0x193   :  { %v3338_v51 = vpop.f32.mrf.mxu2 }
 0x194   :  { %v3339_v43 = vadd.f32 %v3338_v51, %v3290_v56 }
 0x195   :  { %v3434_v9 = vpop.f32.mrf.mxu0 }
 0x196   :  { %v3435_v2 = vadd.f32 %v3434_v9, %v3386_v7 }
 0x197   :  { %v3292_v5 = vpop.f32.mrf.mxu1 }
 0x198   :  { %3471 = vst [vmem:[%s5311_s4 + $0x10] sm:$0xff] %v3435_v2  ;;  %v3293_v18 = vadd.f32 %v3292_v5, %v5130_v48 }
 0x199   :  { %v3387_v22 = vpop.f32.mrf.mxu3 }
 0x19a   :  { %v3388_v52 = vadd.f32 %v3387_v22, %v3339_v43 }
 0x19b   :  { %v3341_v24 = vpop.f32.mrf.mxu2 }
 0x19c   :  { %v3342_v14 = vadd.f32 %v3341_v24, %v3293_v18 }
 0x19d   :  { %v3436_v62 = vpop.f32.mrf.mxu0 }
 0x19e   :  { %v3437_v31 = vadd.f32 %v3436_v62, %v3388_v52 }
 0x19f   :  { %v3294_v8 = vpop.f32.mrf.mxu1 }
 0x1a0   :  { %3472 = vst [vmem:[%s5311_s4 + $0x18] sm:$0xff] %v3437_v31  ;;  %v3295_v30 = vadd.f32 %v3294_v8, %v3246_v50 }
 0x1a1   :  { %v3390_v19 = vpop.f32.mrf.mxu3 }
 0x1a2   :  { %v3391_v13 = vadd.f32 %v3390_v19, %v3342_v14 }
 0x1a3   :  { %v3343_v53 = vpop.f32.mrf.mxu2 }
 0x1a4   :  { %v3344_v40 = vadd.f32 %v3343_v53, %v3295_v30 }
 0x1a5   :  { %v3439_v23 = vpop.f32.mrf.mxu0 }
 0x1a6   :  { %v3440_v26 = vadd.f32 %v3439_v23, %v3391_v13 }
 0x1a7   :  { %v3297_v48 = vpop.f32.mrf.mxu1 }
 0x1a8   :  { %3473 = vst [vmem:[%s5311_s4 + $0x20] sm:$0xff] %v3440_v26  ;;  %v3298_v0 = vadd.f32 %v3297_v48, %v5327_v17 }
 0x1a9   :  { %v3392_v16 = vpop.f32.mrf.mxu3 }
 0x1aa   :  { %v3393_v33 = vadd.f32 %v3392_v16, %v3344_v40 }
 0x1ab   :  { %v3346_v4 = vpop.f32.mrf.mxu2 }
 0x1ac   :  { %v3347_v38 = vadd.f32 %v3346_v4, %v3298_v0 }
 0x1ad   :  { %v3441_v37 = vpop.f32.mrf.mxu0 }
 0x1ae   :  { %v3442_v34 = vadd.f32 %v3441_v37, %v3393_v33 }
 0x1af   :  { %v3299_v45 = vpop.f32.mrf.mxu1 }
 0x1b0   :  { %3474 = vst [vmem:[%s5311_s4 + $0x28] sm:$0xff] %v3442_v34  ;;  %v3300_v32 = vadd.f32 %v3299_v45, %v3251_v28 }
 0x1b1   :  { %v3395_v55 = vpop.f32.mrf.mxu3 }
 0x1b2   :  { %v3396_v46 = vadd.f32 %v3395_v55, %v3347_v38 }
 0x1b3   :  { %v3348_v21 = vpop.f32.mrf.mxu2 }
 0x1b4   :  { %v3349_v58 = vadd.f32 %v3348_v21, %v3300_v32 }
 0x1b5   :  { %v3444_v15 = vpop.f32.mrf.mxu0 }
 0x1b6   :  { %v3445_v41 = vadd.f32 %v3444_v15, %v3396_v46 }
 0x1b7   :  { %v3302_v42 = vpop.f32.mrf.mxu1 }
 0x1b8   :  { %3475 = vst [vmem:[%s5311_s4 + $0x30] sm:$0xff] %v3445_v41  ;;  %v3303_v7 = vadd.f32 %v3302_v42, %v5185_v57 }
 0x1b9   :  { %v3397_v36 = vpop.f32.mrf.mxu3 }
 0x1ba   :  { %v3398_v39 = vadd.f32 %v3397_v36, %v3349_v58 }
 0x1bb   :  { %v3351_v12 = vpop.f32.mrf.mxu2 }
 0x1bc   :  { %v3352_v51 = vadd.f32 %v3351_v12, %v3303_v7 }
 0x1bd   :  { %v3446_v59 = vpop.f32.mrf.mxu0 }
 0x1be   :  { %v3447_v6 = vadd.f32 %v3446_v59, %v3398_v39 }
 0x1bf   :  { %v3304_v9 = vpop.f32.mrf.mxu1 }
 0x1c0   :  { %3476 = vst [vmem:[%s5311_s4 + $0x38] sm:$0xff] %v3447_v6  ;;  %v3305_v27 = vadd.f32 %v3304_v9, %v5194_v44 }
 0x1c1   :  { %v3400_v56 = vpop.f32.mrf.mxu3 }
 0x1c2   :  { %v3401_v2 = vadd.f32 %v3400_v56, %v3352_v51 }
 0x1c3   :  { %v3353_v43 = vpop.f32.mrf.mxu2 }
 0x1c4   :  { %v3354_v60 = vadd.f32 %v3353_v43, %v3305_v27 }
 0x1c5   :  { %v3449_v5 = vpop.f32.mrf.mxu0 }
 0x1c6   :  { %v3450_v22 = vadd.f32 %v3449_v5, %v3401_v2 }
 0x1c7   :  { %v3307_v57 = vpop.f32.mrf.mxu1 }
 0x1c8   :  { %3477 = vst [vmem:[%s5311_s4 + $0x40] sm:$0xff] %v3450_v22  ;;  %v3308_v31 = vadd.f32 %v3307_v57, %v5203_v10 }
 0x1c9   :  { %v3402_v52 = vpop.f32.mrf.mxu3 }
 0x1ca   :  { %v3403_v24 = vadd.f32 %v3402_v52, %v3354_v60 }
 0x1cb   :  { %v3356_v62 = vpop.f32.mrf.mxu2 }
 0x1cc   :  { %v3357_v14 = vadd.f32 %v3356_v62, %v3308_v31 }
 0x1cd   :  { %v3451_v18 = vpop.f32.mrf.mxu0 }
 0x1ce   :  { %v3452_v25 = vadd.f32 %v3451_v18, %v3403_v24 }
 0x1cf   :  { %v3309_v44 = vpop.f32.mrf.mxu1 }
 0x1d0   :  { %3478 = vst [vmem:[%s5311_s4 + $0x48] sm:$0xff] %v3452_v25  ;;  %v3310_v53 = vadd.f32 %v3309_v44, %v5213_v1 }
 0x1d1   :  { %v3405_v8 = vpop.f32.mrf.mxu3 }
 0x1d2   :  { %v3406_v19 = vadd.f32 %v3405_v8, %v3357_v14 }
 0x1d3   :  { %v3358_v13 = vpop.f32.mrf.mxu2 }
 0x1d4   :  { %v3359_v30 = vadd.f32 %v3358_v13, %v3310_v53 }
 0x1d5   :  { %v3454_v50 = vpop.f32.mrf.mxu0 }
 0x1d6   :  { %v3455_v23 = vadd.f32 %v3454_v50, %v3406_v19 }
 0x1d7   :  { %v3312_v10 = vpop.f32.mrf.mxu1 }
 0x1d8   :  { %3479 = vst [vmem:[%s5311_s4 + $0x50] sm:$0xff] %v3455_v23  ;;  %v3313_v16 = vadd.f32 %v3312_v10, %v5216_v11 }
 0x1d9   :  { %v3407_v26 = vpop.f32.mrf.mxu3 }
 0x1da   :  { %v3408_v40 = vadd.f32 %v3407_v26, %v3359_v30 }
 0x1db   :  { %v3361_v48 = vpop.f32.mrf.mxu2 }
 0x1dc   :  { %v3362_v61 = vadd.f32 %v3361_v48, %v3313_v16 }
 0x1dd   :  { %v3456_v54 = vpop.f32.mrf.mxu0 }
 0x1de   :  { %v3457_v20 = vadd.f32 %v3456_v54, %v3408_v40 }
 0x1df   :  { %v3314_v1 = vpop.f32.mrf.mxu1 }
 0x1e0   :  { %3480 = vst [vmem:[%s5311_s4 + $0x58] sm:$0xff] %v3457_v20  ;;  %v3315_v0 = vadd.f32 %v3314_v1, %v5219_v49 }
 0x1e1   :  { %v3410_v33 = vpop.f32.mrf.mxu3 }
 0x1e2   :  { %v3411_v4 = vadd.f32 %v3410_v33, %v3362_v61 }
 0x1e3   :  { %v3363_v37 = vpop.f32.mrf.mxu2 }
 0x1e4   :  { %v3364_v29 = vadd.f32 %v3363_v37, %v3315_v0 }
 0x1e5   :  { %v3459_v17 = vpop.f32.mrf.mxu0 }
 0x1e6   :  { %v3460_v34 = vadd.f32 %v3459_v17, %v3411_v4 }
 0x1e7   :  { %v3317_v11 = vpop.f32.mrf.mxu1 }
 0x1e8   :  { %3481 = vst [vmem:[%s5311_s4 + $0x60] sm:$0xff] %v3460_v34  ;;  %v3318_v46 = vadd.f32 %v3317_v11, %v5223_v47 }
 0x1e9   :  { %v3412_v3 = vpop.f32.mrf.mxu3 }
 0x1ea   :  { %v3413_v38 = vadd.f32 %v3412_v3, %v3364_v29 }
 0x1eb   :  { %v3366_v45 = vpop.f32.mrf.mxu2 }
 0x1ec   :  { %v3367_v28 = vadd.f32 %v3366_v45, %v3318_v46 }
 0x1ed   :  { %v3461_v55 = vpop.f32.mrf.mxu0 }
 0x1ee   :  { %v3462_v35 = vadd.f32 %v3461_v55, %v3413_v38 }
 0x1ef   :  { %v3319_v21 = vpop.f32.mrf.mxu1 }
 0x1f0   :  { %3482 = vst [vmem:[%s5311_s4 + $0x68] sm:$0xff] %v3462_v35  ;;  %v3320_v58 = vadd.f32 %v3319_v21, %v5229_v63 }
 0x1f1   :  { %v3415_v49 = vpop.f32.mrf.mxu3 }
 0x1f2   :  { %v3416_v15 = vadd.f32 %v3415_v49, %v3367_v28 }
 0x1f3   :  { %v3368_v32 = vpop.f32.mrf.mxu2 }
 0x1f4   :  { %v3369_v36 = vadd.f32 %v3368_v32, %v3320_v58 }
 0x1f5   :  { %v3464_v41 = vpop.f32.mrf.mxu0 }
 0x1f6   :  { %v3465_v42 = vadd.f32 %v3464_v41, %v3416_v15 }
 0x1f8   :  { %3483 = vst [vmem:[%s5311_s4 + $0x70] sm:$0xff] %v3465_v42 }
 0x1f9   :  { %v3417_v47 = vpop.f32.mrf.mxu3 }
 0x1fa   :  { %v3418_v39 = vadd.f32 %v3417_v47, %v3369_v36 }
 0x1fd   :  { %v3466_v12 = vpop.f32.mrf.mxu0 }
 0x1fe   :  { %v3467_v59 = vadd.f32 %v3466_v12, %v3418_v39 }
 0x200   :  { %3484 = vst [vmem:[%s5311_s4 + $0x78] sm:$0xff] %v3467_v59 }

</bundles_post_ra>
